<compile_context>
chip_gen: v7x
topology: tpu7x:2x2x1
jax: 0.10.0
libtpu: 0.0.40
codegen_flags: <defaults>
</compile_context>

<pallas_src>
import functools

import jax
import jax.numpy as jnp
from jax.experimental import pallas as pl
from jax.experimental.pallas import tpu as pltpu


_WHOLE_VMEM_BUDGET = 6 << 20   # conservative single-block budget (fits every TPU gen)


# ----------------------------------------------------------------------------
# Pallas kernel: fused  act(W @ X + b)   (transposed orientation, lane-dense M)
#   w: (P, K) bf16    x: (K, M) bf16    b: (P, 1) f32    out: (P, M)
# ----------------------------------------------------------------------------
def _matmul_bias_act_kernel(w_ref, x_ref, b_ref, o_ref, *, act):
    acc = jnp.dot(w_ref[...], x_ref[...], preferred_element_type=jnp.float32)
    acc = acc + b_ref[...]                      # (P, 1) broadcasts over lanes (M)
    if act == "relu":
        acc = jnp.maximum(acc, 0.0)
    elif act == "sigmoid":
        # Exact f32 sigmoid (parity with the PyTorch reference); exp lands on the
        # otherwise-idle EUP slot.
        acc = 1.0 / (1.0 + jnp.exp(-acc))
    o_ref[...] = acc.astype(o_ref.dtype)


def _pick_tile_m(m):
    """Largest lane tile (multiple of 128, <= 1024) that divides m; else pad to 512."""
    for t in (1024, 896, 768, 640, 512, 384, 256, 128):
        if m % t == 0:
            return t, 0
    return 512, (-m) % 512


def matmul_bias_act(w, x, b, act="none", out_dtype=jnp.bfloat16):
    """out = act(w @ x + b).  Output lane dim is M (= batch*spatial): lane-dense.

    Small problems run as one whole-array VMEM block (no per-step grid overhead).
    Large problems keep weight/bias resident and tile M on a parallel grid
    (double-buffered DMA; shards across both v7x TensorCores).
    """
    P, K = w.shape
    K2, M = x.shape
    assert K == K2, (K, K2)
    kernel = functools.partial(_matmul_bias_act_kernel, act=act)

    whole_bytes = (w.size * w.dtype.itemsize + x.size * x.dtype.itemsize
                   + b.size * b.dtype.itemsize
                   + P * M * jnp.dtype(out_dtype).itemsize)
    if whole_bytes <= _WHOLE_VMEM_BUDGET:
        return pl.pallas_call(
            kernel,
            out_shape=jax.ShapeDtypeStruct((P, M), out_dtype),
            in_specs=[pl.BlockSpec(memory_space=pltpu.MemorySpace.VMEM)] * 3,
            out_specs=pl.BlockSpec(memory_space=pltpu.MemorySpace.VMEM),
        )(w, x, b)

    # Scalability path: weight + bias stay resident, M is tiled (512-1024 lanes).
    tile_m, pad_m = _pick_tile_m(M)
    if pad_m:
        x = jnp.pad(x, ((0, 0), (0, pad_m)))
    mp = M + pad_m
    out = pl.pallas_call(
        kernel,
        out_shape=jax.ShapeDtypeStruct((P, mp), out_dtype),
        grid_spec=pltpu.PrefetchScalarGridSpec(
            num_scalar_prefetch=0,
            grid=(mp // tile_m,),
            in_specs=[pl.BlockSpec((P, K), lambda j: (0, 0)),        # weight: resident
                      pl.BlockSpec((K, tile_m), lambda j: (0, j)),   # activation: streamed
                      pl.BlockSpec((P, 1), lambda j: (0, 0))],       # bias: resident
            out_specs=pl.BlockSpec((P, tile_m), lambda j: (0, j))),
        compiler_params=pltpu.CompilerParams(
            dimension_semantics=("parallel",)),
    )(w, x, b)
    if pad_m:
        out = out[:, :M]
    return out


# ----------------------------------------------------------------------------
# Pallas kernel: all four Linear layers fused (encoder FC + bottleneck + decoder FC)
# ----------------------------------------------------------------------------
def _linear_chain_kernel(x_ref, w1, b1, w2, b2, w3, b3, w4, b4, o_ref):
    def fc(h, w_ref, b_ref, relu):
        a = jnp.dot(h, w_ref[...], preferred_element_type=jnp.float32) + b_ref[...]
        if relu:
            a = jnp.maximum(a, 0.0)
        return a.astype(jnp.bfloat16)

    h = fc(x_ref[...], w1, b1, True)     # Linear 2560 -> 128, ReLU
    h = fc(h, w2, b2, False)             # Linear  128 ->  18  (latent code)
    h = fc(h, w3, b3, True)              # Linear   18 -> 128, ReLU
    h = fc(h, w4, b4, True)              # Linear  128 -> 2560, ReLU (ReLU-after-Unflatten folded)
    o_ref[...] = h


def linear_chain(x, p):
    n = x.shape[0]
    weights = (p["el1_w"], p["el1_b"], p["el2_w"], p["el2_b"],
               p["dl1_w"], p["dl1_b"], p["dl2_w"], p["dl2_b"])
    w_bytes = sum(a.size * a.dtype.itemsize for a in weights)
    act_bytes = 2 * n * 2560 * 2   # x + out, bf16

    if w_bytes + act_bytes <= _WHOLE_VMEM_BUDGET:
        return pl.pallas_call(
            _linear_chain_kernel,
            out_shape=jax.ShapeDtypeStruct((n, 2560), jnp.bfloat16),
            in_specs=[pl.BlockSpec(memory_space=pltpu.MemorySpace.VMEM)] * 9,
            out_specs=pl.BlockSpec(memory_space=pltpu.MemorySpace.VMEM),
        )(x, *weights)

    # Large batch: tile over rows (samples), weights resident, parallel grid.
    tile_n = 256
    pad_n = (-n) % tile_n
    if pad_n:
        x = jnp.pad(x, ((0, pad_n), (0, 0)))
    n_p = n + pad_n
    w_specs = [pl.BlockSpec(a.shape, lambda i: (0, 0)) for a in weights]
    out = pl.pallas_call(
        _linear_chain_kernel,
        out_shape=jax.ShapeDtypeStruct((n_p, 2560), jnp.bfloat16),
        grid_spec=pltpu.PrefetchScalarGridSpec(
            num_scalar_prefetch=0,
            grid=(n_p // tile_n,),
            in_specs=[pl.BlockSpec((tile_n, 2560), lambda i: (i, 0))] + w_specs,
            out_specs=pl.BlockSpec((tile_n, 2560), lambda i: (i, 0))),
        compiler_params=pltpu.CompilerParams(
            dimension_semantics=("parallel",)),
    )(x, *weights)
    if pad_n:
        out = out[:n]
    return out


# ----------------------------------------------------------------------------
# XLA layout glue (small tensors only): transposed im2col, padding, pixel-shuffle
# ----------------------------------------------------------------------------
def _im2colT(xcf, k, stride, k_pad_to=None):
    """xcf: padded channels-first (C, N, Hp, Wp) -> (k*k*C [zero-padded to k_pad_to],
    N*Ho*Wo), rows in (kh, kw, cin) order."""
    c, n, hp, wp = xcf.shape
    ho = (hp - k) // stride + 1
    wo = (wp - k) // stride + 1
    m = n * ho * wo
    rows = []
    for kh in range(k):
        for kw in range(k):
            rows.append(
                xcf[:, :, kh:kh + stride * (ho - 1) + 1:stride,
                          kw:kw + stride * (wo - 1) + 1:stride].reshape(c, m))
    kk = k * k * c
    if k_pad_to is not None and k_pad_to > kk:
        rows.append(jnp.zeros((k_pad_to - kk, m), xcf.dtype))
    return jnp.concatenate(rows, axis=0), ho, wo


def conv2d_cf(xcf, wT, b, *, stride, pad, act):
    """PyTorch Conv2d(k=3) on channels-first (cin, n, h, w) -> (cout, n, ho, wo)."""
    cout, k_eff = wT.shape
    n = xcf.shape[1]
    xp = jnp.pad(xcf.astype(jnp.bfloat16), ((0, 0), (0, 0), (pad, pad), (pad, pad)))
    colsT, ho, wo = _im2colT(xp, 3, stride, k_pad_to=k_eff)
    out = matmul_bias_act(wT, colsT, b, act)          # (cout, n*ho*wo), lane-dense
    return out.reshape(cout, n, ho, wo)


def conv_transpose2d_cf(xcf, wT, b, *, act, out_dtype=jnp.bfloat16):
    """PyTorch ConvTranspose2d(k=3, s=2, p=1, op=1) via sub-pixel decomposition."""
    cin, n, h, w = xcf.shape
    cout = wT.shape[0] // 4
    xp = jnp.pad(xcf.astype(jnp.bfloat16), ((0, 0), (0, 0), (0, 1), (0, 1)))
    colsT, _, _ = _im2colT(xp, 2, 1)                  # (4*cin, n*h*w), rows = 4 shifts
    out = matmul_bias_act(wT, colsT, b, act, out_dtype=out_dtype)   # (4*cout, n*h*w)
    out = out.reshape(2, 2, cout, n, h, w)            # (dy, dx, cout, n, a, b)
    out = out.transpose(2, 3, 4, 0, 5, 1).reshape(cout, n, 2 * h, 2 * w)  # pixel shuffle
    return out


# ----------------------------------------------------------------------------
# Parameters: PyTorch-layout synthetic init, then one-time kernel-ready prep
# ----------------------------------------------------------------------------
def init_params(key):
    shapes = dict(
        ec1_w=(16, 1, 3, 3),   ec1_b=(16,),
        ec2_w=(32, 16, 3, 3),  ec2_b=(32,),
        ec3_w=(64, 32, 3, 3),  ec3_b=(64,),
        el1_w=(128, 2560),     el1_b=(128,),
        el2_w=(18, 128),       el2_b=(18,),
        dl1_w=(128, 18),       dl1_b=(128,),
        dl2_w=(2560, 128),     dl2_b=(2560,),
        dc1_w=(64, 32, 3, 3),  dc1_b=(32,),   # ConvTranspose weight: (Cin, Cout, kh, kw)
        dc2_w=(32, 16, 3, 3),  dc2_b=(16,),
        dc3_w=(16, 1, 3, 3),   dc3_b=(1,),
    )
    keys = jax.random.split(key, len(shapes))
    return {name: jax.random.normal(k, shp, jnp.float32) * 0.05
            for (name, shp), k in zip(shapes.items(), keys)}


def _conv_weightT(w):
    """(cout, cin, 3, 3) -> (cout, K) bf16, columns in (kh, kw, cin) order.
    K is zero-padded up to a multiple of 16 (bf16 sublane packing)."""
    cout, cin = w.shape[0], w.shape[1]
    wt = w.transpose(2, 3, 1, 0).reshape(9 * cin, cout).T
    k_pad = (-(9 * cin)) % 16
    if k_pad:
        wt = jnp.pad(wt, ((0, 0), (0, k_pad)))
    return wt.astype(jnp.bfloat16)


def _convT_weightT(wt):
    """(cin, cout, 3, 3) ConvTranspose weight -> sub-pixel matrix (4*cout, 4*cin) bf16.

    Row shifts r: 0=in[a,b], 1=in[a,b+1], 2=in[a+1,b], 3=in[a+1,b+1].
    Column parities p = 2*dy+dx give output pixel (2a+dy, 2b+dx).
    Derived from out[o] = sum in[i]*W[k] with o = 2*i - 1 + k (k=3, s=2, p=1, op=1).
    """
    cin, cout = wt.shape[0], wt.shape[1]
    z = jnp.zeros((cin, cout), jnp.float32)
    s = lambda ky, kx: wt[:, :, ky, kx].astype(jnp.float32)
    blocks = [
        [s(1, 1), s(1, 2), s(2, 1), s(2, 2)],   # from in[a,   b  ]
        [z,       s(1, 0), z,       s(2, 0)],   # from in[a,   b+1]
        [z,       z,       s(0, 1), s(0, 2)],   # from in[a+1, b  ]
        [z,       z,       z,       s(0, 0)],   # from in[a+1, b+1]
    ]
    return jnp.block(blocks).T.astype(jnp.bfloat16)   # (4*cout, 4*cin)


def prepare_params(p):
    """One-time conversion to kernel-ready layouts (hoisted out of the jitted forward)."""
    f32, bf = jnp.float32, jnp.bfloat16
    col = lambda b: b.reshape(-1, 1).astype(f32)
    row = lambda b: b.reshape(1, -1).astype(f32)
    return dict(
        ec1_w=_conv_weightT(p["ec1_w"]), ec1_b=col(p["ec1_b"]),
        ec2_w=_conv_weightT(p["ec2_w"]), ec2_b=col(p["ec2_b"]),
        ec3_w=_conv_weightT(p["ec3_w"]), ec3_b=col(p["ec3_b"]),
        el1_w=p["el1_w"].T.astype(bf), el1_b=row(p["el1_b"]),
        el2_w=p["el2_w"].T.astype(bf), el2_b=row(p["el2_b"]),
        dl1_w=p["dl1_w"].T.astype(bf), dl1_b=row(p["dl1_b"]),
        dl2_w=p["dl2_w"].T.astype(bf), dl2_b=row(p["dl2_b"]),
        dc1_w=_convT_weightT(p["dc1_w"]), dc1_b=jnp.tile(p["dc1_b"], 4).reshape(-1, 1).astype(f32),
        dc2_w=_convT_weightT(p["dc2_w"]), dc2_b=jnp.tile(p["dc2_b"], 4).reshape(-1, 1).astype(f32),
        dc3_w=_convT_weightT(p["dc3_w"]), dc3_b=jnp.tile(p["dc3_b"], 4).reshape(-1, 1).astype(f32),
    )


# ----------------------------------------------------------------------------
# Forward pass (7 pallas_call launches)
# ----------------------------------------------------------------------------
def autoencoder_forward(x_nchw, p):
    n = x_nchw.shape[0]
    x = x_nchw.transpose(1, 0, 2, 3).astype(jnp.bfloat16)          # NCHW -> channels-first (C, N, H, W)

    # ---- encoder convs ----
    x = conv2d_cf(x, p["ec1_w"], p["ec1_b"], stride=2, pad=1, act="relu")   # (16, n, 40, 16)
    x = conv2d_cf(x, p["ec2_w"], p["ec2_b"], stride=2, pad=1, act="relu")   # (32, n, 20,  8)
    x = conv2d_cf(x, p["ec3_w"], p["ec3_b"], stride=2, pad=1, act="relu")   # (64, n, 10,  4)

    # ---- Flatten (PyTorch (C,H,W) order) + fused Linear chain + Unflatten ----
    x = x.transpose(1, 0, 2, 3).reshape(n, 2560)                   # tiny (n, 2560) relayout
    y = linear_chain(x, p)                                         # (n, 2560) bf16
    y = y.reshape(n, 64, 10, 4).transpose(1, 0, 2, 3)              # channels-first (64, n, 10, 4)

    # ---- decoder transposed convs (sub-pixel) ----
    y = conv_transpose2d_cf(y, p["dc1_w"], p["dc1_b"], act="relu")       # (32, n, 20,  8)
    y = conv_transpose2d_cf(y, p["dc2_w"], p["dc2_b"], act="relu")       # (16, n, 40, 16)
    y = conv_transpose2d_cf(y, p["dc3_w"], p["dc3_b"], act="sigmoid")    # ( 1, n, 80, 32) bf16

    # Back to NCHW; upcast to f32 only here (keeps the largest store/pixel-shuffle
    # traffic half-width — sigmoid values live in [0, 1]).
    return y.transpose(1, 0, 2, 3).astype(jnp.float32)


if __name__ == "__main__":
    x = jax.random.normal(jax.random.PRNGKey(0), (2, 1, 80, 32), jnp.float32)
    params = prepare_params(init_params(jax.random.PRNGKey(42)))   # one-time, outside jit

    fwd = jax.jit(autoencoder_forward)
    out = jax.block_until_ready(fwd(x, params))

    assert out.shape == (2, 1, 80, 32), out.shape
    assert out.dtype == jnp.float32
    assert bool(jnp.all((out >= 0.0) & (out <= 1.0)))  # sigmoid output range
    print("KERNEL_OK")
</pallas_src>

<mosaic_0001>
module attributes {stable_mosaic.version = 11 : i64} {
  func.func @_matmul_bias_act_kernel(%arg0: memref<16x16xbf16, #tpu.memory_space<vmem>>, %arg1: memref<16x1280xbf16, #tpu.memory_space<vmem>>, %arg2: memref<16x1xf32, #tpu.memory_space<vmem>>, %arg3: memref<16x1280xbf16, #tpu.memory_space<vmem>>) attributes {dimension_semantics = [], scalar_prefetch = 0 : i64, scratch_operands = 0 : i64, tpu.core_type = #tpu.core_type<tc>} {
    %c0 = arith.constant 0 : index
    %c0_0 = arith.constant 0 : index
    %0 = vector.load %arg0[%c0, %c0_0] : memref<16x16xbf16, #tpu.memory_space<vmem>>, vector<16x16xbf16>
    %c0_1 = arith.constant 0 : index
    %c0_2 = arith.constant 0 : index
    %1 = vector.load %arg1[%c0_1, %c0_2] : memref<16x1280xbf16, #tpu.memory_space<vmem>>, vector<16x1280xbf16>
    %cst = arith.constant dense<0.000000e+00> : vector<16x1280xf32>
    %2 = tpu.matmul %0, %1, %cst {dimension_numbers = #tpu.dot_dimension_numbers<[1], [0], [0], [1], [0, 0, 1, 1], [], []>} : vector<16x16xbf16>, vector<16x1280xbf16>, vector<16x1280xf32> -> vector<16x1280xf32>
    %c0_3 = arith.constant 0 : index
    %c0_4 = arith.constant 0 : index
    %3 = vector.load %arg2[%c0_3, %c0_4] : memref<16x1xf32, #tpu.memory_space<vmem>>, vector<16x1xf32>
    %4 = vector.broadcast %3 : vector<16x1xf32> to vector<16x1280xf32>
    %5 = arith.addf %2, %4 : vector<16x1280xf32>
    %cst_5 = arith.constant 0.000000e+00 : f32
    %6 = vector.broadcast %cst_5 : f32 to vector<16x1280xf32>
    %7 = arith.maximumf %5, %6 : vector<16x1280xf32>
    %8 = arith.truncf %7 : vector<16x1280xf32> to vector<16x1280xbf16>
    %c0_6 = arith.constant 0 : index
    %c0_7 = arith.constant 0 : index
    %9 = vector.load %arg3[%c0_6, %c0_7] : memref<16x1280xbf16, #tpu.memory_space<vmem>>, vector<16x1280xbf16>
    tpu.vector_store %arg3[%c0_6, %c0_7], %8 {strides = array<i32>} : memref<16x1280xbf16, #tpu.memory_space<vmem>>, vector<16x1280xbf16>,
    return
  }
}

module attributes {stable_mosaic.version = 11 : i64} {
  func.func @_matmul_bias_act_kernel(%arg0: memref<32x144xbf16, #tpu.memory_space<vmem>>, %arg1: memref<144x320xbf16, #tpu.memory_space<vmem>>, %arg2: memref<32x1xf32, #tpu.memory_space<vmem>>, %arg3: memref<32x320xbf16, #tpu.memory_space<vmem>>) attributes {dimension_semantics = [], scalar_prefetch = 0 : i64, scratch_operands = 0 : i64, tpu.core_type = #tpu.core_type<tc>} {
    %c0 = arith.constant 0 : index
    %c0_0 = arith.constant 0 : index
    %0 = vector.load %arg0[%c0, %c0_0] : memref<32x144xbf16, #tpu.memory_space<vmem>>, vector<32x144xbf16>
    %c0_1 = arith.constant 0 : index
    %c0_2 = arith.constant 0 : index
    %1 = vector.load %arg1[%c0_1, %c0_2] : memref<144x320xbf16, #tpu.memory_space<vmem>>, vector<144x320xbf16>
    %cst = arith.constant dense<0.000000e+00> : vector<32x320xf32>
    %2 = tpu.matmul %0, %1, %cst {dimension_numbers = #tpu.dot_dimension_numbers<[1], [0], [0], [1], [0, 0, 1, 1], [], []>} : vector<32x144xbf16>, vector<144x320xbf16>, vector<32x320xf32> -> vector<32x320xf32>
    %c0_3 = arith.constant 0 : index
    %c0_4 = arith.constant 0 : index
    %3 = vector.load %arg2[%c0_3, %c0_4] : memref<32x1xf32, #tpu.memory_space<vmem>>, vector<32x1xf32>
    %4 = vector.broadcast %3 : vector<32x1xf32> to vector<32x320xf32>
    %5 = arith.addf %2, %4 : vector<32x320xf32>
    %cst_5 = arith.constant 0.000000e+00 : f32
    %6 = vector.broadcast %cst_5 : f32 to vector<32x320xf32>
    %7 = arith.maximumf %5, %6 : vector<32x320xf32>
    %8 = arith.truncf %7 : vector<32x320xf32> to vector<32x320xbf16>
    %c0_6 = arith.constant 0 : index
    %c0_7 = arith.constant 0 : index
    %9 = vector.load %arg3[%c0_6, %c0_7] : memref<32x320xbf16, #tpu.memory_space<vmem>>, vector<32x320xbf16>
    tpu.vector_store %arg3[%c0_6, %c0_7], %8 {strides = array<i32>} : memref<32x320xbf16, #tpu.memory_space<vmem>>, vector<32x320xbf16>,
    return
  }
}

module attributes {stable_mosaic.version = 11 : i64} {
  func.func @_matmul_bias_act_kernel(%arg0: memref<64x288xbf16, #tpu.memory_space<vmem>>, %arg1: memref<288x80xbf16, #tpu.memory_space<vmem>>, %arg2: memref<64x1xf32, #tpu.memory_space<vmem>>, %arg3: memref<64x80xbf16, #tpu.memory_space<vmem>>) attributes {dimension_semantics = [], scalar_prefetch = 0 : i64, scratch_operands = 0 : i64, tpu.core_type = #tpu.core_type<tc>} {
    %c0 = arith.constant 0 : index
    %c0_0 = arith.constant 0 : index
    %0 = vector.load %arg0[%c0, %c0_0] : memref<64x288xbf16, #tpu.memory_space<vmem>>, vector<64x288xbf16>
    %c0_1 = arith.constant 0 : index
    %c0_2 = arith.constant 0 : index
    %1 = vector.load %arg1[%c0_1, %c0_2] : memref<288x80xbf16, #tpu.memory_space<vmem>>, vector<288x80xbf16>
    %cst = arith.constant dense<0.000000e+00> : vector<64x80xf32>
    %2 = tpu.matmul %0, %1, %cst {dimension_numbers = #tpu.dot_dimension_numbers<[1], [0], [0], [1], [0, 0, 1, 1], [], []>} : vector<64x288xbf16>, vector<288x80xbf16>, vector<64x80xf32> -> vector<64x80xf32>
    %c0_3 = arith.constant 0 : index
    %c0_4 = arith.constant 0 : index
    %3 = vector.load %arg2[%c0_3, %c0_4] : memref<64x1xf32, #tpu.memory_space<vmem>>, vector<64x1xf32>
    %4 = vector.broadcast %3 : vector<64x1xf32> to vector<64x80xf32>
    %5 = arith.addf %2, %4 : vector<64x80xf32>
    %cst_5 = arith.constant 0.000000e+00 : f32
    %6 = vector.broadcast %cst_5 : f32 to vector<64x80xf32>
    %7 = arith.maximumf %5, %6 : vector<64x80xf32>
    %8 = arith.truncf %7 : vector<64x80xf32> to vector<64x80xbf16>
    %c0_6 = arith.constant 0 : index
    %c0_7 = arith.constant 0 : index
    %9 = vector.load %arg3[%c0_6, %c0_7] : memref<64x80xbf16, #tpu.memory_space<vmem>>, vector<64x80xbf16>
    tpu.vector_store %arg3[%c0_6, %c0_7], %8 {strides = array<i32>} : memref<64x80xbf16, #tpu.memory_space<vmem>>, vector<64x80xbf16>,
    return
  }
}

module attributes {stable_mosaic.version = 11 : i64} {
  func.func @_linear_chain_kernel(%arg0: memref<2x2560xbf16, #tpu.memory_space<vmem>>, %arg1: memref<2560x128xbf16, #tpu.memory_space<vmem>>, %arg2: memref<1x128xf32, #tpu.memory_space<vmem>>, %arg3: memref<128x18xbf16, #tpu.memory_space<vmem>>, %arg4: memref<1x18xf32, #tpu.memory_space<vmem>>, %arg5: memref<18x128xbf16, #tpu.memory_space<vmem>>, %arg6: memref<1x128xf32, #tpu.memory_space<vmem>>, %arg7: memref<128x2560xbf16, #tpu.memory_space<vmem>>, %arg8: memref<1x2560xf32, #tpu.memory_space<vmem>>, %arg9: memref<2x2560xbf16, #tpu.memory_space<vmem>>) attributes {dimension_semantics = [], scalar_prefetch = 0 : i64, scratch_operands = 0 : i64, tpu.core_type = #tpu.core_type<tc>} {
    %c0 = arith.constant 0 : index
    %c0_0 = arith.constant 0 : index
    %0 = vector.load %arg0[%c0, %c0_0] : memref<2x2560xbf16, #tpu.memory_space<vmem>>, vector<2x2560xbf16>
    %c0_1 = arith.constant 0 : index
    %c0_2 = arith.constant 0 : index
    %1 = vector.load %arg1[%c0_1, %c0_2] : memref<2560x128xbf16, #tpu.memory_space<vmem>>, vector<2560x128xbf16>
    %cst = arith.constant dense<0.000000e+00> : vector<2x128xf32>
    %2 = tpu.matmul %0, %1, %cst {dimension_numbers = #tpu.dot_dimension_numbers<[1], [0], [0], [1], [0, 0, 1, 1], [], []>} : vector<2x2560xbf16>, vector<2560x128xbf16>, vector<2x128xf32> -> vector<2x128xf32>
    %c0_3 = arith.constant 0 : index
    %c0_4 = arith.constant 0 : index
    %3 = vector.load %arg2[%c0_3, %c0_4] : memref<1x128xf32, #tpu.memory_space<vmem>>, vector<1x128xf32>
    %4 = vector.broadcast %3 : vector<1x128xf32> to vector<2x128xf32>
    %5 = arith.addf %2, %4 : vector<2x128xf32>
    %cst_5 = arith.constant 0.000000e+00 : f32
    %6 = vector.broadcast %cst_5 : f32 to vector<2x128xf32>
    %7 = arith.maximumf %5, %6 : vector<2x128xf32>
    %8 = arith.truncf %7 : vector<2x128xf32> to vector<2x128xbf16>
    %c0_6 = arith.constant 0 : index
    %c0_7 = arith.constant 0 : index
    %9 = vector.load %arg3[%c0_6, %c0_7] : memref<128x18xbf16, #tpu.memory_space<vmem>>, vector<128x18xbf16>
    %cst_8 = arith.constant dense<0.000000e+00> : vector<2x18xf32>
    %10 = tpu.matmul %8, %9, %cst_8 {dimension_numbers = #tpu.dot_dimension_numbers<[1], [0], [0], [1], [0, 0, 1, 1], [], []>} : vector<2x128xbf16>, vector<128x18xbf16>, vector<2x18xf32> -> vector<2x18xf32>
    %c0_9 = arith.constant 0 : index
    %c0_10 = arith.constant 0 : index
    %11 = vector.load %arg4[%c0_9, %c0_10] : memref<1x18xf32, #tpu.memory_space<vmem>>, vector<1x18xf32>
    %12 = vector.broadcast %11 : vector<1x18xf32> to vector<2x18xf32>
    %13 = arith.addf %10, %12 : vector<2x18xf32>
    %14 = arith.truncf %13 : vector<2x18xf32> to vector<2x18xbf16>
    %c0_11 = arith.constant 0 : index
    %c0_12 = arith.constant 0 : index
    %15 = vector.load %arg5[%c0_11, %c0_12] : memref<18x128xbf16, #tpu.memory_space<vmem>>, vector<18x128xbf16>
    %cst_13 = arith.constant dense<0.000000e+00> : vector<2x128xf32>
    %16 = tpu.matmul %14, %15, %cst_13 {dimension_numbers = #tpu.dot_dimension_numbers<[1], [0], [0], [1], [0, 0, 1, 1], [], []>} : vector<2x18xbf16>, vector<18x128xbf16>, vector<2x128xf32> -> vector<2x128xf32>
    %c0_14 = arith.constant 0 : index
    %c0_15 = arith.constant 0 : index
    %17 = vector.load %arg6[%c0_14, %c0_15] : memref<1x128xf32, #tpu.memory_space<vmem>>, vector<1x128xf32>
    %18 = vector.broadcast %17 : vector<1x128xf32> to vector<2x128xf32>
    %19 = arith.addf %16, %18 : vector<2x128xf32>
    %cst_16 = arith.constant 0.000000e+00 : f32
    %20 = vector.broadcast %cst_16 : f32 to vector<2x128xf32>
    %21 = arith.maximumf %19, %20 : vector<2x128xf32>
    %22 = arith.truncf %21 : vector<2x128xf32> to vector<2x128xbf16>
    %c0_17 = arith.constant 0 : index
    %c0_18 = arith.constant 0 : index
    %23 = vector.load %arg7[%c0_17, %c0_18] : memref<128x2560xbf16, #tpu.memory_space<vmem>>, vector<128x2560xbf16>
    %cst_19 = arith.constant dense<0.000000e+00> : vector<2x2560xf32>
    %24 = tpu.matmul %22, %23, %cst_19 {dimension_numbers = #tpu.dot_dimension_numbers<[1], [0], [0], [1], [0, 0, 1, 1], [], []>} : vector<2x128xbf16>, vector<128x2560xbf16>, vector<2x2560xf32> -> vector<2x2560xf32>
    %c0_20 = arith.constant 0 : index
    %c0_21 = arith.constant 0 : index
    %25 = vector.load %arg8[%c0_20, %c0_21] : memref<1x2560xf32, #tpu.memory_space<vmem>>, vector<1x2560xf32>
    %26 = vector.broadcast %25 : vector<1x2560xf32> to vector<2x2560xf32>
    %27 = arith.addf %24, %26 : vector<2x2560xf32>
    %cst_22 = arith.constant 0.000000e+00 : f32
    %28 = vector.broadcast %cst_22 : f32 to vector<2x2560xf32>
    %29 = arith.maximumf %27, %28 : vector<2x2560xf32>
    %30 = arith.truncf %29 : vector<2x2560xf32> to vector<2x2560xbf16>
    %c0_23 = arith.constant 0 : index
    %c0_24 = arith.constant 0 : index
    %31 = vector.load %arg9[%c0_23, %c0_24] : memref<2x2560xbf16, #tpu.memory_space<vmem>>, vector<2x2560xbf16>
    tpu.vector_store %arg9[%c0_23, %c0_24], %30 {strides = array<i32>} : memref<2x2560xbf16, #tpu.memory_space<vmem>>, vector<2x2560xbf16>,
    return
  }
}

module attributes {stable_mosaic.version = 11 : i64} {
  func.func @_matmul_bias_act_kernel(%arg0: memref<128x256xbf16, #tpu.memory_space<vmem>>, %arg1: memref<256x80xbf16, #tpu.memory_space<vmem>>, %arg2: memref<128x1xf32, #tpu.memory_space<vmem>>, %arg3: memref<128x80xbf16, #tpu.memory_space<vmem>>) attributes {dimension_semantics = [], scalar_prefetch = 0 : i64, scratch_operands = 0 : i64, tpu.core_type = #tpu.core_type<tc>} {
    %c0 = arith.constant 0 : index
    %c0_0 = arith.constant 0 : index
    %0 = vector.load %arg0[%c0, %c0_0] : memref<128x256xbf16, #tpu.memory_space<vmem>>, vector<128x256xbf16>
    %c0_1 = arith.constant 0 : index
    %c0_2 = arith.constant 0 : index
    %1 = vector.load %arg1[%c0_1, %c0_2] : memref<256x80xbf16, #tpu.memory_space<vmem>>, vector<256x80xbf16>
    %cst = arith.constant dense<0.000000e+00> : vector<128x80xf32>
    %2 = tpu.matmul %0, %1, %cst {dimension_numbers = #tpu.dot_dimension_numbers<[1], [0], [0], [1], [0, 0, 1, 1], [], []>} : vector<128x256xbf16>, vector<256x80xbf16>, vector<128x80xf32> -> vector<128x80xf32>
    %c0_3 = arith.constant 0 : index
    %c0_4 = arith.constant 0 : index
    %3 = vector.load %arg2[%c0_3, %c0_4] : memref<128x1xf32, #tpu.memory_space<vmem>>, vector<128x1xf32>
    %4 = vector.broadcast %3 : vector<128x1xf32> to vector<128x80xf32>
    %5 = arith.addf %2, %4 : vector<128x80xf32>
    %cst_5 = arith.constant 0.000000e+00 : f32
    %6 = vector.broadcast %cst_5 : f32 to vector<128x80xf32>
    %7 = arith.maximumf %5, %6 : vector<128x80xf32>
    %8 = arith.truncf %7 : vector<128x80xf32> to vector<128x80xbf16>
    %c0_6 = arith.constant 0 : index
    %c0_7 = arith.constant 0 : index
    %9 = vector.load %arg3[%c0_6, %c0_7] : memref<128x80xbf16, #tpu.memory_space<vmem>>, vector<128x80xbf16>
    tpu.vector_store %arg3[%c0_6, %c0_7], %8 {strides = array<i32>} : memref<128x80xbf16, #tpu.memory_space<vmem>>, vector<128x80xbf16>,
    return
  }
}

module attributes {stable_mosaic.version = 11 : i64} {
  func.func @_matmul_bias_act_kernel(%arg0: memref<64x128xbf16, #tpu.memory_space<vmem>>, %arg1: memref<128x320xbf16, #tpu.memory_space<vmem>>, %arg2: memref<64x1xf32, #tpu.memory_space<vmem>>, %arg3: memref<64x320xbf16, #tpu.memory_space<vmem>>) attributes {dimension_semantics = [], scalar_prefetch = 0 : i64, scratch_operands = 0 : i64, tpu.core_type = #tpu.core_type<tc>} {
    %c0 = arith.constant 0 : index
    %c0_0 = arith.constant 0 : index
    %0 = vector.load %arg0[%c0, %c0_0] : memref<64x128xbf16, #tpu.memory_space<vmem>>, vector<64x128xbf16>
    %c0_1 = arith.constant 0 : index
    %c0_2 = arith.constant 0 : index
    %1 = vector.load %arg1[%c0_1, %c0_2] : memref<128x320xbf16, #tpu.memory_space<vmem>>, vector<128x320xbf16>
    %cst = arith.constant dense<0.000000e+00> : vector<64x320xf32>
    %2 = tpu.matmul %0, %1, %cst {dimension_numbers = #tpu.dot_dimension_numbers<[1], [0], [0], [1], [0, 0, 1, 1], [], []>} : vector<64x128xbf16>, vector<128x320xbf16>, vector<64x320xf32> -> vector<64x320xf32>
    %c0_3 = arith.constant 0 : index
    %c0_4 = arith.constant 0 : index
    %3 = vector.load %arg2[%c0_3, %c0_4] : memref<64x1xf32, #tpu.memory_space<vmem>>, vector<64x1xf32>
    %4 = vector.broadcast %3 : vector<64x1xf32> to vector<64x320xf32>
    %5 = arith.addf %2, %4 : vector<64x320xf32>
    %cst_5 = arith.constant 0.000000e+00 : f32
    %6 = vector.broadcast %cst_5 : f32 to vector<64x320xf32>
    %7 = arith.maximumf %5, %6 : vector<64x320xf32>
    %8 = arith.truncf %7 : vector<64x320xf32> to vector<64x320xbf16>
    %c0_6 = arith.constant 0 : index
    %c0_7 = arith.constant 0 : index
    %9 = vector.load %arg3[%c0_6, %c0_7] : memref<64x320xbf16, #tpu.memory_space<vmem>>, vector<64x320xbf16>
    tpu.vector_store %arg3[%c0_6, %c0_7], %8 {strides = array<i32>} : memref<64x320xbf16, #tpu.memory_space<vmem>>, vector<64x320xbf16>,
    return
  }
}

module attributes {stable_mosaic.version = 11 : i64} {
  func.func @_matmul_bias_act_kernel(%arg0: memref<4x64xbf16, #tpu.memory_space<vmem>>, %arg1: memref<64x1280xbf16, #tpu.memory_space<vmem>>, %arg2: memref<4x1xf32, #tpu.memory_space<vmem>>, %arg3: memref<4x1280xbf16, #tpu.memory_space<vmem>>) attributes {dimension_semantics = [], scalar_prefetch = 0 : i64, scratch_operands = 0 : i64, tpu.core_type = #tpu.core_type<tc>} {
    %c0 = arith.constant 0 : index
    %c0_0 = arith.constant 0 : index
    %0 = vector.load %arg0[%c0, %c0_0] : memref<4x64xbf16, #tpu.memory_space<vmem>>, vector<4x64xbf16>
    %c0_1 = arith.constant 0 : index
    %c0_2 = arith.constant 0 : index
    %1 = vector.load %arg1[%c0_1, %c0_2] : memref<64x1280xbf16, #tpu.memory_space<vmem>>, vector<64x1280xbf16>
    %cst = arith.constant dense<0.000000e+00> : vector<4x1280xf32>
    %2 = tpu.matmul %0, %1, %cst {dimension_numbers = #tpu.dot_dimension_numbers<[1], [0], [0], [1], [0, 0, 1, 1], [], []>} : vector<4x64xbf16>, vector<64x1280xbf16>, vector<4x1280xf32> -> vector<4x1280xf32>
    %c0_3 = arith.constant 0 : index
    %c0_4 = arith.constant 0 : index
    %3 = vector.load %arg2[%c0_3, %c0_4] : memref<4x1xf32, #tpu.memory_space<vmem>>, vector<4x1xf32>
    %4 = vector.broadcast %3 : vector<4x1xf32> to vector<4x1280xf32>
    %5 = arith.addf %2, %4 : vector<4x1280xf32>
    %cst_5 = arith.constant 0.000000e+00 : f32
    %6 = vector.broadcast %cst_5 : f32 to vector<4x1280xf32>
    %7 = arith.subf %6, %5 : vector<4x1280xf32>
    %8 = math.exp %7 : vector<4x1280xf32>
    %cst_6 = arith.constant 1.000000e+00 : f32
    %9 = vector.broadcast %cst_6 : f32 to vector<4x1280xf32>
    %10 = arith.addf %9, %8 : vector<4x1280xf32>
    %cst_7 = arith.constant 1.000000e+00 : f32
    %11 = vector.broadcast %cst_7 : f32 to vector<4x1280xf32>
    %12 = arith.divf %11, %10 : vector<4x1280xf32>
    %13 = arith.truncf %12 : vector<4x1280xf32> to vector<4x1280xbf16>
    %c0_8 = arith.constant 0 : index
    %c0_9 = arith.constant 0 : index
    %14 = vector.load %arg3[%c0_8, %c0_9] : memref<4x1280xbf16, #tpu.memory_space<vmem>>, vector<4x1280xbf16>
    tpu.vector_store %arg3[%c0_8, %c0_9], %13 {strides = array<i32>} : memref<4x1280xbf16, #tpu.memory_space<vmem>>, vector<4x1280xbf16>,
    return
  }
}

</mosaic_0001>

<bundles_post_ra>
// kernel: autoencoder_forward.7
= control target key start
LH: loop header
LB: loop body
LE: loop exit
PB: predicated region body
PF: predicated region fallthrough
CT: control target
= control target key end

     0   :  { %8 = vsyncpa [#allocation3], 0  ;;  %s503_s12 = smov [#allocation2]   ;;  %s634_s0 = inlined_call_operand.hbm [shape: bf16[16,16], index: 0, kind: input, shape index: {}]   ;;  %s635_s1 = inlined_call_operand.vmem [shape: bf16[16,1280], index: 1, kind: input, shape index: {}]   ;;  %s636_s2 = inlined_call_operand.vmem [shape: f32[16,1], index: 2, kind: input, shape index: {}]   ;;  %s637_s3 = inlined_call_operand.vmem [shape: bf16[16,1280], index: 3, kind: output, shape index: {}]  }
   0x1   :  { %s14_s13 = sshll.u32 %s503_s12, 4  ;;  %s479_s16 = scalar_lea.hbm %s634_s0, 128  ;;  %s15_s13 = int_to_ptr.vmem [resolvable:$true] %s14_s13 }
   0x2   :  { %p480_p0 = scmp.ne.s32.totalorder %s634_s0, %s479_s16  ;;  %p483_p1 = scmp.lt.u32.totalorder %s479_s16, %s634_s0 }
   0x4   :  { %p485_p2 = pnand %p483_p1, %p480_p0 }
   0x6   :  { %488 = shalt.err (!%p485_p2)
}
   0x7   :  { %s489_s21 = scalar_lea.vmem %s15_s13, 128  ;;  %p494_p4 = scmp.lt.s32.totalorder %s15_s13, %s15_s13 }
   0x8   :  { %p490_p3 = scmp.ne.s32.totalorder %s15_s13, %s489_s21  ;;  %p495_p5 = scmp.lt.s32.totalorder %s489_s21, %s489_s21 }
   0xa   :  { %p496_p6 = por %p495_p5, %p494_p4 }
   0xc   :  { %p497_p7 = pnand %p496_p6, %p490_p3 }
   0xe   :  { %500 = shalt.err (!%p497_p7)
}
   0xf   :  { %s504_s22 = smov 64   ;;  %s505_s23 = smov 4  }
  0x10   :  { %20 = dma.hbm_to_vmem [thread:$0]  %s634_s0, 128, %s15_s13, [#allocation3], %s504_s22, %s504_s22, %s505_s23  }
  0x11   :  { %501 = dma.done.wait [#allocation3], 128  }
  0x12   :  { %502 = vsyncadd [#allocation3], 4294967168  ;;  %v506_v0 = vmov 0   ;;  %v463_v1 = vld [vmem:[%s635_s1 + $0x4] ss:$40 sps:$4 sm:$0xff]   ;;  %vm108_vm0 = vcmask 130048  }
  0x13   :  { %144 = vmatprep.mubr.bf16.mxu0 %v506_v0  ;;  %187 = vmatprep.mubr.bf16.mxu1 %v506_v0  ;;  %v465_v2 = vld [vmem:[%s635_s1] ss:$40 sps:$4 sm:$0xff]   ;;  %v467_v4 = vld [vmem:[%s635_s1 + $0x10] ss:$40 sps:$4 sm:$0xff]   ;;  %v469_v5 = vld [vmem:[%s635_s1 + $0x14] ss:$40 sps:$4 sm:$0xff]  }
  0x14   :  { %462 = vset.pattern.permute.xlu0 %v506_v0  ;;  %112 = vmatprep.subr.bf16.mxu0 %v463_v1  ;;  %v466_v3 = vld [vmem:[#allocation2] sm:$0xff]   ;;  %v470_v6 = vld [vmem:[%s635_s1 + $0xc] ss:$40 sps:$4 sm:$0xff]   ;;  %v472_v7 = vld [vmem:[%s635_s1 + $0x8] ss:$40 sps:$4 sm:$0xff]  }
  0x15   :  { %113 = vmatpush1.bf16.msra.mxu0 %v465_v2  ;;  %155 = vmatprep.subr.bf16.mxu1 %v470_v6  ;;  %v475_v8 = vld [vmem:[%s635_s1 + $0x1c] ss:$40 sps:$4 sm:$0xff]   ;;  %v473_v9 = vld [vmem:[%s635_s1 + $0x18] ss:$40 sps:$4 sm:$0xff]   ;;  %v42_v12 = vld [vmem:[%s636_s2 + $0x8] sm:$0xff] }
  0x16   :  { %198 = vmatprep.subr.bf16.mxu0 %v469_v5  ;;  %156 = vmatpush1.bf16.msra.mxu1 %v472_v7  ;;  %v478_v10 = vld [vmem:[%s635_s1 + $0x24] ss:$40 sps:$4 sm:$0xff]   ;;  %v476_v13 = vld [vmem:[%s635_s1 + $0x20] ss:$40 sps:$4 sm:$0xff]  }
  0x17   :  { %v41_v11 = vld [vmem:[%s636_s2] sm:$0xff]  ;;  %241 = vmatprep.subr.bf16.mxu1 %v475_v8 }
  0x18   :  { %433 = vmatmul.mubr.msk.bf16.vlgmr.msra.gmra.mrb[0].mxu0 %vm108_vm0, %v466_v3  ;;  %45 = vperm.xlu0 %462, %v41_v11  }
  0x19   :  { %199 = vmatpush1.bf16.msra.mxu0 %v467_v4  ;;  %230 = vmatprep.mubr.bf16.mxu0 %v506_v0 }
  0x1a   :  { %284 = vmatprep.subr.bf16.mxu0 %v478_v10  ;;  %434 = vmatmul.mubr.msk.bf16.vlgmr.msra.gmra.mrb[0].mxu1 %vm108_vm0, %v466_v3 }
  0x1b   :  { %242 = vmatpush1.bf16.msra.mxu1 %v473_v9  ;;  %273 = vmatprep.mubr.bf16.mxu1 %v506_v0 }
  0x1c   :  { %50 = vperm.xlu0 %462, %v42_v12  }
  0x20   :  { %435 = vmatmul.mubr.msk.bf16.vlgmr.msra.gmra.mrb[4].mxu0 %vm108_vm0, %v466_v3 }
  0x21   :  { %285 = vmatpush1.bf16.msra.mxu0 %v476_v13  ;;  %316 = vmatprep.mubr.bf16.mxu0 %v506_v0 }
  0x22   :  { %436 = vmatmul.mubr.msk.bf16.vlgmr.msra.gmra.mrb[4].mxu1 %vm108_vm0, %v466_v3 }
  0x28   :  { %437 = vmatmul.mubr.msk.bf16.vlgmr.msra.gmra.mrb[8].mxu0 %vm108_vm0, %v466_v3 }
  0x97   :  { %v580_v14 = vpop.permute.xlu0 %45 }
  0x9b   :  { %v582_v16 = vpop.permute.xlu0 %50 }
  0xeb   :  { %v146_v15 = vpop.f32.mrb[0].mxu0 }
  0xec   :  { %v147_v17 = vadd.f32 %v146_v15, %v580_v14  ;;  %v148_v18 = vpop.f32.mrb[1].mxu0 }
  0xed   :  { %v149_v19 = vadd.f32 %v148_v18, %v580_v14  ;;  %v150_v20 = vpop.f32.mrb[2].mxu0  ;;  %v189_v26 = vpop.f32.mrb[0].mxu1 }
  0xee   :  { %v327_v21 = vmax.f32 %v147_v17, 0.0  ;;  %v151_v22 = vadd.f32 %v150_v20, %v582_v16  ;;  %v152_v23 = vpop.f32.mrb[3].mxu0  ;;  %v190_v28 = vadd.f32 %v189_v26, %v580_v14  ;;  %v191_v29 = vpop.f32.mrb[1].mxu1 }
  0xef   :  { %v328_v24 = vmax.f32 %v149_v19, 0.0  ;;  %v153_v25 = vadd.f32 %v152_v23, %v582_v16  ;;  %v192_v32 = vadd.f32 %v191_v29, %v580_v14  ;;  %v193_v33 = vpop.f32.mrb[2].mxu1 }
  0xf0   :  { %v337_v27 = vmax.f32 %v151_v22, 0.0  ;;  %v329_v34 = vmax.f32 %v190_v28, 0.0  ;;  %v194_v35 = vadd.f32 %v193_v33, %v582_v16  ;;  %v195_v36 = vpop.f32.mrb[3].mxu1 }
  0xf1   :  { %v448_v30 = vpack.c.bf16 %v328_v24, %v327_v21  ;;  %v338_v31 = vmax.f32 %v153_v25, 0.0  ;;  %v330_v38 = vmax.f32 %v192_v32, 0.0  ;;  %v196_v40 = vadd.f32 %v195_v36, %v582_v16 }
  0xf2   :  { %v339_v41 = vmax.f32 %v194_v35, 0.0 }
  0xf3   :  { %407 = vst [vmem:[%s637_s3] sm:$0xff] %v448_v30  ;;  %v453_v37 = vpack.c.bf16 %v338_v31, %v337_v27  ;;  %v232_v39 = vpop.f32.mrb[4].mxu0  ;;  %v449_v44 = vpack.c.bf16 %v330_v38, %v329_v34  ;;  %v340_v45 = vmax.f32 %v196_v40, 0.0 }
  0xf4   :  { %v233_v42 = vadd.f32 %v232_v39, %v580_v14  ;;  %v234_v43 = vpop.f32.mrb[5].mxu0 }
  0xf5   :  { %412 = vst [vmem:[%s637_s3 + $0x28] sm:$0xff] %v453_v37  ;;  %v235_v46 = vadd.f32 %v234_v43, %v580_v14  ;;  %v236_v47 = vpop.f32.mrb[6].mxu0  ;;  %408 = vst [vmem:[%s637_s3 + $0x8] sm:$0xff] %v449_v44  ;;  %v454_v51 = vpack.c.bf16 %v340_v45, %v339_v41  ;;  %v275_v54 = vpop.f32.mrb[4].mxu1 }
  0xf6   :  { %v331_v48 = vmax.f32 %v233_v42, 0.0  ;;  %v237_v49 = vadd.f32 %v236_v47, %v582_v16  ;;  %v238_v50 = vpop.f32.mrb[7].mxu0  ;;  %v276_v56 = vadd.f32 %v275_v54, %v580_v14  ;;  %v277_v57 = vpop.f32.mrb[5].mxu1 }
  0xf7   :  { %v332_v52 = vmax.f32 %v235_v46, 0.0  ;;  %v239_v53 = vadd.f32 %v238_v50, %v582_v16  ;;  %413 = vst [vmem:[%s637_s3 + $0x30] sm:$0xff] %v454_v51  ;;  %v278_v60 = vadd.f32 %v277_v57, %v580_v14  ;;  %v279_v61 = vpop.f32.mrb[6].mxu1 }
  0xf8   :  { %v341_v55 = vmax.f32 %v237_v49, 0.0  ;;  %v333_v62 = vmax.f32 %v276_v56, 0.0  ;;  %v280_v63 = vadd.f32 %v279_v61, %v582_v16  ;;  %v281_v0 = vpop.f32.mrb[7].mxu1 }
  0xf9   :  { %v450_v58 = vpack.c.bf16 %v332_v52, %v331_v48  ;;  %v342_v59 = vmax.f32 %v239_v53, 0.0  ;;  %v334_v2 = vmax.f32 %v278_v60, 0.0  ;;  %v282_v3 = vadd.f32 %v281_v0, %v582_v16 }
  0xfa   :  { %v343_v5 = vmax.f32 %v280_v63, 0.0 }
  0xfb   :  { %409 = vst [vmem:[%s637_s3 + $0x10] sm:$0xff] %v450_v58  ;;  %v455_v1 = vpack.c.bf16 %v342_v59, %v341_v55  ;;  %v318_v4 = vpop.f32.mrb[8].mxu0  ;;  %v451_v8 = vpack.c.bf16 %v334_v2, %v333_v62  ;;  %v344_v9 = vmax.f32 %v282_v3, 0.0 }
  0xfc   :  { %v319_v6 = vadd.f32 %v318_v4, %v580_v14  ;;  %v320_v7 = vpop.f32.mrb[9].mxu0 }
  0xfd   :  { %414 = vst [vmem:[%s637_s3 + $0x38] sm:$0xff] %v455_v1  ;;  %v321_v10 = vadd.f32 %v320_v7, %v580_v14  ;;  %v322_v11 = vpop.f32.mrb[10].mxu0  ;;  %410 = vst [vmem:[%s637_s3 + $0x18] sm:$0xff] %v451_v8  ;;  %v456_v17 = vpack.c.bf16 %v344_v9, %v343_v5 }
  0xfe   :  { %v335_v12 = vmax.f32 %v319_v6, 0.0  ;;  %v323_v13 = vadd.f32 %v322_v11, %v582_v16  ;;  %v324_v15 = vpop.f32.mrb[11].mxu0 }
  0xff   :  { %v336_v18 = vmax.f32 %v321_v10, 0.0  ;;  %v325_v19 = vadd.f32 %v324_v15, %v582_v16  ;;  %415 = vst [vmem:[%s637_s3 + $0x40] sm:$0xff] %v456_v17 }
 0x100   :  { %v345_v20 = vmax.f32 %v323_v13, 0.0 }
 0x101   :  { %v452_v21 = vpack.c.bf16 %v336_v18, %v335_v12  ;;  %v346_v14 = vmax.f32 %v325_v19, 0.0 }
 0x103   :  { %411 = vst [vmem:[%s637_s3 + $0x20] sm:$0xff] %v452_v21  ;;  %v457_v22 = vpack.c.bf16 %v346_v14, %v345_v20 }
 0x105   :  { %416 = vst [vmem:[%s637_s3 + $0x48] sm:$0xff] %v457_v22 }
 0x106   :  { %421 = vsyncpa [#allocation3], 1 }

// kernel: autoencoder_forward.8
= control target key start
LH: loop header
LB: loop body
LE: loop exit
PB: predicated region body
PF: predicated region fallthrough
CT: control target
= control target key end

     0   :  { %v511_v0 = vmov 0   ;;  %vm241_vm0 = vcmask 130048   ;;  %vm403_vm1 = vcmask 519168   ;;  %s680_s1 = inlined_call_operand.vmem [shape: bf16[144,320], index: 1, kind: input, shape index: {}]   ;;  %s681_s0 = inlined_call_operand.vmem [shape: bf16[32,144], index: 0, kind: input, shape index: {}]   ;;  %s682_s2 = inlined_call_operand.vmem [shape: f32[32,1], index: 2, kind: input, shape index: {}]   ;;  %s683_s3 = inlined_call_operand.vmem [shape: bf16[32,320], index: 3, kind: output, shape index: {}]  }
   0x1   :  { %301 = vmatprep.subr.bf16.mxu1 %v511_v0  ;;  %v469_v1 = vld [vmem:[%s680_s1 + $0x4] ss:$12 sps:$4 sm:$0xff]   ;;  %467 = vset.pattern.permute.xlu0 %v511_v0  ;;  %v471_v2 = vld [vmem:[%s680_s1 + $0x8] ss:$12 sps:$4 sm:$0xff]   ;;  %v472_v3 = vld [vmem:[%s680_s1] ss:$12 sps:$4 sm:$0xff]  }
   0x2   :  { %468 = vset.pattern.permute.xlu1 %v511_v0  ;;  %248 = vmatprep.subr.bf16.mxu0 %v469_v1  ;;  %v473_v4 = vld [vmem:[%s680_s1 + $0x1c] ss:$12 sps:$4 sm:$0xff]   ;;  %v475_v5 = vld [vmem:[%s680_s1 + $0x20] ss:$12 sps:$4 sm:$0xff]   ;;  %v476_v6 = vld [vmem:[%s680_s1 + $0x18] ss:$12 sps:$4 sm:$0xff]  }
   0x3   :  { %302 = vmatpush1.bf16.msra.mxu1 %v471_v2  ;;  %249 = vmatpush1.bf16.msra.mxu0 %v472_v3  ;;  %v477_v7 = vld [vmem:[%s680_s1 + $0x34] ss:$12 sps:$4 sm:$0xff]   ;;  %v479_v8 = vld [vmem:[%s680_s1 + $0x38] ss:$12 sps:$4 sm:$0xff]   ;;  %v480_v9 = vld [vmem:[%s680_s1 + $0x30] ss:$12 sps:$4 sm:$0xff]  }
   0x4   :  { %303 = vmatprep.subr.bf16.mxu1 %v511_v0  ;;  %250 = vmatprep.subr.bf16.mxu0 %v473_v4  ;;  %v481_v10 = vld [vmem:[%s680_s1 + $0x4c] ss:$12 sps:$4 sm:$0xff]   ;;  %v483_v11 = vld [vmem:[%s680_s1 + $0x50] ss:$12 sps:$4 sm:$0xff]   ;;  %v484_v12 = vld [vmem:[%s680_s1 + $0x48] ss:$12 sps:$4 sm:$0xff]  }
   0x5   :  { %v485_v13 = vld [vmem:[%s680_s1 + $0x64] ss:$12 sps:$4 sm:$0xff]   ;;  %v487_v14 = vld [vmem:[%s680_s1 + $0x68] ss:$12 sps:$4 sm:$0xff]   ;;  %v488_v15 = vld [vmem:[%s680_s1 + $0x60] ss:$12 sps:$4 sm:$0xff]  }
   0x6   :  { %v489_v16 = vld [vmem:[%s680_s1 + $0x7c] ss:$12 sps:$4 sm:$0xff]   ;;  %v491_v17 = vld [vmem:[%s680_s1 + $0x80] ss:$12 sps:$4 sm:$0xff]   ;;  %v492_v18 = vld [vmem:[%s680_s1 + $0x78] ss:$12 sps:$4 sm:$0xff]  }
   0x7   :  { %304 = vmatpush1.bf16.msra.mxu1 %v475_v5  ;;  %251 = vmatpush1.bf16.msra.mxu0 %v476_v6  ;;  %v493_v19 = vld [vmem:[%s680_s1 + $0x94] ss:$12 sps:$4 sm:$0xff]   ;;  %v507_v20 = vld [vmem:[%s681_s0 + $0x4] ss:$8 sps:$4 sm:$0xff]   ;;  %v496_v23 = vld [vmem:[%s680_s1 + $0x90] ss:$12 sps:$4 sm:$0xff]  }
   0x8   :  { %305 = vmatprep.subr.bf16.mxu1 %v511_v0  ;;  %252 = vmatprep.subr.bf16.mxu0 %v477_v7  ;;  %v495_v21 = vld [vmem:[%s680_s1 + $0x98] ss:$12 sps:$4 sm:$0xff]   ;;  %v57_v24 = vld [vmem:[%s682_s2 + $0x10] sm:$0xff]  ;;  %v56_v27 = vld [vmem:[%s682_s2 + $0x8] sm:$0xff] }
   0x9   :  { %v55_v22 = vld [vmem:[%s682_s2] sm:$0xff]  ;;  %v497_v25 = vld [vmem:[%s680_s1 + $0xac] ss:$12 sps:$4 sm:$0xff]   ;;  %448 = vmatprep.mubr.msk.bf16.mxu1 %vm241_vm0, %v507_v20  ;;  %446 = vmatprep.mubr.msk.bf16.mxu0 %vm241_vm0, %v507_v20  ;;  %v499_v26 = vld [vmem:[%s680_s1 + $0xb0] ss:$12 sps:$4 sm:$0xff]  }
   0xa   :  { %61 = vperm.xlu0 %467, %v55_v22   ;;  %71 = vperm.xlu1 %468, %v57_v24   ;;  %v500_v28 = vld [vmem:[%s680_s1 + $0xa8] ss:$12 sps:$4 sm:$0xff]   ;;  %v58_v29 = vld [vmem:[%s682_s2 + $0x18] sm:$0xff]  ;;  %v501_v30 = vld [vmem:[%s680_s1 + $0xc4] ss:$12 sps:$4 sm:$0xff]  }
   0xb   :  { %306 = vmatpush1.bf16.msra.mxu1 %v479_v8  ;;  %253 = vmatpush1.bf16.msra.mxu0 %v480_v9  ;;  %v503_v31 = vld [vmem:[%s680_s1 + $0xc8] ss:$12 sps:$4 sm:$0xff]   ;;  %v504_v32 = vld [vmem:[%s680_s1 + $0xc0] ss:$12 sps:$4 sm:$0xff]   ;;  %v510_v35 = vld [vmem:[%s681_s0 + $0x10] ss:$8 sps:$4 sm:$0xff]  }
   0xc   :  { %307 = vmatprep.subr.bf16.mxu1 %v511_v0  ;;  %254 = vmatprep.subr.bf16.mxu0 %v481_v10  ;;  %v505_v33 = vld [vmem:[%s681_s0] ss:$8 sps:$4 sm:$0xff]   ;;  %v508_v34 = vld [vmem:[%s681_s0 + $0x14] ss:$8 sps:$4 sm:$0xff]  }
   0xe   :  { %66 = vperm.xlu0 %467, %v56_v27   ;;  %76 = vperm.xlu1 %468, %v58_v29  }
   0xf   :  { %308 = vmatpush1.bf16.msra.mxu1 %v483_v11  ;;  %255 = vmatpush1.bf16.msra.mxu0 %v484_v12 }
  0x10   :  { %309 = vmatprep.subr.bf16.mxu1 %v511_v0  ;;  %256 = vmatprep.subr.bf16.mxu0 %v485_v13 }
  0x13   :  { %310 = vmatpush1.bf16.msra.mxu1 %v487_v14  ;;  %257 = vmatpush1.bf16.msra.mxu0 %v488_v15 }
  0x14   :  { %311 = vmatprep.subr.bf16.mxu1 %v511_v0  ;;  %258 = vmatprep.subr.bf16.mxu0 %v489_v16 }
  0x17   :  { %312 = vmatpush1.bf16.msra.mxu1 %v491_v17  ;;  %259 = vmatpush1.bf16.msra.mxu0 %v492_v18 }
  0x18   :  { %313 = vmatprep.subr.bf16.mxu1 %v511_v0  ;;  %260 = vmatprep.subr.bf16.mxu0 %v493_v19 }
  0x1b   :  { %314 = vmatpush1.bf16.msra.mxu1 %v495_v21  ;;  %261 = vmatpush1.bf16.msra.mxu0 %v496_v23 }
  0x1c   :  { %315 = vmatprep.subr.bf16.mxu1 %v511_v0  ;;  %262 = vmatprep.subr.bf16.mxu0 %v497_v25 }
  0x1f   :  { %316 = vmatpush1.bf16.msra.mxu1 %v499_v26  ;;  %263 = vmatpush1.bf16.msra.mxu0 %v500_v28 }
  0x20   :  { %317 = vmatprep.subr.bf16.mxu1 %v511_v0  ;;  %264 = vmatprep.subr.bf16.mxu0 %v501_v30 }
  0x23   :  { %318 = vmatpush1.bf16.msra.mxu1 %v503_v31  ;;  %265 = vmatpush1.bf16.msra.mxu0 %v504_v32 }
  0x26   :  { %334 = vmatmul.mubr.bf16.vlgmr.msra.gmra.mrb[0].mxu1 %v505_v33  ;;  %281 = vmatmul.mubr.bf16.vlgmr.msra.gmra.mrb[0].mxu0 %v505_v33 }
  0x27   :  { %449 = vmatprep.mubr.msk.bf16.mxu1 %vm241_vm0, %v508_v34  ;;  %447 = vmatprep.mubr.msk.bf16.mxu0 %vm241_vm0, %v508_v34 }
  0x2e   :  { %342 = vmatmul.mubr.bf16.gmra.mrb[4].mxu1 %v510_v35  ;;  %291 = vmatmul.mubr.bf16.gmra.mrb[4].mxu0 %v510_v35 }
  0x89   :  { %v62_v36 = vpop.permute.xlu0 %61  ;;  %v72_v37 = vpop.permute.xlu1 %71 }
  0x8d   :  { %v67_v39 = vpop.permute.xlu0 %66  ;;  %v77_v62 = vpop.permute.xlu1 %76 }
  0xf9   :  { %v335_v38 = vpop.f32.mrb[0].mxu1  ;;  %v282_v41 = vpop.f32.mrb[0].mxu0 }
  0xfa   :  { %v336_v40 = vadd.f32 %v335_v38, %v62_v36  ;;  %v337_v42 = vpop.f32.mrb[1].mxu1  ;;  %v283_v43 = vadd.f32 %v282_v41, %v62_v36  ;;  %v284_v44 = vpop.f32.mrb[1].mxu0 }
  0xfb   :  { %v338_v45 = vpop.f32.mrb[2].mxu1  ;;  %v285_v47 = vadd.f32 %v284_v44, %v62_v36  ;;  %v286_v49 = vpop.f32.mrb[2].mxu0 }
  0xfc   :  { %v352_v46 = vmax.f32 %v336_v40, 0.0  ;;  %v339_v48 = vadd.f32 %v338_v45, %v67_v39  ;;  %v340_v50 = vpop.f32.mrb[3].mxu1  ;;  %v350_v51 = vmax.f32 %v283_v43, 0.0  ;;  %v287_v52 = vadd.f32 %v286_v49, %v67_v39  ;;  %v288_v53 = vpop.f32.mrb[3].mxu0 }
  0xfd   :  { %v351_v55 = vmax.f32 %v285_v47, 0.0  ;;  %v289_v57 = vadd.f32 %v288_v53, %v67_v39 }
  0xfe   :  { %v459_v54 = vpack.c.bf16 %v352_v46, %v352_v46  ;;  %v355_v56 = vmax.f32 %v339_v48, 0.0  ;;  %v353_v58 = vmax.f32 %v287_v52, 0.0 }
  0xff   :  { %v458_v59 = vpack.c.bf16 %v351_v55, %v350_v51  ;;  %v354_v61 = vmax.f32 %v289_v57, 0.0 }
 0x100   :  { %404 = vst.msk [vmem:[%s683_s3 + $0x8] sm:$0xf] %vm403_vm1, %v459_v54  ;;  %v461_v60 = vpack.c.bf16 %v355_v56, %v355_v56 }
 0x101   :  { %v343_v63 = vpop.f32.mrb[4].mxu1  ;;  %402 = vst [vmem:[%s683_s3] sm:$0xff] %v458_v59  ;;  %v460_v0 = vpack.c.bf16 %v354_v61, %v353_v58  ;;  %v292_v2 = vpop.f32.mrb[4].mxu0 }
 0x102   :  { %406 = vst.msk [vmem:[%s683_s3 + $0x14] sm:$0xf] %vm403_vm1, %v461_v60  ;;  %v344_v1 = vadd.f32 %v343_v63, %v72_v37  ;;  %v345_v3 = vpop.f32.mrb[5].mxu1  ;;  %v293_v4 = vadd.f32 %v292_v2, %v72_v37  ;;  %v294_v5 = vpop.f32.mrb[5].mxu0 }
 0x103   :  { %v346_v6 = vpop.f32.mrb[6].mxu1  ;;  %405 = vst [vmem:[%s683_s3 + $0xc] sm:$0xff] %v460_v0  ;;  %v295_v8 = vadd.f32 %v294_v5, %v72_v37  ;;  %v296_v10 = vpop.f32.mrb[6].mxu0 }
 0x104   :  { %v358_v7 = vmax.f32 %v344_v1, 0.0  ;;  %v347_v9 = vadd.f32 %v346_v6, %v77_v62  ;;  %v348_v11 = vpop.f32.mrb[7].mxu1  ;;  %v356_v12 = vmax.f32 %v293_v4, 0.0  ;;  %v297_v13 = vadd.f32 %v296_v10, %v77_v62  ;;  %v298_v14 = vpop.f32.mrb[7].mxu0 }
 0x105   :  { %v357_v16 = vmax.f32 %v295_v8, 0.0  ;;  %v299_v18 = vadd.f32 %v298_v14, %v77_v62 }
 0x106   :  { %v463_v15 = vpack.c.bf16 %v358_v7, %v358_v7  ;;  %v361_v17 = vmax.f32 %v347_v9, 0.0  ;;  %v359_v19 = vmax.f32 %v297_v13, 0.0 }
 0x107   :  { %v462_v20 = vpack.c.bf16 %v357_v16, %v356_v12  ;;  %v360_v22 = vmax.f32 %v299_v18, 0.0 }
 0x108   :  { %408 = vst.msk [vmem:[%s683_s3 + $0x20] sm:$0xf] %vm403_vm1, %v463_v15  ;;  %v465_v21 = vpack.c.bf16 %v361_v17, %v361_v17 }
 0x109   :  { %407 = vst [vmem:[%s683_s3 + $0x18] sm:$0xff] %v462_v20  ;;  %v464_v23 = vpack.c.bf16 %v360_v22, %v359_v19 }
 0x10a   :  { %410 = vst.msk [vmem:[%s683_s3 + $0x2c] sm:$0xf] %vm403_vm1, %v465_v21 }
 0x10b   :  { %409 = vst [vmem:[%s683_s3 + $0x24] sm:$0xff] %v464_v23 }

// kernel: autoencoder_forward.9
= control target key start
LH: loop header
LB: loop body
LE: loop exit
PB: predicated region body
PF: predicated region fallthrough
CT: control target
= control target key end

     0   :  { %v640_v1 = vmov 0   ;;  %vm283_vm0 = vcmask 261120   ;;  %vm466_vm1 = vcmask 650240   ;;  %s811_s1 = inlined_call_operand.vmem [shape: bf16[288,80], index: 1, kind: input, shape index: {}]   ;;  %s812_s0 = inlined_call_operand.vmem [shape: bf16[64,288], index: 0, kind: input, shape index: {}]   ;;  %s813_s2 = inlined_call_operand.vmem [shape: f32[64,1], index: 2, kind: input, shape index: {}]   ;;  %s814_s3 = inlined_call_operand.vmem [shape: bf16[64,80], index: 3, kind: output, shape index: {}]  }
   0x1   :  { %v606_v0 = vld [vmem:[%s811_s1 + $0x40] sm:$0xff]   ;;  %605 = vset.pattern.permute.xlu1 %v640_v1  ;;  %604 = vset.pattern.permute.xlu0 %v640_v1  ;;  %v608_v3 = vld [vmem:[%s811_s1 + $0x48] sm:$0xff]   ;;  %v610_v5 = vld [vmem:[%s811_s1 + $0x50] sm:$0xff]  }
   0x2   :  { %v607_v2 = vld [vmem:[%s811_s1] sm:$0xff]   ;;  %529 = vmatprep.subr.bf16.mxu0 %v606_v0  ;;  %587 = vmatprep.subr.bf16.mxu1 %v606_v0  ;;  %v609_v4 = vld [vmem:[%s811_s1 + $0x8] sm:$0xff]   ;;  %v611_v6 = vld [vmem:[%s811_s1 + $0x10] sm:$0xff]  }
   0x3   :  { %530 = vmatpush3.bf16.msra.mxu0 %v607_v2  ;;  %595 = vmatpush3.bf16.msra.mxu1 %v607_v2  ;;  %v612_v7 = vld [vmem:[%s811_s1 + $0x58] sm:$0xff]   ;;  %v614_v9 = vld [vmem:[%s811_s1 + $0x60] sm:$0xff]   ;;  %v616_v11 = vld [vmem:[%s811_s1 + $0x68] sm:$0xff]  }
   0x4   :  { %531 = vmatprep.subr.bf16.mxu0 %v608_v3  ;;  %588 = vmatprep.subr.bf16.mxu1 %v608_v3  ;;  %v613_v8 = vld [vmem:[%s811_s1 + $0x18] sm:$0xff]   ;;  %v615_v10 = vld [vmem:[%s811_s1 + $0x20] sm:$0xff]   ;;  %v617_v14 = vld [vmem:[%s811_s1 + $0x28] sm:$0xff]  }
   0x5   :  { %v624_v12 = vld [vmem:[%s812_s0 + $0x4] ss:$12 sps:$4 sm:$0xff]   ;;  %v627_v13 = vld [vmem:[%s812_s0 + $0x4c] ss:$12 sps:$4 sm:$0xff]   ;;  %v625_v23 = vld [vmem:[%s812_s0 + $0x48] ss:$12 sps:$4 sm:$0xff]  }
   0x6   :  { %v618_v15 = vld [vmem:[%s811_s1 + $0x70] sm:$0xff]   ;;  %328 = vmatprep.mubr.bf16.mxu0 %v624_v12  ;;  %352 = vmatprep.mubr.bf16.mxu1 %v627_v13  ;;  %v620_v17 = vld [vmem:[%s811_s1 + $0x78] sm:$0xff]   ;;  %v67_v20 = vld [vmem:[%s813_s2] sm:$0xff] }
   0x7   :  { %532 = vmatpush3.bf16.msra.mxu0 %v609_v4  ;;  %596 = vmatpush3.bf16.msra.mxu1 %v609_v4  ;;  %v619_v16 = vld [vmem:[%s811_s1 + $0x30] sm:$0xff]   ;;  %v621_v18 = vld [vmem:[%s811_s1 + $0x38] sm:$0xff]   ;;  %v628_v21 = vld [vmem:[%s811_s1 + $0x80] sm:$0xff]  }
   0x8   :  { %533 = vmatprep.subr.bf16.mxu0 %v610_v5  ;;  %589 = vmatprep.subr.bf16.mxu1 %v610_v5  ;;  %v69_v19 = vld [vmem:[%s813_s2 + $0x10] sm:$0xff]  ;;  %v622_v22 = vld [vmem:[%s812_s0] ss:$12 sps:$4 sm:$0xff]   ;;  %v70_v24 = vld [vmem:[%s813_s2 + $0x18] sm:$0xff] }
   0x9   :  { %87 = vperm.xlu1 %605, %v69_v19   ;;  %77 = vperm.xlu0 %604, %v67_v20   ;;  %v68_v25 = vld [vmem:[%s813_s2 + $0x8] sm:$0xff]  ;;  %v71_v30 = vld [vmem:[%s813_s2 + $0x20] sm:$0xff]  ;;  %v74_v33 = vld [vmem:[%s813_s2 + $0x38] sm:$0xff] }
   0xa   :  { %v630_v26 = vld [vmem:[%s812_s0 + $0x1c] ss:$12 sps:$4 sm:$0xff]   ;;  %v633_v31 = vld [vmem:[%s812_s0 + $0x18] ss:$12 sps:$4 sm:$0xff]   ;;  %v634_v32 = vld [vmem:[%s812_s0 + $0x20] ss:$12 sps:$4 sm:$0xff]  }
   0xb   :  { %534 = vmatpush3.bf16.msra.mxu0 %v611_v6  ;;  %597 = vmatpush3.bf16.msra.mxu1 %v611_v6  ;;  %v629_v27 = vld [vmem:[%s811_s1 + $0x88] sm:$0xff]   ;;  %v73_v34 = vld [vmem:[%s813_s2 + $0x30] sm:$0xff]  ;;  %v637_v36 = vld [vmem:[%s812_s0 + $0x38] ss:$12 sps:$4 sm:$0xff]  }
   0xc   :  { %535 = vmatprep.subr.bf16.mxu0 %v612_v7  ;;  %590 = vmatprep.subr.bf16.mxu1 %v612_v7  ;;  %v632_v28 = vld [vmem:[%s812_s0 + $0x8] ss:$12 sps:$4 sm:$0xff]   ;;  %v638_v37 = vld [vmem:[%s812_s0 + $0x30] ss:$12 sps:$4 sm:$0xff]  }
   0xd   :  { %92 = vperm.xlu1 %605, %v70_v24   ;;  %82 = vperm.xlu0 %604, %v68_v25   ;;  %v72_v29 = vld [vmem:[%s813_s2 + $0x28] sm:$0xff]  ;;  %v635_v35 = vld [vmem:[%s812_s0 + $0x34] ss:$12 sps:$4 sm:$0xff]   ;;  %v639_v38 = vld [vmem:[%s812_s0 + $0x50] ss:$12 sps:$4 sm:$0xff]  }
   0xf   :  { %536 = vmatpush3.bf16.msra.mxu0 %v613_v8  ;;  %598 = vmatpush3.bf16.msra.mxu1 %v613_v8 }
  0x10   :  { %537 = vmatprep.subr.bf16.mxu0 %v614_v9  ;;  %591 = vmatprep.subr.bf16.mxu1 %v614_v9 }
  0x11   :  { %102 = vperm.xlu1 %605, %v72_v29   ;;  %97 = vperm.xlu0 %604, %v71_v30  }
  0x13   :  { %538 = vmatpush3.bf16.msra.mxu0 %v615_v10  ;;  %599 = vmatpush3.bf16.msra.mxu1 %v615_v10 }
  0x14   :  { %539 = vmatprep.subr.bf16.mxu0 %v616_v11  ;;  %592 = vmatprep.subr.bf16.mxu1 %v616_v11 }
  0x15   :  { %112 = vperm.xlu1 %605, %v74_v33   ;;  %107 = vperm.xlu0 %604, %v73_v34  }
  0x17   :  { %540 = vmatpush3.bf16.msra.mxu0 %v617_v14  ;;  %600 = vmatpush3.bf16.msra.mxu1 %v617_v14 }
  0x18   :  { %541 = vmatprep.subr.bf16.mxu0 %v618_v15  ;;  %593 = vmatprep.subr.bf16.mxu1 %v618_v15 }
  0x1b   :  { %542 = vmatpush3.bf16.msra.mxu0 %v619_v16  ;;  %601 = vmatpush3.bf16.msra.mxu1 %v619_v16 }
  0x1c   :  { %543 = vmatprep.subr.bf16.mxu0 %v620_v17  ;;  %594 = vmatprep.subr.bf16.mxu1 %v620_v17 }
  0x1f   :  { %544 = vmatpush3.bf16.msra.mxu0 %v621_v18  ;;  %602 = vmatpush3.bf16.msra.mxu1 %v621_v18 }
  0x20   :  { %575 = vmatprep.subr.bf16.mxu1 %v628_v21 }
  0x22   :  { %329 = vmatmul.mubr.bf16.vlgmr.msra.gmra.mrb[0].mxu0 %v622_v22  ;;  %353 = vmatmul.mubr.bf16.vlgmr.msra.gmra.mrb[0].mxu1 %v625_v23 }
  0x23   :  { %576 = vmatpush3.bf16.msra.mxu1 %v628_v21  ;;  %336 = vmatprep.mubr.bf16.mxu0 %v630_v26 }
  0x24   :  { %577 = vmatprep.subr.bf16.mxu1 %v629_v27  ;;  %579 = vmatprep.mubr.msk.bf16.mxu1 %vm283_vm0, %v632_v28 }
  0x27   :  { %578 = vmatpush3.bf16.msra.mxu1 %v629_v27 }
  0x2a   :  { %337 = vmatmul.mubr.bf16.gmra.mrb[4].mxu0 %v633_v31  ;;  %580 = vmatmul.mubr.msk.bf16.vlgmr.msra.gmra.mrb[4].mxu1 %vm283_vm0, %v634_v32 }
  0x2b   :  { %344 = vmatprep.mubr.bf16.mxu0 %v635_v35  ;;  %583 = vmatprep.mubr.msk.bf16.mxu1 %vm283_vm0, %v637_v36 }
  0x32   :  { %345 = vmatmul.mubr.bf16.gmra.mrb[8].mxu0 %v638_v37  ;;  %584 = vmatmul.mubr.msk.bf16.gmra.mrb[8].mxu1 %vm283_vm0, %v639_v38 }
  0x88   :  { %v88_v39 = vpop.permute.xlu1 %87  ;;  %v78_v40 = vpop.permute.xlu0 %77 }
  0x8c   :  { %v93_v41 = vpop.permute.xlu1 %92  ;;  %v83_v42 = vpop.permute.xlu0 %82 }
  0x90   :  { %v98_v55 = vpop.permute.xlu0 %97  ;;  %v103_v56 = vpop.permute.xlu1 %102 }
  0x94   :  { %v108_v5 = vpop.permute.xlu0 %107  ;;  %v113_v10 = vpop.permute.xlu1 %112 }
  0xf5   :  { %v545_v43 = vpop.f32.mrb[0].mxu0  ;;  %v563_v44 = vpop.f32.mrb[0].mxu1 }
  0xf6   :  { %v546_v45 = vpop.f32.mrb[1].mxu0  ;;  %v564_v46 = vpop.f32.mrb[1].mxu1 }
  0xf7   :  { %v547_v47 = vadd.f32 %v546_v45, %v545_v43  ;;  %v548_v48 = vpop.f32.mrb[2].mxu0  ;;  %v565_v49 = vadd.f32 %v564_v46, %v563_v44  ;;  %v566_v50 = vpop.f32.mrb[2].mxu1 }
  0xf8   :  { %v549_v51 = vpop.f32.mrb[3].mxu0  ;;  %v567_v52 = vpop.f32.mrb[3].mxu1 }
  0xf9   :  { %v550_v53 = vadd.f32 %v549_v51, %v548_v48  ;;  %v568_v54 = vadd.f32 %v567_v52, %v566_v50  ;;  %v331_v59 = vadd.f32 %v547_v47, %v78_v40  ;;  %v355_v15 = vadd.f32 %v565_v49, %v108_v5 }
  0xfb   :  { %v334_v2 = vadd.f32 %v550_v53, %v83_v42  ;;  %v358_v21 = vadd.f32 %v568_v54, %v113_v10 }
  0xfd   :  { %v551_v57 = vpop.f32.mrb[4].mxu0  ;;  %v581_v58 = vpop.f32.mrb[4].mxu1 }
  0xfe   :  { %v552_v60 = vpop.f32.mrb[5].mxu0  ;;  %v395_v61 = vpop.f32.mrb[5].mxu1 }
  0xff   :  { %v553_v62 = vadd.f32 %v552_v60, %v551_v57  ;;  %v396_v63 = vadd.f32 %v395_v61, %v331_v59  ;;  %v554_v0 = vpop.f32.mrb[6].mxu0  ;;  %v582_v1 = vpop.f32.mrb[6].mxu1 }
 0x100   :  { %v555_v3 = vpop.f32.mrb[7].mxu0  ;;  %v398_v4 = vpop.f32.mrb[7].mxu1 }
 0x101   :  { %v339_v6 = vadd.f32 %v553_v62, %v88_v39  ;;  %v426_v7 = vmax.f32 %v396_v63, 0.0  ;;  %v556_v8 = vadd.f32 %v555_v3, %v554_v0  ;;  %v399_v9 = vadd.f32 %v398_v4, %v334_v2 }
 0x103   :  { %v404_v11 = vadd.f32 %v581_v58, %v339_v6  ;;  %v521_v12 = vpack.c.bf16 %v426_v7, %v426_v7  ;;  %v342_v13 = vadd.f32 %v556_v8, %v93_v41  ;;  %v427_v14 = vmax.f32 %v399_v9, 0.0 }
 0x105   :  { %v428_v16 = vmax.f32 %v404_v11, 0.0  ;;  %467 = vst.msk [vmem:[%s814_s3] sm:$0xf] %vm466_vm1, %v521_v12  ;;  %v407_v17 = vadd.f32 %v582_v1, %v342_v13  ;;  %v522_v18 = vpack.c.bf16 %v427_v14, %v427_v14  ;;  %v557_v19 = vpop.f32.mrb[8].mxu0  ;;  %v585_v20 = vpop.f32.mrb[8].mxu1 }
 0x106   :  { %v420_v22 = vadd.f32 %v585_v20, %v355_v15  ;;  %v558_v23 = vpop.f32.mrb[9].mxu0  ;;  %v411_v24 = vpop.f32.mrb[9].mxu1 }
 0x107   :  { %v523_v25 = vpack.c.bf16 %v428_v16, %v428_v16  ;;  %v429_v26 = vmax.f32 %v407_v17, 0.0  ;;  %468 = vst.msk [vmem:[%s814_s3 + $0x4] sm:$0xf] %vm466_vm1, %v522_v18  ;;  %v559_v27 = vadd.f32 %v558_v23, %v557_v19  ;;  %v560_v28 = vpop.f32.mrb[10].mxu0  ;;  %v586_v29 = vpop.f32.mrb[10].mxu1 }
 0x108   :  { %v432_v30 = vmax.f32 %v420_v22, 0.0  ;;  %v423_v31 = vadd.f32 %v586_v29, %v358_v21  ;;  %v561_v32 = vpop.f32.mrb[11].mxu0  ;;  %v414_v33 = vpop.f32.mrb[11].mxu1 }
 0x109   :  { %469 = vst.msk [vmem:[%s814_s3 + $0x8] sm:$0xf] %vm466_vm1, %v523_v25  ;;  %v524_v34 = vpack.c.bf16 %v429_v26, %v429_v26  ;;  %v347_v35 = vadd.f32 %v559_v27, %v98_v55  ;;  %v562_v36 = vadd.f32 %v561_v32, %v560_v28 }
 0x10a   :  { %v527_v37 = vpack.c.bf16 %v432_v30, %v432_v30  ;;  %v433_v38 = vmax.f32 %v423_v31, 0.0 }
 0x10b   :  { %470 = vst.msk [vmem:[%s814_s3 + $0xc] sm:$0xf] %vm466_vm1, %v524_v34  ;;  %v412_v39 = vadd.f32 %v411_v24, %v347_v35  ;;  %v350_v40 = vadd.f32 %v562_v36, %v103_v56 }
 0x10c   :  { %473 = vst.msk [vmem:[%s814_s3 + $0x18] sm:$0xf] %vm466_vm1, %v527_v37  ;;  %v528_v41 = vpack.c.bf16 %v433_v38, %v433_v38 }
 0x10d   :  { %v430_v42 = vmax.f32 %v412_v39, 0.0  ;;  %v415_v43 = vadd.f32 %v414_v33, %v350_v40 }
 0x10e   :  { %474 = vst.msk [vmem:[%s814_s3 + $0x1c] sm:$0xf] %vm466_vm1, %v528_v41 }
 0x10f   :  { %v525_v44 = vpack.c.bf16 %v430_v42, %v430_v42  ;;  %v431_v45 = vmax.f32 %v415_v43, 0.0 }
 0x111   :  { %471 = vst.msk [vmem:[%s814_s3 + $0x10] sm:$0xf] %vm466_vm1, %v525_v44  ;;  %v526_v46 = vpack.c.bf16 %v431_v45, %v431_v45 }
 0x113   :  { %472 = vst.msk [vmem:[%s814_s3 + $0x14] sm:$0xf] %vm466_vm1, %v526_v46 }

// kernel: autoencoder_forward.10
= control target key start
LH: loop header
LB: loop body
LE: loop exit
PB: predicated region body
PF: predicated region fallthrough
CT: control target
= control target key end

     0   :  { %v4741_v22 = vmov 1966171168   ;;  %v370_v24 = vlaneseq  ;;  %vm4743_vm0 = vmmov 0   ;;  %vm2005_vm1 = vcmask 1040384   ;;  %s5914_s1 = inlined_call_operand.vmem [shape: bf16[2560,128], index: 1, kind: input, shape index: {}]   ;;  %s5915_s0 = inlined_call_operand.vmem [shape: bf16[2,2560], index: 0, kind: input, shape index: {}]   ;;  %s5916_s3 = inlined_call_operand.vmem [shape: bf16[128,18], index: 3, kind: input, shape index: {}]   ;;  %s5917_s2 = inlined_call_operand.vmem [shape: f32[1,128], index: 2, kind: input, shape index: {}]   ;;  %s5918_s5 = inlined_call_operand.vmem [shape: bf16[18,128], index: 5, kind: input, shape index: {}]   ;;  %s5919_s7 = inlined_call_operand.vmem [shape: bf16[128,2560], index: 7, kind: input, shape index: {}]   ;;  %s5920_s4 = inlined_call_operand.vmem [shape: f32[1,18], index: 4, kind: input, shape index: {}]   ;;  %s5921_s6 = inlined_call_operand.vmem [shape: f32[1,128], index: 6, kind: input, shape index: {}]   ;;  %s5922_s8 = inlined_call_operand.vmem [shape: f32[1,2560], index: 8, kind: input, shape index: {}]   ;;  %s5923_s9 = inlined_call_operand.vmem [shape: bf16[2,2560], index: 9, kind: output, shape index: {}]  }
   0x1   :  { %v4329_v0 = vld [vmem:[%s5914_s1 + $0x40] sm:$0xff]   ;;  %v4333_v4 = vld [vmem:[%s5914_s1 + $0x48] sm:$0xff]   ;;  %v4337_v8 = vld [vmem:[%s5914_s1 + $0x50] sm:$0xff]   ;;  %v368_v23 = vunpack.c.l.s4 %v4741_v22  ;;  %vm2001_vm2 = vcmask 146432  }
   0x2   :  { %v4330_v1 = vld [vmem:[%s5914_s1 + $0xc0] sm:$0xff]   ;;  %4065 = vmatprep.subr.bf16.mxu0 %v4329_v0  ;;  %v4334_v5 = vld [vmem:[%s5914_s1 + $0xc8] sm:$0xff]   ;;  %v4338_v9 = vld [vmem:[%s5914_s1 + $0xd0] sm:$0xff]   ;;  %v4873_v30 = vshrl.u32 %v370_v24, 7 }
   0x3   :  { %v4331_v2 = vld [vmem:[%s5914_s1] sm:$0xff]   ;;  %4087 = vmatprep.subr.bf16.mxu1 %v4330_v1  ;;  %v4335_v6 = vld [vmem:[%s5914_s1 + $0x8] sm:$0xff]   ;;  %v4339_v10 = vld [vmem:[%s5914_s1 + $0x10] sm:$0xff]   ;;  %v369_v29 = vunpack.c.0.s8 %v368_v23 }
   0x4   :  { %v4332_v3 = vld [vmem:[%s5914_s1 + $0x80] sm:$0xff]   ;;  %4066 = vmatpush3.bf16.msra.mxu0 %v4331_v2  ;;  %v4336_v7 = vld [vmem:[%s5914_s1 + $0x88] sm:$0xff]   ;;  %v4340_v11 = vld [vmem:[%s5914_s1 + $0x90] sm:$0xff]  }
   0x5   :  { %4088 = vmatpush3.bf16.msra.mxu1 %v4332_v3  ;;  %4067 = vmatprep.subr.bf16.mxu0 %v4333_v4  ;;  %v4341_v12 = vld [vmem:[%s5914_s1 + $0x58] sm:$0xff]   ;;  %v4345_v16 = vld [vmem:[%s5914_s1 + $0x60] sm:$0xff]   ;;  %v4349_v20 = vld [vmem:[%s5914_s1 + $0x68] sm:$0xff]   ;;  %v4888_v35 = vsub.s32 %v369_v29, %v4873_v30 }
   0x6   :  { %4089 = vmatprep.subr.bf16.mxu1 %v4334_v5  ;;  %v4342_v13 = vld [vmem:[%s5914_s1 + $0xd8] sm:$0xff]   ;;  %v4346_v17 = vld [vmem:[%s5914_s1 + $0xe0] sm:$0xff]   ;;  %v4350_v21 = vld [vmem:[%s5914_s1 + $0xe8] sm:$0xff]  }
   0x7   :  { %v4343_v14 = vld [vmem:[%s5914_s1 + $0x18] sm:$0xff]   ;;  %v4347_v18 = vld [vmem:[%s5914_s1 + $0x20] sm:$0xff]   ;;  %v4351_v25 = vld [vmem:[%s5914_s1 + $0x28] sm:$0xff]  }
   0x8   :  { %4068 = vmatpush3.bf16.msra.mxu0 %v4335_v6  ;;  %v4344_v15 = vld [vmem:[%s5914_s1 + $0x98] sm:$0xff]   ;;  %v4348_v19 = vld [vmem:[%s5914_s1 + $0xa0] sm:$0xff]   ;;  %v4352_v26 = vld [vmem:[%s5914_s1 + $0xa8] sm:$0xff]  }
   0x9   :  { %4090 = vmatpush3.bf16.msra.mxu1 %v4336_v7  ;;  %4069 = vmatprep.subr.bf16.mxu0 %v4337_v8  ;;  %v4353_v27 = vld [vmem:[%s5914_s1 + $0x70] sm:$0xff]   ;;  %v4357_v33 = vld [vmem:[%s5914_s1 + $0x78] sm:$0xff]   ;;  %v33_v38 = vld [vmem:[%s5915_s0] sm:$0xff] }
   0xa   :  { %4091 = vmatprep.subr.bf16.mxu1 %v4338_v9  ;;  %v4354_v28 = vld [vmem:[%s5914_s1 + $0xf0] sm:$0xff]   ;;  %v4358_v34 = vld [vmem:[%s5914_s1 + $0xf8] sm:$0xff]   ;;  %v366_v39 = vcombine.high %v33_v38, %v33_v38  ;;  %v373_v40 = vrot.slane %v33_v38, %v4888_v35  ;;  %v4362_v41 = vld [vmem:[%s5914_s1 + $0x140] sm:$0xff]  }
   0xb   :  { %v4355_v31 = vld [vmem:[%s5914_s1 + $0x30] sm:$0xff]   ;;  %v4359_v36 = vld [vmem:[%s5914_s1 + $0x38] sm:$0xff]   ;;  %v4363_v42 = vld [vmem:[%s5914_s1 + $0x1c0] sm:$0xff]  }
   0xc   :  { %4070 = vmatpush3.bf16.msra.mxu0 %v4339_v10  ;;  %v4356_v32 = vld [vmem:[%s5914_s1 + $0xb0] sm:$0xff]   ;;  %v4360_v37 = vld [vmem:[%s5914_s1 + $0xb8] sm:$0xff]   ;;  %v381_v43 = vcombine.high %v373_v40, %v373_v40  ;;  %v389_v44 = vrot.slane %v373_v40, %v4888_v35  ;;  %v4908_v45 = vrot.slane %v366_v39, %v4888_v35  ;;  %v4364_v47 = vld [vmem:[%s5914_s1 + $0x100] sm:$0xff]  }
   0xd   :  { %4092 = vmatpush3.bf16.msra.mxu1 %v4340_v11  ;;  %4071 = vmatprep.subr.bf16.mxu0 %v4341_v12  ;;  %v4366_v50 = vld [vmem:[%s5914_s1 + $0x148] sm:$0xff]   ;;  %v4365_v52 = vld [vmem:[%s5914_s1 + $0x180] sm:$0xff]   ;;  %v4370_v57 = vld [vmem:[%s5914_s1 + $0x150] sm:$0xff]  }
   0xe   :  { %4093 = vmatprep.subr.bf16.mxu1 %v4342_v13  ;;  %v403_v46 = vrot.slane %v381_v43, %v4888_v35  ;;  %v382_v48 = vcombine.high %v4908_v45, %v4908_v45  ;;  %v411_v49 = vcombine.high %v389_v44, %v389_v44  ;;  %v4367_v54 = vld [vmem:[%s5914_s1 + $0x1c8] sm:$0xff]   ;;  %v4371_v59 = vld [vmem:[%s5914_s1 + $0x1d0] sm:$0xff]   ;;  %v4374_v61 = vld [vmem:[%s5914_s1 + $0x158] sm:$0xff]  }
   0xf   :  { %v4368_v55 = vld [vmem:[%s5914_s1 + $0x108] sm:$0xff]   ;;  %v4372_v60 = vld [vmem:[%s5914_s1 + $0x110] sm:$0xff]   ;;  %v4375_v63 = vld [vmem:[%s5914_s1 + $0x1d8] sm:$0xff]  }
  0x10   :  { %4072 = vmatpush3.bf16.msra.mxu0 %v4343_v14  ;;  %1500 = vmatprep.mubr.bf16.mxu0 %v403_v46  ;;  %v413_v51 = vcombine.high %v403_v46, %v403_v46  ;;  %v410_v53 = vrot.slane %v382_v48, %v4888_v35  ;;  %v4369_v58 = vld [vmem:[%s5914_s1 + $0x188] sm:$0xff]   ;;  %v4373_v62 = vld [vmem:[%s5914_s1 + $0x190] sm:$0xff]   ;;  %v4376_v0 = vld [vmem:[%s5914_s1 + $0x118] sm:$0xff]  }
  0x11   :  { %4094 = vmatpush3.bf16.msra.mxu1 %v4344_v15  ;;  %4073 = vmatprep.subr.bf16.mxu0 %v4345_v16  ;;  %v4378_v1 = vld [vmem:[%s5914_s1 + $0x160] sm:$0xff]   ;;  %v4377_v2 = vld [vmem:[%s5914_s1 + $0x198] sm:$0xff]   ;;  %v4382_v5 = vld [vmem:[%s5914_s1 + $0x168] sm:$0xff]  }
  0x12   :  { %4095 = vmatprep.subr.bf16.mxu1 %v4346_v17  ;;  %1540 = vmatprep.mubr.bf16.mxu1 %v413_v51  ;;  %v414_v56 = vcombine.high %v410_v53, %v410_v53  ;;  %v4379_v3 = vld [vmem:[%s5914_s1 + $0x1e0] sm:$0xff]   ;;  %v4383_v7 = vld [vmem:[%s5914_s1 + $0x1e8] sm:$0xff]   ;;  %v4386_v9 = vld [vmem:[%s5914_s1 + $0x170] sm:$0xff]   ;;  %v396_v17 = vrot.slane %v4908_v45, %v4888_v35 }
  0x13   :  { %v4380_v4 = vld [vmem:[%s5914_s1 + $0x120] sm:$0xff]   ;;  %v4384_v8 = vld [vmem:[%s5914_s1 + $0x128] sm:$0xff]   ;;  %v4387_v11 = vld [vmem:[%s5914_s1 + $0x1f0] sm:$0xff]  }
  0x14   :  { %4074 = vmatpush3.bf16.msra.mxu0 %v4347_v18  ;;  %v4381_v6 = vld [vmem:[%s5914_s1 + $0x1a0] sm:$0xff]   ;;  %v4385_v10 = vld [vmem:[%s5914_s1 + $0x1a8] sm:$0xff]   ;;  %v4388_v12 = vld [vmem:[%s5914_s1 + $0x130] sm:$0xff]   ;;  %v412_v22 = vcombine.high %v396_v17, %v396_v17 }
  0x15   :  { %4096 = vmatpush3.bf16.msra.mxu1 %v4348_v19  ;;  %4075 = vmatprep.subr.bf16.mxu0 %v4349_v20  ;;  %v4390_v13 = vld [vmem:[%s5914_s1 + $0x178] sm:$0xff]   ;;  %v4389_v14 = vld [vmem:[%s5914_s1 + $0x1b0] sm:$0xff]   ;;  %v4394_v18 = vld [vmem:[%s5914_s1 + $0x240] sm:$0xff]  }
  0x16   :  { %4097 = vmatprep.subr.bf16.mxu1 %v4350_v21  ;;  %v4391_v15 = vld [vmem:[%s5914_s1 + $0x1f8] sm:$0xff]   ;;  %v4395_v20 = vld [vmem:[%s5914_s1 + $0x2c0] sm:$0xff]   ;;  %v4398_v23 = vld [vmem:[%s5914_s1 + $0x248] sm:$0xff]  }
  0x17   :  { %v4392_v16 = vld [vmem:[%s5914_s1 + $0x138] sm:$0xff]   ;;  %v4396_v21 = vld [vmem:[%s5914_s1 + $0x200] sm:$0xff]   ;;  %v4403_v29 = vld [vmem:[%s5914_s1 + $0x2d0] sm:$0xff]  }
  0x18   :  { %4076 = vmatpush3.bf16.msra.mxu0 %v4351_v25  ;;  %v4393_v19 = vld [vmem:[%s5914_s1 + $0x1b8] sm:$0xff]   ;;  %v4397_v24 = vld [vmem:[%s5914_s1 + $0x280] sm:$0xff]   ;;  %v4399_v25 = vld [vmem:[%s5914_s1 + $0x2c8] sm:$0xff]  }
  0x19   :  { %4098 = vmatpush3.bf16.msra.mxu1 %v4352_v26  ;;  %4077 = vmatprep.subr.bf16.mxu0 %v4353_v27  ;;  %v4400_v26 = vld [vmem:[%s5914_s1 + $0x208] sm:$0xff]   ;;  %v4402_v27 = vld [vmem:[%s5914_s1 + $0x250] sm:$0xff]   ;;  %v4409_v38 = vld [vmem:[%s5914_s1 + $0x298] sm:$0xff]  }
  0x1a   :  { %4099 = vmatprep.subr.bf16.mxu1 %v4354_v28  ;;  %v4401_v28 = vld [vmem:[%s5914_s1 + $0x288] sm:$0xff]   ;;  %v4411_v39 = vld [vmem:[%s5914_s1 + $0x2e0] sm:$0xff]   ;;  %v4418_v45 = vld [vmem:[%s5914_s1 + $0x270] sm:$0xff]  }
  0x1b   :  { %v4412_v40 = vld [vmem:[%s5914_s1 + $0x220] sm:$0xff]   ;;  %v4415_v43 = vld [vmem:[%s5914_s1 + $0x2e8] sm:$0xff]   ;;  %v4420_v48 = vld [vmem:[%s5914_s1 + $0x230] sm:$0xff]  }
  0x1c   :  { %4078 = vmatpush3.bf16.msra.mxu0 %v4355_v31  ;;  %v4404_v31 = vld [vmem:[%s5914_s1 + $0x210] sm:$0xff]   ;;  %v4417_v46 = vld [vmem:[%s5914_s1 + $0x2a8] sm:$0xff]   ;;  %v4423_v51 = vld [vmem:[%s5914_s1 + $0x2f8] sm:$0xff]  }
  0x1d   :  { %4100 = vmatpush3.bf16.msra.mxu1 %v4356_v32  ;;  %4079 = vmatprep.subr.bf16.mxu0 %v4357_v33  ;;  %v4406_v32 = vld [vmem:[%s5914_s1 + $0x258] sm:$0xff]   ;;  %v4405_v33 = vld [vmem:[%s5914_s1 + $0x290] sm:$0xff]  }
  0x1e   :  { %4101 = vmatprep.subr.bf16.mxu1 %v4358_v34  ;;  %v4407_v34 = vld [vmem:[%s5914_s1 + $0x2d8] sm:$0xff]  }
  0x20   :  { %4080 = vmatpush3.bf16.msra.mxu0 %v4359_v36  ;;  %v4408_v36 = vld [vmem:[%s5914_s1 + $0x218] sm:$0xff]  }
  0x21   :  { %4102 = vmatpush3.bf16.msra.mxu1 %v4360_v37  ;;  %4109 = vmatprep.subr.bf16.mxu0 %v4362_v41  ;;  %v4410_v37 = vld [vmem:[%s5914_s1 + $0x260] sm:$0xff]   ;;  %v4414_v41 = vld [vmem:[%s5914_s1 + $0x268] sm:$0xff]  }
  0x22   :  { %4131 = vmatprep.subr.bf16.mxu1 %v4363_v42  ;;  %v4413_v42 = vld [vmem:[%s5914_s1 + $0x2a0] sm:$0xff]  }
  0x23   :  { %1501 = vmatmul.mubr.bf16.vlgmr.msra.gmra.mrb[0].mxu0 %v389_v44  ;;  %v4416_v44 = vld [vmem:[%s5914_s1 + $0x228] sm:$0xff]  }
  0x24   :  { %4110 = vmatpush3.bf16.msra.mxu0 %v4364_v47  ;;  %1541 = vmatmul.mubr.bf16.vlgmr.msra.gmra.mrb[0].mxu1 %v411_v49  ;;  %v4419_v47 = vld [vmem:[%s5914_s1 + $0x2f0] sm:$0xff]   ;;  %v4422_v49 = vld [vmem:[%s5914_s1 + $0x278] sm:$0xff]  }
  0x25   :  { %4111 = vmatprep.subr.bf16.mxu0 %v4366_v50  ;;  %4132 = vmatpush3.bf16.msra.mxu1 %v4365_v52  ;;  %v4421_v50 = vld [vmem:[%s5914_s1 + $0x2b0] sm:$0xff]   ;;  %v34_v52 = vld [vmem:[%s5915_s0 + $0x8] sm:$0xff] }
  0x26   :  { %1580 = vmatprep.mubr.bf16.mxu0 %v410_v53  ;;  %4133 = vmatprep.subr.bf16.mxu1 %v4367_v54  ;;  %v4424_v53 = vld [vmem:[%s5914_s1 + $0x238] sm:$0xff]   ;;  %v422_v54 = vrot.slane %v34_v52, %v4888_v35 }
  0x27   :  { %1620 = vmatprep.mubr.bf16.mxu1 %v414_v56  ;;  %v4426_v56 = vld [vmem:[%s5914_s1 + $0x340] sm:$0xff]  }
  0x28   :  { %4112 = vmatpush3.bf16.msra.mxu0 %v4368_v55  ;;  %v415_v55 = vcombine.high %v34_v52, %v34_v52  ;;  %v4473_v52 = vld [vmem:[%s5914_s1 + $0x418] sm:$0xff]  }
  0x29   :  { %4113 = vmatprep.subr.bf16.mxu0 %v4370_v57  ;;  %4134 = vmatpush3.bf16.msra.mxu1 %v4369_v58  ;;  %v4425_v57 = vld [vmem:[%s5914_s1 + $0x2b8] sm:$0xff]   ;;  %v430_v58 = vcombine.high %v422_v54, %v422_v54 }
  0x2a   :  { %4135 = vmatprep.subr.bf16.mxu1 %v4371_v59  ;;  %v438_v59 = vrot.slane %v422_v54, %v4888_v35  ;;  %v4474_v54 = vld [vmem:[%s5914_s1 + $0x498] sm:$0xff]  }
  0x2c   :  { %4114 = vmatpush3.bf16.msra.mxu0 %v4372_v60  ;;  %v5111_v60 = vrot.slane %v415_v55, %v4888_v35  ;;  %v4476_v55 = vld [vmem:[%s5914_s1 + $0x4e0] sm:$0xff]  }
  0x2d   :  { %4115 = vmatprep.subr.bf16.mxu0 %v4374_v61  ;;  %4136 = vmatpush3.bf16.msra.mxu1 %v4373_v62  ;;  %v4427_v61 = vld [vmem:[%s5914_s1 + $0x3c0] sm:$0xff]   ;;  %v452_v62 = vrot.slane %v430_v58, %v4888_v35 }
  0x2e   :  { %4137 = vmatprep.subr.bf16.mxu1 %v4375_v63  ;;  %v4428_v63 = vld [vmem:[%s5914_s1 + $0x300] sm:$0xff]  }
  0x2f   :  { %v4478_v58 = vld [vmem:[%s5914_s1 + $0x4a0] sm:$0xff]  }
  0x30   :  { %4116 = vmatpush3.bf16.msra.mxu0 %v4376_v0  ;;  %v431_v0 = vcombine.high %v5111_v60, %v5111_v60 }
  0x31   :  { %4117 = vmatprep.subr.bf16.mxu0 %v4378_v1  ;;  %4138 = vmatpush3.bf16.msra.mxu1 %v4377_v2  ;;  %v460_v1 = vcombine.high %v438_v59, %v438_v59  ;;  %v4430_v2 = vld [vmem:[%s5914_s1 + $0x348] sm:$0xff]  }
  0x32   :  { %4139 = vmatprep.subr.bf16.mxu1 %v4379_v3  ;;  %v462_v3 = vcombine.high %v452_v62, %v452_v62 }
  0x34   :  { %4118 = vmatpush3.bf16.msra.mxu0 %v4380_v4  ;;  %v4429_v4 = vld [vmem:[%s5914_s1 + $0x380] sm:$0xff]  }
  0x35   :  { %4119 = vmatprep.subr.bf16.mxu0 %v4382_v5  ;;  %4140 = vmatpush3.bf16.msra.mxu1 %v4381_v6  ;;  %v459_v5 = vrot.slane %v431_v0, %v4888_v35  ;;  %v4431_v6 = vld [vmem:[%s5914_s1 + $0x3c8] sm:$0xff]   ;;  %v4485_v0 = vld [vmem:[%s5914_s1 + $0x430] sm:$0xff]  }
  0x36   :  { %4141 = vmatprep.subr.bf16.mxu1 %v4383_v7  ;;  %v4432_v7 = vld [vmem:[%s5914_s1 + $0x308] sm:$0xff]  }
  0x38   :  { %4120 = vmatpush3.bf16.msra.mxu0 %v4384_v8  ;;  %v463_v8 = vcombine.high %v459_v5, %v459_v5 }
  0x39   :  { %4121 = vmatprep.subr.bf16.mxu0 %v4386_v9  ;;  %4142 = vmatpush3.bf16.msra.mxu1 %v4385_v10  ;;  %v4434_v9 = vld [vmem:[%s5914_s1 + $0x350] sm:$0xff]   ;;  %v4433_v10 = vld [vmem:[%s5914_s1 + $0x388] sm:$0xff]  }
  0x3a   :  { %4143 = vmatprep.subr.bf16.mxu1 %v4387_v11  ;;  %v4435_v11 = vld [vmem:[%s5914_s1 + $0x3d0] sm:$0xff]  }
  0x3c   :  { %4122 = vmatpush3.bf16.msra.mxu0 %v4388_v12  ;;  %v4436_v12 = vld [vmem:[%s5914_s1 + $0x310] sm:$0xff]  }
  0x3d   :  { %4123 = vmatprep.subr.bf16.mxu0 %v4390_v13  ;;  %4144 = vmatpush3.bf16.msra.mxu1 %v4389_v14  ;;  %v4438_v13 = vld [vmem:[%s5914_s1 + $0x358] sm:$0xff]   ;;  %v4437_v14 = vld [vmem:[%s5914_s1 + $0x390] sm:$0xff]  }
  0x3e   :  { %4145 = vmatprep.subr.bf16.mxu1 %v4391_v15  ;;  %v4439_v15 = vld [vmem:[%s5914_s1 + $0x3d8] sm:$0xff]  }
  0x40   :  { %4124 = vmatpush3.bf16.msra.mxu0 %v4392_v16  ;;  %v4440_v16 = vld [vmem:[%s5914_s1 + $0x318] sm:$0xff]  }
  0x41   :  { %4153 = vmatprep.subr.bf16.mxu0 %v4394_v18  ;;  %4146 = vmatpush3.bf16.msra.mxu1 %v4393_v19  ;;  %v4441_v18 = vld [vmem:[%s5914_s1 + $0x398] sm:$0xff]   ;;  %v4443_v19 = vld [vmem:[%s5914_s1 + $0x3e0] sm:$0xff]  }
  0x42   :  { %4175 = vmatprep.subr.bf16.mxu1 %v4395_v20  ;;  %v4444_v20 = vld [vmem:[%s5914_s1 + $0x320] sm:$0xff]  }
  0x43   :  { %1581 = vmatmul.mubr.bf16.vlgmr.msra.gmra.mrb[4].mxu0 %v396_v17  ;;  %v4442_v17 = vld [vmem:[%s5914_s1 + $0x360] sm:$0xff]  }
  0x44   :  { %4154 = vmatpush3.bf16.msra.mxu0 %v4396_v21  ;;  %1621 = vmatmul.mubr.bf16.vlgmr.msra.gmra.mrb[4].mxu1 %v412_v22  ;;  %v4446_v21 = vld [vmem:[%s5914_s1 + $0x368] sm:$0xff]   ;;  %v4445_v22 = vld [vmem:[%s5914_s1 + $0x3a0] sm:$0xff]  }
  0x45   :  { %4155 = vmatprep.subr.bf16.mxu0 %v4398_v23  ;;  %4176 = vmatpush3.bf16.msra.mxu1 %v4397_v24  ;;  %v4447_v23 = vld [vmem:[%s5914_s1 + $0x3e8] sm:$0xff]  }
  0x46   :  { %4177 = vmatprep.subr.bf16.mxu1 %v4399_v25  ;;  %1660 = vmatprep.mubr.bf16.mxu0 %v452_v62  ;;  %v4448_v24 = vld [vmem:[%s5914_s1 + $0x328] sm:$0xff]   ;;  %v4450_v25 = vld [vmem:[%s5914_s1 + $0x370] sm:$0xff]  }
  0x47   :  { %1700 = vmatprep.mubr.bf16.mxu1 %v462_v3  ;;  %v4482_v62 = vld [vmem:[%s5914_s1 + $0x4a8] sm:$0xff]   ;;  %v4488_v3 = vld [vmem:[%s5914_s1 + $0x4f8] sm:$0xff]  }
  0x48   :  { %4156 = vmatpush3.bf16.msra.mxu0 %v4400_v26  ;;  %v4449_v26 = vld [vmem:[%s5914_s1 + $0x3a8] sm:$0xff]  }
  0x49   :  { %4157 = vmatprep.subr.bf16.mxu0 %v4402_v27  ;;  %4178 = vmatpush3.bf16.msra.mxu1 %v4401_v28  ;;  %v4451_v27 = vld [vmem:[%s5914_s1 + $0x3f0] sm:$0xff]  }
  0x4a   :  { %4179 = vmatprep.subr.bf16.mxu1 %v4403_v29  ;;  %v4452_v28 = vld [vmem:[%s5914_s1 + $0x330] sm:$0xff]   ;;  %v4454_v29 = vld [vmem:[%s5914_s1 + $0x378] sm:$0xff]  }
  0x4c   :  { %4158 = vmatpush3.bf16.msra.mxu0 %v4404_v31  ;;  %v4453_v31 = vld [vmem:[%s5914_s1 + $0x3b0] sm:$0xff]  }
  0x4d   :  { %4159 = vmatprep.subr.bf16.mxu0 %v4406_v32  ;;  %4180 = vmatpush3.bf16.msra.mxu1 %v4405_v33  ;;  %v4455_v32 = vld [vmem:[%s5914_s1 + $0x3f8] sm:$0xff]  }
  0x4e   :  { %4181 = vmatprep.subr.bf16.mxu1 %v4407_v34  ;;  %v4456_v33 = vld [vmem:[%s5914_s1 + $0x338] sm:$0xff]   ;;  %v445_v34 = vrot.slane %v5111_v60, %v4888_v35  ;;  %v4481_v60 = vld [vmem:[%s5914_s1 + $0x428] sm:$0xff]  }
  0x50   :  { %4160 = vmatpush3.bf16.msra.mxu0 %v4408_v36  ;;  %v4459_v36 = vld [vmem:[%s5914_s1 + $0x440] sm:$0xff]  }
  0x51   :  { %4161 = vmatprep.subr.bf16.mxu0 %v4410_v37  ;;  %4182 = vmatpush3.bf16.msra.mxu1 %v4409_v38  ;;  %v4457_v37 = vld [vmem:[%s5914_s1 + $0x3b8] sm:$0xff]   ;;  %v4460_v38 = vld [vmem:[%s5914_s1 + $0x4c0] sm:$0xff]  }
  0x52   :  { %4183 = vmatprep.subr.bf16.mxu1 %v4411_v39  ;;  %v4461_v39 = vld [vmem:[%s5914_s1 + $0x400] sm:$0xff]  }
  0x54   :  { %4162 = vmatpush3.bf16.msra.mxu0 %v4412_v40  ;;  %v461_v40 = vcombine.high %v445_v34, %v445_v34 }
  0x55   :  { %4163 = vmatprep.subr.bf16.mxu0 %v4414_v41  ;;  %4184 = vmatpush3.bf16.msra.mxu1 %v4413_v42  ;;  %v4463_v41 = vld [vmem:[%s5914_s1 + $0x448] sm:$0xff]   ;;  %v4462_v42 = vld [vmem:[%s5914_s1 + $0x480] sm:$0xff]  }
  0x56   :  { %4185 = vmatprep.subr.bf16.mxu1 %v4415_v43  ;;  %v4464_v43 = vld [vmem:[%s5914_s1 + $0x4c8] sm:$0xff]  }
  0x58   :  { %4164 = vmatpush3.bf16.msra.mxu0 %v4416_v44  ;;  %v4465_v44 = vld [vmem:[%s5914_s1 + $0x408] sm:$0xff]  }
  0x59   :  { %4165 = vmatprep.subr.bf16.mxu0 %v4418_v45  ;;  %4186 = vmatpush3.bf16.msra.mxu1 %v4417_v46  ;;  %v4467_v45 = vld [vmem:[%s5914_s1 + $0x450] sm:$0xff]   ;;  %v4466_v46 = vld [vmem:[%s5914_s1 + $0x488] sm:$0xff]  }
  0x5a   :  { %4187 = vmatprep.subr.bf16.mxu1 %v4419_v47  ;;  %v4468_v47 = vld [vmem:[%s5914_s1 + $0x4d0] sm:$0xff]  }
  0x5c   :  { %4166 = vmatpush3.bf16.msra.mxu0 %v4420_v48  ;;  %v4469_v48 = vld [vmem:[%s5914_s1 + $0x410] sm:$0xff]  }
  0x5d   :  { %4167 = vmatprep.subr.bf16.mxu0 %v4422_v49  ;;  %4188 = vmatpush3.bf16.msra.mxu1 %v4421_v50  ;;  %v4471_v49 = vld [vmem:[%s5914_s1 + $0x458] sm:$0xff]   ;;  %v4470_v50 = vld [vmem:[%s5914_s1 + $0x490] sm:$0xff]  }
  0x5e   :  { %4189 = vmatprep.subr.bf16.mxu1 %v4423_v51  ;;  %v4472_v51 = vld [vmem:[%s5914_s1 + $0x4d8] sm:$0xff]  }
  0x60   :  { %4168 = vmatpush3.bf16.msra.mxu0 %v4424_v53  ;;  %v4475_v53 = vld [vmem:[%s5914_s1 + $0x460] sm:$0xff]  }
  0x61   :  { %4197 = vmatprep.subr.bf16.mxu0 %v4426_v56  ;;  %4190 = vmatpush3.bf16.msra.mxu1 %v4425_v57  ;;  %v4477_v56 = vld [vmem:[%s5914_s1 + $0x420] sm:$0xff]   ;;  %v4479_v57 = vld [vmem:[%s5914_s1 + $0x468] sm:$0xff]  }
  0x62   :  { %4219 = vmatprep.subr.bf16.mxu1 %v4427_v61  ;;  %v4483_v61 = vld [vmem:[%s5914_s1 + $0x470] sm:$0xff]  }
  0x63   :  { %1661 = vmatmul.mubr.bf16.vlgmr.msra.gmra.mrb[8].mxu0 %v438_v59  ;;  %v4480_v59 = vld [vmem:[%s5914_s1 + $0x4e8] sm:$0xff]  }
  0x64   :  { %4198 = vmatpush3.bf16.msra.mxu0 %v4428_v63  ;;  %1701 = vmatmul.mubr.bf16.vlgmr.msra.gmra.mrb[8].mxu1 %v460_v1  ;;  %v4484_v63 = vld [vmem:[%s5914_s1 + $0x4f0] sm:$0xff]   ;;  %v4487_v1 = vld [vmem:[%s5914_s1 + $0x478] sm:$0xff]  }
  0x65   :  { %4199 = vmatprep.subr.bf16.mxu0 %v4430_v2  ;;  %4220 = vmatpush3.bf16.msra.mxu1 %v4429_v4  ;;  %v4486_v2 = vld [vmem:[%s5914_s1 + $0x4b0] sm:$0xff]   ;;  %v4489_v4 = vld [vmem:[%s5914_s1 + $0x438] sm:$0xff]  }
  0x66   :  { %1740 = vmatprep.mubr.bf16.mxu0 %v459_v5  ;;  %4221 = vmatprep.subr.bf16.mxu1 %v4431_v6  ;;  %v3720_v5 = vld.sshfl [vmem:[%s5915_s0 + $0x10] sm:$0x33 pattern:$0x75316420] }
  0x67   :  { %1780 = vmatprep.mubr.bf16.mxu1 %v463_v8  ;;  %v471_v6 = vcombine.high %v3720_v5, %v3720_v5  ;;  %v4490_v8 = vld [vmem:[%s5914_s1 + $0x4b8] sm:$0xff]  }
  0x68   :  { %4200 = vmatpush3.bf16.msra.mxu0 %v4432_v7  ;;  %v478_v7 = vrot.slane %v3720_v5, %v4888_v35 }
  0x69   :  { %4201 = vmatprep.subr.bf16.mxu0 %v4434_v9  ;;  %4222 = vmatpush3.bf16.msra.mxu1 %v4433_v10  ;;  %v485_v9 = vrot.slane %v471_v6, %v4888_v35 }
  0x6a   :  { %4223 = vmatprep.subr.bf16.mxu1 %v4435_v11  ;;  %v486_v11 = vcombine.high %v478_v7, %v478_v7 }
  0x6b   :  { %v487_v10 = vcombine.high %v485_v9, %v485_v9 }
  0x6c   :  { %4202 = vmatpush3.bf16.msra.mxu0 %v4436_v12  ;;  %v4742_v12 = vmov 0.0  }
  0x6d   :  { %4203 = vmatprep.subr.bf16.mxu0 %v4438_v13  ;;  %4224 = vmatpush3.bf16.msra.mxu1 %v4437_v14  ;;  %v4491_v13 = vld [vmem:[%s5916_s3] sm:$0xff]   ;;  %v4492_v14 = vld [vmem:[%s5916_s3 + $0x8] sm:$0xff]  }
  0x6e   :  { %4225 = vmatprep.subr.bf16.mxu1 %v4439_v15  ;;  %v4493_v15 = vld [vmem:[%s5916_s3 + $0x10] sm:$0xff]  }
  0x70   :  { %4204 = vmatpush3.bf16.msra.mxu0 %v4440_v16  ;;  %v4494_v16 = vld [vmem:[%s5916_s3 + $0x18] sm:$0xff]  }
  0x71   :  { %4205 = vmatprep.subr.bf16.mxu0 %v4442_v17  ;;  %4226 = vmatpush3.bf16.msra.mxu1 %v4441_v18  ;;  %v4495_v17 = vld [vmem:[%s5916_s3 + $0x20] sm:$0xff]  }
  0x72   :  { %4227 = vmatprep.subr.bf16.mxu1 %v4443_v19  ;;  %v3719_v19 = vld [vmem:[%s5917_s2] ss:$0 sm:$0xff] }
  0x74   :  { %4206 = vmatpush3.bf16.msra.mxu0 %v4444_v20 }
  0x75   :  { %4207 = vmatprep.subr.bf16.mxu0 %v4446_v21  ;;  %4228 = vmatpush3.bf16.msra.mxu1 %v4445_v22  ;;  %v4496_v21 = vld [vmem:[%s5916_s3 + $0x28] sm:$0xff]  }
  0x76   :  { %4229 = vmatprep.subr.bf16.mxu1 %v4447_v23 }
  0x78   :  { %4208 = vmatpush3.bf16.msra.mxu0 %v4448_v24 }
  0x79   :  { %4209 = vmatprep.subr.bf16.mxu0 %v4450_v25  ;;  %4230 = vmatpush3.bf16.msra.mxu1 %v4449_v26 }
  0x7a   :  { %4231 = vmatprep.subr.bf16.mxu1 %v4451_v27 }
  0x7c   :  { %4210 = vmatpush3.bf16.msra.mxu0 %v4452_v28 }
  0x7d   :  { %4211 = vmatprep.subr.bf16.mxu0 %v4454_v29  ;;  %4232 = vmatpush3.bf16.msra.mxu1 %v4453_v31 }
  0x7e   :  { %4233 = vmatprep.subr.bf16.mxu1 %v4455_v32  ;;  %v4497_v32 = vld [vmem:[%s5916_s3 + $0x30] sm:$0xff]  }
  0x80   :  { %4212 = vmatpush3.bf16.msra.mxu0 %v4456_v33 }
  0x81   :  { %4241 = vmatprep.subr.bf16.mxu0 %v4459_v36  ;;  %4234 = vmatpush3.bf16.msra.mxu1 %v4457_v37  ;;  %v4499_v36 = vld [vmem:[%s5918_s5] sm:$0xff]  }
  0x82   :  { %4263 = vmatprep.subr.bf16.mxu1 %v4460_v38 }
  0x83   :  { %1741 = vmatmul.mubr.bf16.vlgmr.msra.gmra.mrb[12].mxu0 %v445_v34  ;;  %v4498_v34 = vld [vmem:[%s5916_s3 + $0x38] sm:$0xff]  }
  0x84   :  { %4242 = vmatpush3.bf16.msra.mxu0 %v4461_v39  ;;  %1781 = vmatmul.mubr.bf16.vlgmr.msra.gmra.mrb[12].mxu1 %v461_v40 }
  0x85   :  { %4243 = vmatprep.subr.bf16.mxu0 %v4463_v41  ;;  %4264 = vmatpush3.bf16.msra.mxu1 %v4462_v42 }
  0x86   :  { %4265 = vmatprep.subr.bf16.mxu1 %v4464_v43  ;;  %1820 = vmatprep.mubr.bf16.mxu0 %v485_v9 }
  0x87   :  { %1860 = vmatprep.mubr.bf16.mxu1 %v487_v10 }
  0x88   :  { %4244 = vmatpush3.bf16.msra.mxu0 %v4465_v44 }
  0x89   :  { %4245 = vmatprep.subr.bf16.mxu0 %v4467_v45  ;;  %4266 = vmatpush3.bf16.msra.mxu1 %v4466_v46 }
  0x8a   :  { %4267 = vmatprep.subr.bf16.mxu1 %v4468_v47 }
  0x8c   :  { %4246 = vmatpush3.bf16.msra.mxu0 %v4469_v48 }
  0x8d   :  { %4247 = vmatprep.subr.bf16.mxu0 %v4471_v49  ;;  %4268 = vmatpush3.bf16.msra.mxu1 %v4470_v50 }
  0x8e   :  { %4269 = vmatprep.subr.bf16.mxu1 %v4472_v51 }
  0x90   :  { %4248 = vmatpush3.bf16.msra.mxu0 %v4473_v52 }
  0x91   :  { %4249 = vmatprep.subr.bf16.mxu0 %v4475_v53  ;;  %4270 = vmatpush3.bf16.msra.mxu1 %v4474_v54 }
  0x92   :  { %4271 = vmatprep.subr.bf16.mxu1 %v4476_v55 }
  0x94   :  { %4250 = vmatpush3.bf16.msra.mxu0 %v4477_v56 }
  0x95   :  { %4251 = vmatprep.subr.bf16.mxu0 %v4479_v57  ;;  %4272 = vmatpush3.bf16.msra.mxu1 %v4478_v58 }
  0x96   :  { %4273 = vmatprep.subr.bf16.mxu1 %v4480_v59 }
  0x98   :  { %4252 = vmatpush3.bf16.msra.mxu0 %v4481_v60 }
  0x99   :  { %4253 = vmatprep.subr.bf16.mxu0 %v4483_v61  ;;  %4274 = vmatpush3.bf16.msra.mxu1 %v4482_v62 }
  0x9a   :  { %4275 = vmatprep.subr.bf16.mxu1 %v4484_v63 }
  0x9c   :  { %4254 = vmatpush3.bf16.msra.mxu0 %v4485_v0 }
  0x9d   :  { %4255 = vmatprep.subr.bf16.mxu0 %v4487_v1  ;;  %4276 = vmatpush3.bf16.msra.mxu1 %v4486_v2 }
  0x9e   :  { %4277 = vmatprep.subr.bf16.mxu1 %v4488_v3 }
  0xa0   :  { %4256 = vmatpush3.bf16.msra.mxu0 %v4489_v4 }
  0xa1   :  { %4278 = vmatpush3.bf16.msra.mxu1 %v4490_v8  ;;  %4297 = vmatprep.subr.bf16.mxu0 %v4742_v12 }
  0xa2   :  { %4317 = vmatprep.subr.bf16.mxu1 %v4742_v12 }
  0xa3   :  { %1821 = vmatmul.mubr.bf16.vlgmr.msra.gmra.mrb[16].mxu0 %v478_v7 }
  0xa4   :  { %1861 = vmatmul.mubr.bf16.vlgmr.msra.gmra.mrb[16].mxu1 %v486_v11  ;;  %4298 = vmatpush3.bf16.msra.mxu0 %v4491_v13 }
  0xa5   :  { %4299 = vmatprep.subr.bf16.mxu0 %v4742_v12  ;;  %4313 = vmatprep.mubr.msk.bf16.mxu0 %vm4743_vm0, %v4742_v12 }
  0xa6   :  { %4321 = vmatprep.mubr.msk.bf16.mxu1 %vm4743_vm0, %v4742_v12  ;;  %4318 = vmatpush3.bf16.msra.mxu1 %v4499_v36  ;;  %v4530_v36 = vld [vmem:[%s5919_s7 + $0x28c] ss:$80 sps:$4 sm:$0xff]  }
  0xa7   :  { %4319 = vmatprep.subr.bf16.mxu1 %v4742_v12 }
  0xa8   :  { %4300 = vmatpush3.bf16.msra.mxu0 %v4492_v14 }
  0xa9   :  { %4301 = vmatprep.subr.bf16.mxu0 %v4742_v12 }
  0xac   :  { %4302 = vmatpush3.bf16.msra.mxu0 %v4493_v15 }
  0xad   :  { %4303 = vmatprep.subr.bf16.mxu0 %v4742_v12 }
  0xb0   :  { %4304 = vmatpush3.bf16.msra.mxu0 %v4494_v16 }
  0xb1   :  { %4305 = vmatprep.subr.bf16.mxu0 %v4742_v12 }
  0xb4   :  { %4306 = vmatpush3.bf16.msra.mxu0 %v4495_v17 }
  0xb5   :  { %4307 = vmatprep.subr.bf16.mxu0 %v4742_v12 }
  0xb8   :  { %4308 = vmatpush3.bf16.msra.mxu0 %v4496_v21 }
  0xb9   :  { %4309 = vmatprep.subr.bf16.mxu0 %v4742_v12 }
  0xbc   :  { %4310 = vmatpush3.bf16.msra.mxu0 %v4497_v32  ;;  %v4516_v32 = vld [vmem:[%s5919_s7 + $0x148] ss:$80 sps:$4 sm:$0xff]  }
  0xbd   :  { %4311 = vmatprep.subr.bf16.mxu0 %v4742_v12 }
  0xc0   :  { %4312 = vmatpush3.bf16.msra.mxu0 %v4498_v34  ;;  %v4522_v34 = vld [vmem:[%s5919_s7 + $0x1e8] ss:$80 sps:$4 sm:$0xff]  }
  0xf6   :  { %v4081_v18 = vpop.f32.mrb[0].mxu0 }
  0xf7   :  { %v4082_v20 = vpop.f32.mrb[1].mxu0  ;;  %v4103_v22 = vpop.f32.mrb[0].mxu1 }
  0xf8   :  { %v4083_v23 = vadd.f32 %v4082_v20, %v4081_v18  ;;  %v4084_v24 = vpop.f32.mrb[2].mxu0  ;;  %v4104_v25 = vpop.f32.mrb[1].mxu1 }
  0xf9   :  { %v4085_v26 = vpop.f32.mrb[3].mxu0  ;;  %v4105_v28 = vadd.f32 %v4104_v25, %v4103_v22  ;;  %v4106_v29 = vpop.f32.mrb[2].mxu1  ;;  %v4503_v25 = vld [vmem:[%s5919_s7 + $0x4] ss:$80 sps:$4 sm:$0xff]  }
  0xfa   :  { %v1503_v27 = vadd.f32 %v4083_v23, %v3719_v19  ;;  %v4107_v31 = vpop.f32.mrb[3].mxu1  ;;  %v4500_v23 = vld [vmem:[%s5918_s5 + $0x8] ss:$0 sps:$4 sm:$0x11]   ;;  %v4512_v29 = vld [vmem:[%s5919_s7 + $0xac] ss:$80 sps:$4 sm:$0xff]  }
  0xfb   :  { %v2007_v24 = vsel %vm2005_vm1, %v4500_v23, 0  ;;  %v4504_v26 = vld [vmem:[%s5919_s7 + $0x8] ss:$80 sps:$4 sm:$0xff]   ;;  %v4518_v31 = vld [vmem:[%s5919_s7 + $0x14c] ss:$80 sps:$4 sm:$0xff]  }
  0xfc   :  { %v1543_v33 = vadd.f32 %v4105_v28, %v1503_v27  ;;  %4320 = vmatpush3.bf16.msra.mxu1 %v2007_v24  ;;  %v4506_v27 = vld [vmem:[%s5919_s7 + $0xc] ss:$80 sps:$4 sm:$0xff]   ;;  %v4510_v28 = vld [vmem:[%s5919_s7 + $0xa8] ss:$80 sps:$4 sm:$0xff]   ;;  %v4569_v23 = vld [vmem:[%s5919_s7 + $0x1f4] ss:$80 sps:$4 sm:$0xff]  }
  0xfd   :  { %3117 = vmatprep.subr.bf16.mxu1 %v4503_v25  ;;  %3158 = vmatprep.subr.bf16.mxu0 %v4506_v27  ;;  %v4572_v24 = vld [vmem:[%s5919_s7 + $0x1fc] ss:$80 sps:$4 sm:$0xff]   ;;  %v4567_v25 = vld [vmem:[%s5919_s7 + $0x1f0] ss:$80 sps:$4 sm:$0xff]   ;;  %v4575_v27 = vld [vmem:[%s5919_s7 + $0x294] ss:$80 sps:$4 sm:$0xff]  }
 0x116   :  { %v4125_v37 = vpop.f32.mrb[4].mxu0 }
 0x117   :  { %v4126_v38 = vpop.f32.mrb[5].mxu0  ;;  %v4147_v39 = vpop.f32.mrb[4].mxu1 }
 0x118   :  { %v4127_v40 = vadd.f32 %v4126_v38, %v4125_v37  ;;  %v4128_v41 = vpop.f32.mrb[6].mxu0  ;;  %v4148_v42 = vpop.f32.mrb[5].mxu1  ;;  %v4528_v37 = vld [vmem:[%s5919_s7 + $0x288] ss:$80 sps:$4 sm:$0xff]   ;;  %v4536_v38 = vld [vmem:[%s5919_s7 + $0x32c] ss:$80 sps:$4 sm:$0xff]  }
 0x119   :  { %v4129_v43 = vpop.f32.mrb[7].mxu0  ;;  %v4149_v45 = vadd.f32 %v4148_v42, %v4147_v39  ;;  %v4150_v46 = vpop.f32.mrb[6].mxu1  ;;  %v4534_v39 = vld [vmem:[%s5919_s7 + $0x328] ss:$80 sps:$4 sm:$0xff]   ;;  %v3881_v42 = vld [vmem:[%s5920_s4] ss:$0 sm:$0xff] }
 0x11a   :  { %v1583_v44 = vadd.f32 %v4127_v40, %v1543_v33  ;;  %v4151_v47 = vpop.f32.mrb[7].mxu1  ;;  %v4524_v33 = vld [vmem:[%s5919_s7 + $0x1ec] ss:$80 sps:$4 sm:$0xff]   ;;  %v4540_v41 = vld [vmem:[%s5919_s7 + $0x3c8] ss:$80 sps:$4 sm:$0xff]  }
 0x11b   :  { %v4542_v40 = vld [vmem:[%s5919_s7 + $0x3cc] ss:$80 sps:$4 sm:$0xff]   ;;  %v4501_v47 = vld [vmem:[%s5919_s7] ss:$80 sps:$4 sm:$0xff]  }
 0x11c   :  { %v1623_v48 = vadd.f32 %v4149_v45, %v1583_v44 }
 0x136   :  { %v4169_v49 = vpop.f32.mrb[8].mxu0 }
 0x137   :  { %v4170_v50 = vpop.f32.mrb[9].mxu0  ;;  %v4191_v51 = vpop.f32.mrb[8].mxu1 }
 0x138   :  { %v4171_v52 = vadd.f32 %v4170_v50, %v4169_v49  ;;  %v4172_v53 = vpop.f32.mrb[10].mxu0  ;;  %v4192_v54 = vpop.f32.mrb[9].mxu1  ;;  %v4509_v50 = vld [vmem:[%s5919_s7 + $0xa4] ss:$80 sps:$4 sm:$0xff]  }
 0x139   :  { %v4173_v55 = vpop.f32.mrb[11].mxu0  ;;  %v4193_v57 = vadd.f32 %v4192_v54, %v4191_v51  ;;  %v4194_v58 = vpop.f32.mrb[10].mxu1  ;;  %v4507_v51 = vld [vmem:[%s5919_s7 + $0xa0] ss:$80 sps:$4 sm:$0xff]   ;;  %v4521_v54 = vld [vmem:[%s5919_s7 + $0x1e4] ss:$80 sps:$4 sm:$0xff]  }
 0x13a   :  { %v1663_v56 = vadd.f32 %v4171_v52, %v1623_v48  ;;  %v4195_v59 = vpop.f32.mrb[11].mxu1  ;;  %v4515_v52 = vld [vmem:[%s5919_s7 + $0x144] ss:$80 sps:$4 sm:$0xff]   ;;  %v4513_v53 = vld [vmem:[%s5919_s7 + $0x140] ss:$80 sps:$4 sm:$0xff]  }
 0x13b   :  { %v4519_v55 = vld [vmem:[%s5919_s7 + $0x1e0] ss:$80 sps:$4 sm:$0xff]   ;;  %v4533_v58 = vld [vmem:[%s5919_s7 + $0x324] ss:$80 sps:$4 sm:$0xff]  }
 0x13c   :  { %v1703_v60 = vadd.f32 %v4193_v57, %v1663_v56  ;;  %v4527_v56 = vld [vmem:[%s5919_s7 + $0x284] ss:$80 sps:$4 sm:$0xff]   ;;  %v4525_v57 = vld [vmem:[%s5919_s7 + $0x280] ss:$80 sps:$4 sm:$0xff]  }
 0x13d   :  { %v4531_v59 = vld [vmem:[%s5919_s7 + $0x320] ss:$80 sps:$4 sm:$0xff]  }
 0x156   :  { %v4213_v61 = vpop.f32.mrb[12].mxu0 }
 0x157   :  { %v4214_v62 = vpop.f32.mrb[13].mxu0  ;;  %v4235_v63 = vpop.f32.mrb[12].mxu1 }
 0x158   :  { %v4215_v0 = vadd.f32 %v4214_v62, %v4213_v61  ;;  %v4216_v1 = vpop.f32.mrb[14].mxu0  ;;  %v4236_v2 = vpop.f32.mrb[13].mxu1  ;;  %v4537_v61 = vld [vmem:[%s5919_s7 + $0x3c0] ss:$80 sps:$4 sm:$0xff]   ;;  %v4545_v62 = vld [vmem:[%s5919_s7 + $0x464] ss:$80 sps:$4 sm:$0xff]  }
 0x159   :  { %v4217_v3 = vpop.f32.mrb[15].mxu0  ;;  %v4237_v5 = vadd.f32 %v4236_v2, %v4235_v63  ;;  %v4238_v6 = vpop.f32.mrb[14].mxu1  ;;  %v4548_v63 = vld [vmem:[%s5919_s7 + $0x46c] ss:$80 sps:$4 sm:$0xff]   ;;  %v4546_v1 = vld [vmem:[%s5919_s7 + $0x468] ss:$80 sps:$4 sm:$0xff]  }
 0x15a   :  { %v1743_v4 = vadd.f32 %v4215_v0, %v1703_v60  ;;  %v4239_v7 = vpop.f32.mrb[15].mxu1  ;;  %v4539_v60 = vld [vmem:[%s5919_s7 + $0x3c4] ss:$80 sps:$4 sm:$0xff]   ;;  %v4543_v0 = vld [vmem:[%s5919_s7 + $0x460] ss:$80 sps:$4 sm:$0xff]   ;;  %v4744_v3 = vmov 0  }
 0x15b   :  { %v4551_v2 = vld [vmem:[%s5919_s7 + $0x14] ss:$80 sps:$4 sm:$0xff]  }
 0x15c   :  { %v1783_v8 = vadd.f32 %v4237_v5, %v1743_v4  ;;  %v4554_v4 = vld [vmem:[%s5919_s7 + $0x1c] ss:$80 sps:$4 sm:$0xff]   ;;  %v3890_v5 = vld [vmem:[%s5921_s6] ss:$0 sm:$0xff] }
 0x176   :  { %v4257_v9 = vpop.f32.mrb[16].mxu0 }
 0x177   :  { %v4258_v10 = vpop.f32.mrb[17].mxu0  ;;  %v4279_v11 = vpop.f32.mrb[16].mxu1 }
 0x178   :  { %v4259_v12 = vadd.f32 %v4258_v10, %v4257_v9  ;;  %v4260_v13 = vpop.f32.mrb[18].mxu0  ;;  %v4280_v14 = vpop.f32.mrb[17].mxu1 }
 0x179   :  { %v4261_v15 = vpop.f32.mrb[19].mxu0  ;;  %v4281_v17 = vadd.f32 %v4280_v14, %v4279_v11  ;;  %v4282_v18 = vpop.f32.mrb[18].mxu1  ;;  %v4552_v13 = vld [vmem:[%s5919_s7 + $0x18] ss:$80 sps:$4 sm:$0xff]  }
 0x17a   :  { %v1823_v16 = vadd.f32 %v4259_v12, %v1783_v8  ;;  %v4283_v19 = vpop.f32.mrb[19].mxu1  ;;  %v4549_v12 = vld [vmem:[%s5919_s7 + $0x10] ss:$80 sps:$4 sm:$0xff]   ;;  %v4557_v15 = vld [vmem:[%s5919_s7 + $0xb4] ss:$80 sps:$4 sm:$0xff]  }
 0x17b   :  { %v4558_v18 = vld [vmem:[%s5919_s7 + $0xb8] ss:$80 sps:$4 sm:$0xff]   ;;  %v4563_v19 = vld [vmem:[%s5919_s7 + $0x154] ss:$80 sps:$4 sm:$0xff]  }
 0x17c   :  { %v1863_v20 = vadd.f32 %v4281_v17, %v1823_v16  ;;  %v4560_v16 = vld [vmem:[%s5919_s7 + $0xbc] ss:$80 sps:$4 sm:$0xff]   ;;  %v4555_v17 = vld [vmem:[%s5919_s7 + $0xb0] ss:$80 sps:$4 sm:$0xff]  }
 0x17e   :  { %v1868_v21 = vmax.f32 %v1863_v20, 0.0  ;;  %v4566_v20 = vld [vmem:[%s5919_s7 + $0x15c] ss:$80 sps:$4 sm:$0xff]  }
 0x180   :  { %v1869_v22 = vpack.c.bf16 %v1868_v21, %v1868_v21  ;;  %v4561_v21 = vld [vmem:[%s5919_s7 + $0x150] ss:$80 sps:$4 sm:$0xff]  }
 0x182   :  { %4314 = vmatmul.mubr.bf16.vlgmr.msra.gmra.mrb[20].mxu0 %v1869_v22  ;;  %v4564_v22 = vld [vmem:[%s5919_s7 + $0x158] ss:$80 sps:$4 sm:$0xff]  }
 0x183   :  { %3159 = vmatpush1.bf16.msra.mxu0 %v4504_v26  ;;  %3190 = vmatprep.mubr.bf16.mxu0 %v4744_v3  ;;  %v4570_v26 = vld [vmem:[%s5919_s7 + $0x1f8] ss:$80 sps:$4 sm:$0xff]  }
 0x184   :  { %3160 = vmatprep.subr.bf16.mxu0 %v4512_v29  ;;  %v4573_v29 = vld [vmem:[%s5919_s7 + $0x290] ss:$80 sps:$4 sm:$0xff]  }
 0x187   :  { %3161 = vmatpush1.bf16.msra.mxu0 %v4510_v28  ;;  %v4578_v28 = vld [vmem:[%s5919_s7 + $0x29c] ss:$80 sps:$4 sm:$0xff]  }
 0x188   :  { %3162 = vmatprep.subr.bf16.mxu0 %v4518_v31  ;;  %v4576_v31 = vld [vmem:[%s5919_s7 + $0x298] ss:$80 sps:$4 sm:$0xff]  }
 0x18b   :  { %3163 = vmatpush1.bf16.msra.mxu0 %v4516_v32  ;;  %v4581_v32 = vld [vmem:[%s5919_s7 + $0x334] ss:$80 sps:$4 sm:$0xff]  }
 0x18c   :  { %3164 = vmatprep.subr.bf16.mxu0 %v4524_v33  ;;  %v4584_v33 = vld [vmem:[%s5919_s7 + $0x33c] ss:$80 sps:$4 sm:$0xff]  }
 0x18f   :  { %3165 = vmatpush1.bf16.msra.mxu0 %v4522_v34  ;;  %v4579_v34 = vld [vmem:[%s5919_s7 + $0x330] ss:$80 sps:$4 sm:$0xff]  }
 0x190   :  { %3166 = vmatprep.subr.bf16.mxu0 %v4530_v36  ;;  %v4582_v36 = vld [vmem:[%s5919_s7 + $0x338] ss:$80 sps:$4 sm:$0xff]  }
 0x193   :  { %3167 = vmatpush1.bf16.msra.mxu0 %v4528_v37  ;;  %v4587_v37 = vld [vmem:[%s5919_s7 + $0x3d4] ss:$80 sps:$4 sm:$0xff]  }
 0x194   :  { %3168 = vmatprep.subr.bf16.mxu0 %v4536_v38  ;;  %v4590_v38 = vld [vmem:[%s5919_s7 + $0x3dc] ss:$80 sps:$4 sm:$0xff]  }
 0x197   :  { %3169 = vmatpush1.bf16.msra.mxu0 %v4534_v39  ;;  %v4585_v39 = vld [vmem:[%s5919_s7 + $0x3d0] ss:$80 sps:$4 sm:$0xff]  }
 0x198   :  { %3170 = vmatprep.subr.bf16.mxu0 %v4542_v40  ;;  %v4588_v40 = vld [vmem:[%s5919_s7 + $0x3d8] ss:$80 sps:$4 sm:$0xff]  }
 0x19b   :  { %3171 = vmatpush1.bf16.msra.mxu0 %v4540_v41  ;;  %v4593_v41 = vld [vmem:[%s5919_s7 + $0x474] ss:$80 sps:$4 sm:$0xff]  }
 0x19c   :  { %3172 = vmatprep.subr.bf16.mxu0 %v4548_v63  ;;  %v4621_v63 = vld [vmem:[%s5919_s7 + $0x2a0] ss:$80 sps:$4 sm:$0xff]  }
 0x19f   :  { %3173 = vmatpush1.bf16.msra.mxu0 %v4546_v1  ;;  %v4629_v1 = vld [vmem:[%s5919_s7 + $0x344] ss:$80 sps:$4 sm:$0xff]  }
 0x1a0   :  { %3240 = vmatprep.subr.bf16.mxu0 %v4554_v4  ;;  %v4627_v4 = vld [vmem:[%s5919_s7 + $0x340] ss:$80 sps:$4 sm:$0xff]  }
 0x255   :  { %v1975_v43 = vpop.f32.mrb[20].mxu0 }
 0x256   :  { %v1976_v44 = vadd.f32 %v3881_v42, %v1975_v43  ;;  %v4315_v45 = vpop.f32.mrb[21].mxu0  ;;  %v4596_v42 = vld [vmem:[%s5919_s7 + $0x47c] ss:$80 sps:$4 sm:$0xff]   ;;  %v4591_v43 = vld [vmem:[%s5919_s7 + $0x470] ss:$80 sps:$4 sm:$0xff]  }
 0x257   :  { %v1978_v46 = vpop.f32.mrb[22].mxu0  ;;  %v4599_v45 = vld [vmem:[%s5919_s7 + $0x24] ss:$80 sps:$4 sm:$0xff]  }
 0x258   :  { %v1981_v48 = vpack.c.bf16 %v1976_v44, %v1976_v44  ;;  %v4316_v49 = vpop.f32.mrb[23].mxu0  ;;  %v4594_v44 = vld [vmem:[%s5919_s7 + $0x478] ss:$80 sps:$4 sm:$0xff]   ;;  %v4602_v46 = vld [vmem:[%s5919_s7 + $0x2c] ss:$80 sps:$4 sm:$0xff]  }
 0x259   :  { %v4605_v49 = vld [vmem:[%s5919_s7 + $0xc4] ss:$80 sps:$4 sm:$0xff]  }
 0x25a   :  { %4322 = vmatmul.mubr.msk.bf16.vlgmr.msra.gmra.mrb[20].mxu1 %vm2001_vm2, %v1981_v48  ;;  %v4600_v48 = vld [vmem:[%s5919_s7 + $0x28] ss:$80 sps:$4 sm:$0xff]  }
 0x25b   :  { %3118 = vmatpush1.bf16.msra.mxu1 %v4501_v47  ;;  %3149 = vmatprep.mubr.bf16.mxu1 %v4744_v3  ;;  %v4597_v47 = vld [vmem:[%s5919_s7 + $0x20] ss:$80 sps:$4 sm:$0xff]  }
 0x25c   :  { %3119 = vmatprep.subr.bf16.mxu1 %v4509_v50  ;;  %v4608_v50 = vld [vmem:[%s5919_s7 + $0xcc] ss:$80 sps:$4 sm:$0xff]  }
 0x25f   :  { %3120 = vmatpush1.bf16.msra.mxu1 %v4507_v51  ;;  %v4603_v51 = vld [vmem:[%s5919_s7 + $0xc0] ss:$80 sps:$4 sm:$0xff]  }
 0x260   :  { %3121 = vmatprep.subr.bf16.mxu1 %v4515_v52  ;;  %v4606_v52 = vld [vmem:[%s5919_s7 + $0xc8] ss:$80 sps:$4 sm:$0xff]  }
 0x263   :  { %3122 = vmatpush1.bf16.msra.mxu1 %v4513_v53  ;;  %v4611_v53 = vld [vmem:[%s5919_s7 + $0x164] ss:$80 sps:$4 sm:$0xff]  }
 0x264   :  { %3123 = vmatprep.subr.bf16.mxu1 %v4521_v54  ;;  %v4614_v54 = vld [vmem:[%s5919_s7 + $0x16c] ss:$80 sps:$4 sm:$0xff]  }
 0x267   :  { %3124 = vmatpush1.bf16.msra.mxu1 %v4519_v55  ;;  %v4609_v55 = vld [vmem:[%s5919_s7 + $0x160] ss:$80 sps:$4 sm:$0xff]  }
 0x268   :  { %3125 = vmatprep.subr.bf16.mxu1 %v4527_v56  ;;  %v4612_v56 = vld [vmem:[%s5919_s7 + $0x168] ss:$80 sps:$4 sm:$0xff]  }
 0x26b   :  { %3126 = vmatpush1.bf16.msra.mxu1 %v4525_v57  ;;  %v4617_v57 = vld [vmem:[%s5919_s7 + $0x204] ss:$80 sps:$4 sm:$0xff]  }
 0x26c   :  { %3127 = vmatprep.subr.bf16.mxu1 %v4533_v58  ;;  %v4620_v58 = vld [vmem:[%s5919_s7 + $0x20c] ss:$80 sps:$4 sm:$0xff]  }
 0x26f   :  { %3128 = vmatpush1.bf16.msra.mxu1 %v4531_v59  ;;  %v4615_v59 = vld [vmem:[%s5919_s7 + $0x200] ss:$80 sps:$4 sm:$0xff]  }
 0x270   :  { %3129 = vmatprep.subr.bf16.mxu1 %v4539_v60  ;;  %v4618_v60 = vld [vmem:[%s5919_s7 + $0x208] ss:$80 sps:$4 sm:$0xff]  }
 0x273   :  { %3130 = vmatpush1.bf16.msra.mxu1 %v4537_v61  ;;  %v4623_v61 = vld [vmem:[%s5919_s7 + $0x2a4] ss:$80 sps:$4 sm:$0xff]  }
 0x274   :  { %3131 = vmatprep.subr.bf16.mxu1 %v4545_v62  ;;  %v4626_v62 = vld [vmem:[%s5919_s7 + $0x2ac] ss:$80 sps:$4 sm:$0xff]  }
 0x277   :  { %3132 = vmatpush1.bf16.msra.mxu1 %v4543_v0  ;;  %v4624_v0 = vld [vmem:[%s5919_s7 + $0x2a8] ss:$80 sps:$4 sm:$0xff]  }
 0x278   :  { %3199 = vmatprep.subr.bf16.mxu1 %v4551_v2  ;;  %v4632_v2 = vld [vmem:[%s5919_s7 + $0x34c] ss:$80 sps:$4 sm:$0xff]  }
 0x32d   :  { %v2043_v6 = vpop.f32.mrb[20].mxu1 }
 0x32e   :  { %v2044_v7 = vadd.f32 %v3890_v5, %v2043_v6  ;;  %v4323_v8 = vpop.f32.mrb[21].mxu1  ;;  %v4630_v5 = vld [vmem:[%s5919_s7 + $0x348] ss:$80 sps:$4 sm:$0xff]   ;;  %v4635_v6 = vld [vmem:[%s5919_s7 + $0x3e4] ss:$80 sps:$4 sm:$0xff]  }
 0x32f   :  { %v2046_v9 = vpop.f32.mrb[22].mxu1  ;;  %v4633_v8 = vld [vmem:[%s5919_s7 + $0x3e0] ss:$80 sps:$4 sm:$0xff]  }
 0x330   :  { %v2049_v10 = vmax.f32 %v2044_v7, 0.0  ;;  %v4324_v11 = vpop.f32.mrb[23].mxu1  ;;  %v4638_v7 = vld [vmem:[%s5919_s7 + $0x3ec] ss:$80 sps:$4 sm:$0xff]   ;;  %v4636_v9 = vld [vmem:[%s5919_s7 + $0x3e8] ss:$80 sps:$4 sm:$0xff]  }
 0x331   :  { %v4644_v11 = vld [vmem:[%s5919_s7 + $0x48c] ss:$80 sps:$4 sm:$0xff]  }
 0x332   :  { %v5462_v14 = vpack.c.bf16 %v2049_v10, %v2049_v10  ;;  %v4641_v10 = vld [vmem:[%s5919_s7 + $0x484] ss:$80 sps:$4 sm:$0xff]  }
 0x334   :  { %3150 = vmatmul.mubr.bf16.vlgmr.msra.gmra.mrb[24].mxu1 %v5462_v14  ;;  %3191 = vmatmul.mubr.bf16.vlgmr.msra.gmra.mrb[24].mxu0 %v5462_v14 }
 0x335   :  { %3200 = vmatpush1.bf16.msra.mxu1 %v4549_v12  ;;  %3241 = vmatpush1.bf16.msra.mxu0 %v4552_v13  ;;  %v4639_v12 = vld [vmem:[%s5919_s7 + $0x480] ss:$80 sps:$4 sm:$0xff]   ;;  %v4642_v13 = vld [vmem:[%s5919_s7 + $0x488] ss:$80 sps:$4 sm:$0xff]  }
 0x336   :  { %3201 = vmatprep.subr.bf16.mxu1 %v4557_v15  ;;  %3242 = vmatprep.subr.bf16.mxu0 %v4560_v16  ;;  %v4647_v15 = vld [vmem:[%s5919_s7 + $0x34] ss:$80 sps:$4 sm:$0xff]   ;;  %v4650_v16 = vld [vmem:[%s5919_s7 + $0x3c] ss:$80 sps:$4 sm:$0xff]  }
 0x337   :  { %3231 = vmatprep.mubr.bf16.mxu1 %v4744_v3  ;;  %3272 = vmatprep.mubr.bf16.mxu0 %v4744_v3 }
 0x339   :  { %3202 = vmatpush1.bf16.msra.mxu1 %v4555_v17  ;;  %3243 = vmatpush1.bf16.msra.mxu0 %v4558_v18  ;;  %v4645_v17 = vld [vmem:[%s5919_s7 + $0x30] ss:$80 sps:$4 sm:$0xff]   ;;  %v4648_v18 = vld [vmem:[%s5919_s7 + $0x38] ss:$80 sps:$4 sm:$0xff]  }
 0x33a   :  { %3203 = vmatprep.subr.bf16.mxu1 %v4563_v19  ;;  %3244 = vmatprep.subr.bf16.mxu0 %v4566_v20  ;;  %v4653_v19 = vld [vmem:[%s5919_s7 + $0xd4] ss:$80 sps:$4 sm:$0xff]   ;;  %v4656_v20 = vld [vmem:[%s5919_s7 + $0xdc] ss:$80 sps:$4 sm:$0xff]  }
 0x33d   :  { %3204 = vmatpush1.bf16.msra.mxu1 %v4561_v21  ;;  %3245 = vmatpush1.bf16.msra.mxu0 %v4564_v22  ;;  %v4651_v21 = vld [vmem:[%s5919_s7 + $0xd0] ss:$80 sps:$4 sm:$0xff]   ;;  %v4654_v22 = vld [vmem:[%s5919_s7 + $0xd8] ss:$80 sps:$4 sm:$0xff]  }
 0x33e   :  { %3205 = vmatprep.subr.bf16.mxu1 %v4569_v23  ;;  %3246 = vmatprep.subr.bf16.mxu0 %v4572_v24  ;;  %v4659_v23 = vld [vmem:[%s5919_s7 + $0x174] ss:$80 sps:$4 sm:$0xff]   ;;  %v4662_v24 = vld [vmem:[%s5919_s7 + $0x17c] ss:$80 sps:$4 sm:$0xff]  }
 0x341   :  { %3206 = vmatpush1.bf16.msra.mxu1 %v4567_v25  ;;  %3247 = vmatpush1.bf16.msra.mxu0 %v4570_v26  ;;  %v4657_v25 = vld [vmem:[%s5919_s7 + $0x170] ss:$80 sps:$4 sm:$0xff]   ;;  %v4660_v26 = vld [vmem:[%s5919_s7 + $0x178] ss:$80 sps:$4 sm:$0xff]  }
 0x342   :  { %3207 = vmatprep.subr.bf16.mxu1 %v4575_v27  ;;  %3248 = vmatprep.subr.bf16.mxu0 %v4578_v28  ;;  %v4665_v27 = vld [vmem:[%s5919_s7 + $0x214] ss:$80 sps:$4 sm:$0xff]   ;;  %v4668_v28 = vld [vmem:[%s5919_s7 + $0x21c] ss:$80 sps:$4 sm:$0xff]  }
 0x345   :  { %3208 = vmatpush1.bf16.msra.mxu1 %v4573_v29  ;;  %3249 = vmatpush1.bf16.msra.mxu0 %v4576_v31  ;;  %v4663_v29 = vld [vmem:[%s5919_s7 + $0x210] ss:$80 sps:$4 sm:$0xff]   ;;  %v4666_v31 = vld [vmem:[%s5919_s7 + $0x218] ss:$80 sps:$4 sm:$0xff]  }
 0x346   :  { %3209 = vmatprep.subr.bf16.mxu1 %v4581_v32  ;;  %3250 = vmatprep.subr.bf16.mxu0 %v4584_v33  ;;  %v4671_v32 = vld [vmem:[%s5919_s7 + $0x2b4] ss:$80 sps:$4 sm:$0xff]   ;;  %v4674_v33 = vld [vmem:[%s5919_s7 + $0x2bc] ss:$80 sps:$4 sm:$0xff]  }
 0x349   :  { %3210 = vmatpush1.bf16.msra.mxu1 %v4579_v34  ;;  %3251 = vmatpush1.bf16.msra.mxu0 %v4582_v36  ;;  %v4669_v34 = vld [vmem:[%s5919_s7 + $0x2b0] ss:$80 sps:$4 sm:$0xff]   ;;  %v4672_v36 = vld [vmem:[%s5919_s7 + $0x2b8] ss:$80 sps:$4 sm:$0xff]  }
 0x34a   :  { %3211 = vmatprep.subr.bf16.mxu1 %v4587_v37  ;;  %3252 = vmatprep.subr.bf16.mxu0 %v4590_v38  ;;  %v4677_v37 = vld [vmem:[%s5919_s7 + $0x354] ss:$80 sps:$4 sm:$0xff]   ;;  %v4680_v38 = vld [vmem:[%s5919_s7 + $0x35c] ss:$80 sps:$4 sm:$0xff]  }
 0x34d   :  { %3212 = vmatpush1.bf16.msra.mxu1 %v4585_v39  ;;  %3253 = vmatpush1.bf16.msra.mxu0 %v4588_v40  ;;  %v4675_v39 = vld [vmem:[%s5919_s7 + $0x350] ss:$80 sps:$4 sm:$0xff]   ;;  %v4678_v40 = vld [vmem:[%s5919_s7 + $0x358] ss:$80 sps:$4 sm:$0xff]  }
 0x34e   :  { %3213 = vmatprep.subr.bf16.mxu1 %v4593_v41  ;;  %3254 = vmatprep.subr.bf16.mxu0 %v4596_v42  ;;  %v4683_v41 = vld [vmem:[%s5919_s7 + $0x3f4] ss:$80 sps:$4 sm:$0xff]   ;;  %v4686_v42 = vld [vmem:[%s5919_s7 + $0x3fc] ss:$80 sps:$4 sm:$0xff]  }
 0x351   :  { %3214 = vmatpush1.bf16.msra.mxu1 %v4591_v43  ;;  %3255 = vmatpush1.bf16.msra.mxu0 %v4594_v44  ;;  %v4681_v43 = vld [vmem:[%s5919_s7 + $0x3f0] ss:$80 sps:$4 sm:$0xff]   ;;  %v4684_v44 = vld [vmem:[%s5919_s7 + $0x3f8] ss:$80 sps:$4 sm:$0xff]  }
 0x352   :  { %3281 = vmatprep.subr.bf16.mxu1 %v4599_v45  ;;  %3322 = vmatprep.subr.bf16.mxu0 %v4602_v46  ;;  %v4689_v45 = vld [vmem:[%s5919_s7 + $0x494] ss:$80 sps:$4 sm:$0xff]   ;;  %v4692_v46 = vld [vmem:[%s5919_s7 + $0x49c] ss:$80 sps:$4 sm:$0xff]  }
 0x354   :  { %3232 = vmatmul.mubr.bf16.vlgmr.msra.gmra.mrb[28].mxu1 %v5462_v14  ;;  %3273 = vmatmul.mubr.bf16.vlgmr.msra.gmra.mrb[28].mxu0 %v5462_v14 }
 0x355   :  { %3282 = vmatpush1.bf16.msra.mxu1 %v4597_v47  ;;  %3323 = vmatpush1.bf16.msra.mxu0 %v4600_v48  ;;  %v4687_v47 = vld [vmem:[%s5919_s7 + $0x490] ss:$80 sps:$4 sm:$0xff]   ;;  %v4690_v48 = vld [vmem:[%s5919_s7 + $0x498] ss:$80 sps:$4 sm:$0xff]  }
 0x356   :  { %3283 = vmatprep.subr.bf16.mxu1 %v4605_v49  ;;  %3324 = vmatprep.subr.bf16.mxu0 %v4608_v50  ;;  %v4695_v49 = vld [vmem:[%s5919_s7 + $0x44] ss:$80 sps:$4 sm:$0xff]   ;;  %v4698_v50 = vld [vmem:[%s5919_s7 + $0x4c] ss:$80 sps:$4 sm:$0xff]  }
 0x357   :  { %3313 = vmatprep.mubr.bf16.mxu1 %v4744_v3  ;;  %3354 = vmatprep.mubr.bf16.mxu0 %v4744_v3 }
 0x359   :  { %3284 = vmatpush1.bf16.msra.mxu1 %v4603_v51  ;;  %3325 = vmatpush1.bf16.msra.mxu0 %v4606_v52  ;;  %v4693_v51 = vld [vmem:[%s5919_s7 + $0x40] ss:$80 sps:$4 sm:$0xff]   ;;  %v4696_v52 = vld [vmem:[%s5919_s7 + $0x48] ss:$80 sps:$4 sm:$0xff]  }
 0x35a   :  { %3285 = vmatprep.subr.bf16.mxu1 %v4611_v53  ;;  %3326 = vmatprep.subr.bf16.mxu0 %v4614_v54  ;;  %v4701_v53 = vld [vmem:[%s5919_s7 + $0xe4] ss:$80 sps:$4 sm:$0xff]   ;;  %v4704_v54 = vld [vmem:[%s5919_s7 + $0xec] ss:$80 sps:$4 sm:$0xff]  }
 0x35d   :  { %3286 = vmatpush1.bf16.msra.mxu1 %v4609_v55  ;;  %3327 = vmatpush1.bf16.msra.mxu0 %v4612_v56  ;;  %v4699_v55 = vld [vmem:[%s5919_s7 + $0xe0] ss:$80 sps:$4 sm:$0xff]   ;;  %v4702_v56 = vld [vmem:[%s5919_s7 + $0xe8] ss:$80 sps:$4 sm:$0xff]  }
 0x35e   :  { %3287 = vmatprep.subr.bf16.mxu1 %v4617_v57  ;;  %3328 = vmatprep.subr.bf16.mxu0 %v4620_v58  ;;  %v4707_v57 = vld [vmem:[%s5919_s7 + $0x184] ss:$80 sps:$4 sm:$0xff]   ;;  %v4710_v58 = vld [vmem:[%s5919_s7 + $0x18c] ss:$80 sps:$4 sm:$0xff]  }
 0x361   :  { %3288 = vmatpush1.bf16.msra.mxu1 %v4615_v59  ;;  %3329 = vmatpush1.bf16.msra.mxu0 %v4618_v60  ;;  %v4705_v59 = vld [vmem:[%s5919_s7 + $0x180] ss:$80 sps:$4 sm:$0xff]   ;;  %v4708_v60 = vld [vmem:[%s5919_s7 + $0x188] ss:$80 sps:$4 sm:$0xff]  }
 0x362   :  { %3289 = vmatprep.subr.bf16.mxu1 %v4623_v61  ;;  %3330 = vmatprep.subr.bf16.mxu0 %v4626_v62  ;;  %v4713_v61 = vld [vmem:[%s5919_s7 + $0x224] ss:$80 sps:$4 sm:$0xff]   ;;  %v4711_v62 = vld [vmem:[%s5919_s7 + $0x220] ss:$80 sps:$4 sm:$0xff]  }
 0x365   :  { %3290 = vmatpush1.bf16.msra.mxu1 %v4621_v63  ;;  %3331 = vmatpush1.bf16.msra.mxu0 %v4624_v0  ;;  %v4714_v63 = vld [vmem:[%s5919_s7 + $0x228] ss:$80 sps:$4 sm:$0xff]   ;;  %v4719_v0 = vld [vmem:[%s5919_s7 + $0x2c4] ss:$80 sps:$4 sm:$0xff]  }
 0x366   :  { %3291 = vmatprep.subr.bf16.mxu1 %v4629_v1  ;;  %3332 = vmatprep.subr.bf16.mxu0 %v4632_v2  ;;  %v4722_v1 = vld [vmem:[%s5919_s7 + $0x2cc] ss:$80 sps:$4 sm:$0xff]   ;;  %v4717_v2 = vld [vmem:[%s5919_s7 + $0x2c0] ss:$80 sps:$4 sm:$0xff]  }
 0x369   :  { %3292 = vmatpush1.bf16.msra.mxu1 %v4627_v4  ;;  %3333 = vmatpush1.bf16.msra.mxu0 %v4630_v5  ;;  %v4720_v4 = vld [vmem:[%s5919_s7 + $0x2c8] ss:$80 sps:$4 sm:$0xff]   ;;  %v4725_v5 = vld [vmem:[%s5919_s7 + $0x364] ss:$80 sps:$4 sm:$0xff]  }
 0x36a   :  { %3293 = vmatprep.subr.bf16.mxu1 %v4635_v6  ;;  %3334 = vmatprep.subr.bf16.mxu0 %v4638_v7  ;;  %v4728_v6 = vld [vmem:[%s5919_s7 + $0x36c] ss:$80 sps:$4 sm:$0xff]   ;;  %v4723_v7 = vld [vmem:[%s5919_s7 + $0x360] ss:$80 sps:$4 sm:$0xff]  }
 0x36d   :  { %3294 = vmatpush1.bf16.msra.mxu1 %v4633_v8  ;;  %3335 = vmatpush1.bf16.msra.mxu0 %v4636_v9  ;;  %v4726_v8 = vld [vmem:[%s5919_s7 + $0x368] ss:$80 sps:$4 sm:$0xff]   ;;  %v4731_v9 = vld [vmem:[%s5919_s7 + $0x404] ss:$80 sps:$4 sm:$0xff]  }
 0x36e   :  { %3295 = vmatprep.subr.bf16.mxu1 %v4641_v10  ;;  %3336 = vmatprep.subr.bf16.mxu0 %v4644_v11  ;;  %v4734_v10 = vld [vmem:[%s5919_s7 + $0x40c] ss:$80 sps:$4 sm:$0xff]   ;;  %v4729_v11 = vld [vmem:[%s5919_s7 + $0x400] ss:$80 sps:$4 sm:$0xff]  }
 0x371   :  { %3296 = vmatpush1.bf16.msra.mxu1 %v4639_v12  ;;  %3337 = vmatpush1.bf16.msra.mxu0 %v4642_v13  ;;  %v4732_v12 = vld [vmem:[%s5919_s7 + $0x408] ss:$80 sps:$4 sm:$0xff]   ;;  %v4737_v13 = vld [vmem:[%s5919_s7 + $0x4a4] ss:$80 sps:$4 sm:$0xff]  }
 0x372   :  { %3363 = vmatprep.subr.bf16.mxu1 %v4647_v15  ;;  %3404 = vmatprep.subr.bf16.mxu0 %v4650_v16  ;;  %v4740_v15 = vld [vmem:[%s5919_s7 + $0x4ac] ss:$80 sps:$4 sm:$0xff]   ;;  %v4735_v16 = vld [vmem:[%s5919_s7 + $0x4a0] ss:$80 sps:$4 sm:$0xff]  }
 0x374   :  { %3314 = vmatmul.mubr.bf16.vlgmr.msra.gmra.mrb[32].mxu1 %v5462_v14  ;;  %3355 = vmatmul.mubr.bf16.vlgmr.msra.gmra.mrb[32].mxu0 %v5462_v14 }
 0x375   :  { %3364 = vmatpush1.bf16.msra.mxu1 %v4645_v17  ;;  %3405 = vmatpush1.bf16.msra.mxu0 %v4648_v18  ;;  %v4738_v17 = vld [vmem:[%s5919_s7 + $0x4a8] ss:$80 sps:$4 sm:$0xff]   ;;  %v5855_v18 = vsub.s32 0, %v4873_v30 }
 0x376   :  { %3365 = vmatprep.subr.bf16.mxu1 %v4653_v19  ;;  %3406 = vmatprep.subr.bf16.mxu0 %v4656_v20  ;;  %v5858_v19 = vsub.s32 2, %v4873_v30  ;;  %v2211_v20 = vld [vmem:[%s5922_s8] sm:$0xff] }
 0x377   :  { %3395 = vmatprep.mubr.bf16.mxu1 %v4744_v3  ;;  %3436 = vmatprep.mubr.bf16.mxu0 %v4744_v3 }
 0x379   :  { %3366 = vmatpush1.bf16.msra.mxu1 %v4651_v21  ;;  %3407 = vmatpush1.bf16.msra.mxu0 %v4654_v22  ;;  %v5864_v21 = vsub.s32 1, %v4873_v30  ;;  %v5867_v22 = vsub.s32 3, %v4873_v30 }
 0x37a   :  { %3367 = vmatprep.subr.bf16.mxu1 %v4659_v23  ;;  %3408 = vmatprep.subr.bf16.mxu0 %v4662_v24  ;;  %v2220_v23 = vrot.slane %v2211_v20, %v5855_v18 }
 0x37b   :  { %v2224_v24 = vrot.slane %v2211_v20, %v5864_v21 }
 0x37d   :  { %3368 = vmatpush1.bf16.msra.mxu1 %v4657_v25  ;;  %3409 = vmatpush1.bf16.msra.mxu0 %v4660_v26  ;;  %v2232_v25 = vrot.slane %v2211_v20, %v5867_v22 }
 0x37e   :  { %3369 = vmatprep.subr.bf16.mxu1 %v4665_v27  ;;  %3410 = vmatprep.subr.bf16.mxu0 %v4668_v28 }
 0x381   :  { %3370 = vmatpush1.bf16.msra.mxu1 %v4663_v29  ;;  %3411 = vmatpush1.bf16.msra.mxu0 %v4666_v31 }
 0x382   :  { %3371 = vmatprep.subr.bf16.mxu1 %v4671_v32  ;;  %3412 = vmatprep.subr.bf16.mxu0 %v4674_v33 }
 0x385   :  { %3372 = vmatpush1.bf16.msra.mxu1 %v4669_v34  ;;  %3413 = vmatpush1.bf16.msra.mxu0 %v4672_v36 }
 0x386   :  { %3373 = vmatprep.subr.bf16.mxu1 %v4677_v37  ;;  %3414 = vmatprep.subr.bf16.mxu0 %v4680_v38 }
 0x389   :  { %3374 = vmatpush1.bf16.msra.mxu1 %v4675_v39  ;;  %3415 = vmatpush1.bf16.msra.mxu0 %v4678_v40 }
 0x38a   :  { %3375 = vmatprep.subr.bf16.mxu1 %v4683_v41  ;;  %3416 = vmatprep.subr.bf16.mxu0 %v4686_v42 }
 0x38d   :  { %3376 = vmatpush1.bf16.msra.mxu1 %v4681_v43  ;;  %3417 = vmatpush1.bf16.msra.mxu0 %v4684_v44 }
 0x38e   :  { %3377 = vmatprep.subr.bf16.mxu1 %v4689_v45  ;;  %3418 = vmatprep.subr.bf16.mxu0 %v4692_v46 }
 0x391   :  { %3378 = vmatpush1.bf16.msra.mxu1 %v4687_v47  ;;  %3419 = vmatpush1.bf16.msra.mxu0 %v4690_v48 }
 0x392   :  { %3445 = vmatprep.subr.bf16.mxu1 %v4695_v49  ;;  %3486 = vmatprep.subr.bf16.mxu0 %v4698_v50  ;;  %v2235_v49 = vsub.s32 4, %v4873_v30  ;;  %v2243_v50 = vsub.s32 6, %v4873_v30 }
 0x394   :  { %3396 = vmatmul.mubr.bf16.vlgmr.msra.gmra.mrb[36].mxu1 %v5462_v14  ;;  %3437 = vmatmul.mubr.bf16.vlgmr.msra.gmra.mrb[36].mxu0 %v5462_v14 }
 0x395   :  { %3446 = vmatpush1.bf16.msra.mxu1 %v4693_v51  ;;  %3487 = vmatpush1.bf16.msra.mxu0 %v4696_v52  ;;  %v2239_v51 = vsub.s32 5, %v4873_v30  ;;  %v2247_v52 = vsub.s32 7, %v4873_v30 }
 0x396   :  { %3447 = vmatprep.subr.bf16.mxu1 %v4701_v53  ;;  %3488 = vmatprep.subr.bf16.mxu0 %v4704_v54  ;;  %v2236_v53 = vrot.slane %v2211_v20, %v2235_v49  ;;  %v2244_v54 = vrot.slane %v2211_v20, %v2243_v50 }
 0x397   :  { %3477 = vmatprep.mubr.bf16.mxu1 %v4744_v3  ;;  %3518 = vmatprep.mubr.bf16.mxu0 %v4744_v3  ;;  %v4716_v3 = vld [vmem:[%s5919_s7 + $0x22c] ss:$80 sps:$4 sm:$0xff]  }
 0x399   :  { %3448 = vmatpush1.bf16.msra.mxu1 %v4699_v55  ;;  %3489 = vmatpush1.bf16.msra.mxu0 %v4702_v56  ;;  %v2240_v55 = vrot.slane %v2211_v20, %v2239_v51  ;;  %v2248_v56 = vrot.slane %v2211_v20, %v2247_v52 }
 0x39a   :  { %3449 = vmatprep.subr.bf16.mxu1 %v4707_v57  ;;  %3490 = vmatprep.subr.bf16.mxu0 %v4710_v58 }
 0x39d   :  { %3450 = vmatpush1.bf16.msra.mxu1 %v4705_v59  ;;  %3491 = vmatpush1.bf16.msra.mxu0 %v4708_v60 }
 0x39e   :  { %3451 = vmatprep.subr.bf16.mxu1 %v4713_v61  ;;  %3492 = vmatprep.subr.bf16.mxu0 %v4716_v3 }
 0x3a1   :  { %3452 = vmatpush1.bf16.msra.mxu1 %v4711_v62  ;;  %3493 = vmatpush1.bf16.msra.mxu0 %v4714_v63 }
 0x3a2   :  { %3453 = vmatprep.subr.bf16.mxu1 %v4719_v0  ;;  %3494 = vmatprep.subr.bf16.mxu0 %v4722_v1 }
 0x3a5   :  { %3454 = vmatpush1.bf16.msra.mxu1 %v4717_v2  ;;  %3495 = vmatpush1.bf16.msra.mxu0 %v4720_v4 }
 0x3a6   :  { %3455 = vmatprep.subr.bf16.mxu1 %v4725_v5  ;;  %3496 = vmatprep.subr.bf16.mxu0 %v4728_v6 }
 0x3a9   :  { %3456 = vmatpush1.bf16.msra.mxu1 %v4723_v7  ;;  %3497 = vmatpush1.bf16.msra.mxu0 %v4726_v8 }
 0x3aa   :  { %3457 = vmatprep.subr.bf16.mxu1 %v4731_v9  ;;  %3498 = vmatprep.subr.bf16.mxu0 %v4734_v10 }
 0x3ad   :  { %3458 = vmatpush1.bf16.msra.mxu1 %v4729_v11  ;;  %3499 = vmatpush1.bf16.msra.mxu0 %v4732_v12 }
 0x3ae   :  { %3459 = vmatprep.subr.bf16.mxu1 %v4737_v13  ;;  %3500 = vmatprep.subr.bf16.mxu0 %v4740_v15 }
 0x3b1   :  { %3460 = vmatpush1.bf16.msra.mxu1 %v4735_v16  ;;  %3501 = vmatpush1.bf16.msra.mxu0 %v4738_v17  ;;  %v2212_v17 = vld [vmem:[%s5922_s8 + $0x8] sm:$0xff] }
 0x3b4   :  { %3478 = vmatmul.mubr.bf16.vlgmr.msra.gmra.mrb[40].mxu1 %v5462_v14  ;;  %3519 = vmatmul.mubr.bf16.vlgmr.msra.gmra.mrb[40].mxu0 %v5462_v14  ;;  %v2228_v14 = vrot.slane %v2211_v20, %v5858_v19  ;;  %v2252_v20 = vrot.slane %v2212_v17, %v5855_v18 }
 0x407   :  { %v3151_v26 = vpop.f32.mrb[24].mxu1  ;;  %v3192_v27 = vpop.f32.mrb[24].mxu0 }
 0x408   :  { %v3152_v28 = vadd.f32 %v3151_v26, %v2220_v23  ;;  %v3193_v29 = vadd.f32 %v3192_v27, %v2228_v14  ;;  %v3153_v31 = vpop.f32.mrb[25].mxu1  ;;  %v3194_v32 = vpop.f32.mrb[25].mxu0  ;;  %v2260_v23 = vrot.slane %v2212_v17, %v5858_v19  ;;  %v2256_v14 = vrot.slane %v2212_v17, %v5864_v21 }
 0x409   :  { %v3154_v33 = vadd.f32 %v3153_v31, %v2224_v24  ;;  %v3195_v34 = vadd.f32 %v3194_v32, %v2232_v25  ;;  %v3155_v36 = vpop.f32.mrb[26].mxu1  ;;  %v3196_v37 = vpop.f32.mrb[26].mxu0  ;;  %v2264_v24 = vrot.slane %v2212_v17, %v5867_v22 }
 0x40a   :  { %v3527_v38 = vmax.f32 %v3152_v28, 0.0  ;;  %v3529_v39 = vmax.f32 %v3193_v29, 0.0  ;;  %v3156_v40 = vpop.f32.mrb[27].mxu1  ;;  %v3197_v41 = vpop.f32.mrb[27].mxu0 }
 0x40b   :  { %v3528_v42 = vmax.f32 %v3154_v33, 0.0  ;;  %v3530_v43 = vmax.f32 %v3195_v34, 0.0 }
 0x40d   :  { %v4054_v44 = vpack.c.bf16 %v3528_v42, %v3527_v38  ;;  %v4055_v45 = vpack.c.bf16 %v3530_v43, %v3529_v39 }
 0x40f   :  { %v3597_v46 = vrot.slane %v4054_v44, %v4888_v35  ;;  %v3604_v47 = vrot.slane %v4055_v45, %v4888_v35 }
 0x411   :  { %v3619_v48 = vcombine.low %v3597_v46, %v3604_v47 }
 0x413   :  { %v3627_v13 = vrot.slane %v3619_v48, %v4888_v35  ;;  %v2268_v48 = vrot.slane %v2212_v17, %v2235_v49 }
 0x427   :  { %v3233_v57 = vpop.f32.mrb[28].mxu1  ;;  %v3274_v58 = vpop.f32.mrb[28].mxu0 }
 0x428   :  { %v3234_v59 = vadd.f32 %v3233_v57, %v2236_v53  ;;  %v3275_v60 = vadd.f32 %v3274_v58, %v2244_v54  ;;  %v3235_v61 = vpop.f32.mrb[29].mxu1  ;;  %v3276_v3 = vpop.f32.mrb[29].mxu0  ;;  %v2276_v53 = vrot.slane %v2212_v17, %v2243_v50  ;;  %v2272_v54 = vrot.slane %v2212_v17, %v2239_v51 }
 0x429   :  { %v3236_v62 = vadd.f32 %v3235_v61, %v2240_v55  ;;  %v3277_v63 = vadd.f32 %v3276_v3, %v2248_v56  ;;  %v3237_v0 = vpop.f32.mrb[30].mxu1  ;;  %v3278_v1 = vpop.f32.mrb[30].mxu0  ;;  %v2280_v55 = vrot.slane %v2212_v17, %v2247_v52 }
 0x42a   :  { %v3531_v2 = vmax.f32 %v3234_v59, 0.0  ;;  %v3533_v4 = vmax.f32 %v3275_v60, 0.0  ;;  %v3238_v5 = vpop.f32.mrb[31].mxu1  ;;  %v3279_v6 = vpop.f32.mrb[31].mxu0 }
 0x42b   :  { %v3532_v7 = vmax.f32 %v3236_v62, 0.0  ;;  %v3534_v30 = vmax.f32 %v3277_v63, 0.0 }
 0x42d   :  { %v4056_v8 = vpack.c.bf16 %v3532_v7, %v3531_v2  ;;  %v4057_v9 = vpack.c.bf16 %v3534_v30, %v3533_v4 }
 0x42f   :  { %v3611_v10 = vrot.slane %v4056_v8, %v4888_v35  ;;  %v3618_v11 = vrot.slane %v4057_v9, %v4888_v35 }
 0x431   :  { %v3620_v12 = vcombine.low %v3611_v10, %v3618_v11  ;;  %v2213_v11 = vld [vmem:[%s5922_s8 + $0x10] sm:$0xf] }
 0x433   :  { %v3634_v15 = vrot.slane %v3620_v12, %v4888_v35  ;;  %v2284_v12 = vrot.slane %v2213_v11, %v5855_v18 }
 0x435   :  { %v3635_v16 = vcombine.low %v3627_v13, %v3634_v15  ;;  %v2292_v13 = vrot.slane %v2213_v11, %v5858_v19  ;;  %v2288_v15 = vrot.slane %v2213_v11, %v5864_v21 }
 0x437   :  { %3712 = vst [vmem:[%s5923_s9] sm:$0xff] %v3635_v16  ;;  %v2296_v16 = vrot.slane %v2213_v11, %v5867_v22 }
 0x447   :  { %v3315_v25 = vpop.f32.mrb[32].mxu1  ;;  %v3356_v26 = vpop.f32.mrb[32].mxu0 }
 0x448   :  { %v3316_v27 = vadd.f32 %v3315_v25, %v2252_v20  ;;  %v3357_v28 = vadd.f32 %v3356_v26, %v2260_v23  ;;  %v3317_v29 = vpop.f32.mrb[33].mxu1  ;;  %v3358_v31 = vpop.f32.mrb[33].mxu0 }
 0x449   :  { %v3318_v32 = vadd.f32 %v3317_v29, %v2256_v14  ;;  %v3359_v33 = vadd.f32 %v3358_v31, %v2264_v24  ;;  %v3319_v34 = vpop.f32.mrb[34].mxu1  ;;  %v3360_v36 = vpop.f32.mrb[34].mxu0 }
 0x44a   :  { %v3535_v37 = vmax.f32 %v3316_v27, 0.0  ;;  %v3537_v38 = vmax.f32 %v3357_v28, 0.0  ;;  %v3320_v39 = vpop.f32.mrb[35].mxu1  ;;  %v3361_v40 = vpop.f32.mrb[35].mxu0 }
 0x44b   :  { %v3536_v41 = vmax.f32 %v3318_v32, 0.0  ;;  %v3538_v42 = vmax.f32 %v3359_v33, 0.0 }
 0x44d   :  { %v4058_v43 = vpack.c.bf16 %v3536_v41, %v3535_v37  ;;  %v4059_v44 = vpack.c.bf16 %v3538_v42, %v3537_v38 }
 0x44f   :  { %v3646_v45 = vrot.slane %v4058_v43, %v4888_v35  ;;  %v3653_v46 = vrot.slane %v4059_v44, %v4888_v35 }
 0x451   :  { %v3668_v47 = vcombine.low %v3646_v45, %v3653_v46 }
 0x453   :  { %v3676_v8 = vrot.slane %v3668_v47, %v4888_v35 }
 0x467   :  { %v3397_v56 = vpop.f32.mrb[36].mxu1  ;;  %v3438_v57 = vpop.f32.mrb[36].mxu0 }
 0x468   :  { %v3398_v58 = vadd.f32 %v3397_v56, %v2268_v48  ;;  %v3439_v59 = vadd.f32 %v3438_v57, %v2276_v53  ;;  %v3399_v60 = vpop.f32.mrb[37].mxu1  ;;  %v3440_v61 = vpop.f32.mrb[37].mxu0 }
 0x469   :  { %v3400_v3 = vadd.f32 %v3399_v60, %v2272_v54  ;;  %v3441_v62 = vadd.f32 %v3440_v61, %v2280_v55  ;;  %v3401_v63 = vpop.f32.mrb[38].mxu1  ;;  %v3442_v0 = vpop.f32.mrb[38].mxu0 }
 0x46a   :  { %v3539_v1 = vmax.f32 %v3398_v58, 0.0  ;;  %v3541_v2 = vmax.f32 %v3439_v59, 0.0  ;;  %v3402_v4 = vpop.f32.mrb[39].mxu1  ;;  %v3443_v5 = vpop.f32.mrb[39].mxu0 }
 0x46b   :  { %v3540_v6 = vmax.f32 %v3400_v3, 0.0  ;;  %v3542_v7 = vmax.f32 %v3441_v62, 0.0 }
 0x46d   :  { %v4060_v49 = vpack.c.bf16 %v3540_v6, %v3539_v1  ;;  %v4061_v50 = vpack.c.bf16 %v3542_v7, %v3541_v2 }
 0x46f   :  { %v3660_v51 = vrot.slane %v4060_v49, %v4888_v35  ;;  %v3667_v52 = vrot.slane %v4061_v50, %v4888_v35 }
 0x471   :  { %v3669_v30 = vcombine.low %v3660_v51, %v3667_v52 }
 0x473   :  { %v3683_v9 = vrot.slane %v3669_v30, %v4888_v35 }
 0x475   :  { %v3684_v10 = vcombine.low %v3676_v8, %v3683_v9 }
 0x477   :  { %3713 = vst [vmem:[%s5923_s9 + $0x8] sm:$0xff] %v3684_v10 }
 0x487   :  { %v3479_v17 = vpop.f32.mrb[40].mxu1  ;;  %v3520_v20 = vpop.f32.mrb[40].mxu0 }
 0x488   :  { %v3480_v23 = vadd.f32 %v3479_v17, %v2284_v12  ;;  %v3521_v14 = vadd.f32 %v3520_v20, %v2292_v13  ;;  %v3481_v24 = vpop.f32.mrb[41].mxu1  ;;  %v3522_v25 = vpop.f32.mrb[41].mxu0 }
 0x489   :  { %v3482_v26 = vadd.f32 %v3481_v24, %v2288_v15  ;;  %v3523_v27 = vadd.f32 %v3522_v25, %v2296_v16  ;;  %v3483_v28 = vpop.f32.mrb[42].mxu1  ;;  %v3524_v29 = vpop.f32.mrb[42].mxu0 }
 0x48a   :  { %v3543_v31 = vmax.f32 %v3480_v23, 0.0  ;;  %v3545_v32 = vmax.f32 %v3521_v14, 0.0  ;;  %v3484_v33 = vpop.f32.mrb[43].mxu1  ;;  %v3525_v18 = vpop.f32.mrb[43].mxu0 }
 0x48b   :  { %v3544_v34 = vmax.f32 %v3482_v26, 0.0  ;;  %v3546_v19 = vmax.f32 %v3523_v27, 0.0 }
 0x48d   :  { %v4062_v36 = vpack.c.bf16 %v3544_v34, %v3543_v31  ;;  %v4063_v21 = vpack.c.bf16 %v3546_v19, %v3545_v32 }
 0x48f   :  { %v3693_v22 = vrot.slane %v4062_v36, %v4888_v35  ;;  %v3700_v37 = vrot.slane %v4063_v21, %v4888_v35 }
 0x491   :  { %v3701_v38 = vcombine.low %v3693_v22, %v3700_v37 }
 0x493   :  { %4064 = vst.sshfl [vmem:[%s5923_s9 + $0x10] sm:$0x55 pattern:$0x73625140] %v3701_v38 }

// kernel: autoencoder_forward.11
= control target key start
LH: loop header
LB: loop body
LE: loop exit
PB: predicated region body
PF: predicated region fallthrough
CT: control target
= control target key end

     0   :  { %v720_v1 = vmov 0   ;;  %vm512_vm0 = vcmask 650240   ;;  %s961_s1 = inlined_call_operand.vmem [shape: bf16[256,80], index: 1, kind: input, shape index: {}]   ;;  %s962_s0 = inlined_call_operand.vmem [shape: bf16[128,256], index: 0, kind: input, shape index: {}]   ;;  %s963_s2 = inlined_call_operand.vmem [shape: f32[128,1], index: 2, kind: input, shape index: {}]   ;;  %s964_s3 = inlined_call_operand.vmem [shape: bf16[128,80], index: 3, kind: output, shape index: {}]  }
   0x1   :  { %v680_v0 = vld [vmem:[%s961_s1 + $0x40] sm:$0xff]   ;;  %679 = vset.pattern.permute.xlu1 %v720_v1  ;;  %678 = vset.pattern.permute.xlu0 %v720_v1  ;;  %v682_v3 = vld [vmem:[%s961_s1 + $0x48] sm:$0xff]   ;;  %v684_v5 = vld [vmem:[%s961_s1 + $0x50] sm:$0xff]  }
   0x2   :  { %v681_v2 = vld [vmem:[%s961_s1] sm:$0xff]   ;;  %597 = vmatprep.subr.bf16.mxu0 %v680_v0  ;;  %661 = vmatprep.subr.bf16.mxu1 %v680_v0  ;;  %v683_v4 = vld [vmem:[%s961_s1 + $0x8] sm:$0xff]   ;;  %v685_v6 = vld [vmem:[%s961_s1 + $0x10] sm:$0xff]  }
   0x3   :  { %598 = vmatpush3.bf16.msra.mxu0 %v681_v2  ;;  %669 = vmatpush3.bf16.msra.mxu1 %v681_v2  ;;  %v686_v7 = vld [vmem:[%s961_s1 + $0x58] sm:$0xff]   ;;  %v688_v9 = vld [vmem:[%s961_s1 + $0x60] sm:$0xff]   ;;  %v690_v11 = vld [vmem:[%s961_s1 + $0x68] sm:$0xff]  }
   0x4   :  { %599 = vmatprep.subr.bf16.mxu0 %v682_v3  ;;  %662 = vmatprep.subr.bf16.mxu1 %v682_v3  ;;  %v687_v8 = vld [vmem:[%s961_s1 + $0x18] sm:$0xff]   ;;  %v689_v10 = vld [vmem:[%s961_s1 + $0x20] sm:$0xff]   ;;  %v691_v14 = vld [vmem:[%s961_s1 + $0x28] sm:$0xff]  }
   0x5   :  { %v698_v12 = vld [vmem:[%s962_s0 + $0x4] ss:$8 sps:$4 sm:$0xff]   ;;  %v692_v15 = vld [vmem:[%s961_s1 + $0x70] sm:$0xff]   ;;  %v694_v17 = vld [vmem:[%s961_s1 + $0x78] sm:$0xff]  }
   0x6   :  { %v701_v13 = vld [vmem:[%s962_s0 + $0x44] ss:$8 sps:$4 sm:$0xff]   ;;  %367 = vmatprep.mubr.bf16.mxu0 %v698_v12  ;;  %v693_v16 = vld [vmem:[%s961_s1 + $0x30] sm:$0xff]   ;;  %v695_v19 = vld [vmem:[%s961_s1 + $0x38] sm:$0xff]  }
   0x7   :  { %600 = vmatpush3.bf16.msra.mxu0 %v683_v4  ;;  %670 = vmatpush3.bf16.msra.mxu1 %v683_v4  ;;  %v65_v18 = vld [vmem:[%s963_s2 + $0x10] sm:$0xff]  ;;  %v63_v20 = vld [vmem:[%s963_s2] sm:$0xff]  ;;  %v66_v23 = vld [vmem:[%s963_s2 + $0x18] sm:$0xff] }
   0x8   :  { %601 = vmatprep.subr.bf16.mxu0 %v684_v5  ;;  %663 = vmatprep.subr.bf16.mxu1 %v684_v5  ;;  %v696_v21 = vld [vmem:[%s962_s0] ss:$8 sps:$4 sm:$0xff]   ;;  %v702_v25 = vld [vmem:[%s962_s0 + $0x14] ss:$8 sps:$4 sm:$0xff]   ;;  %v706_v29 = vld [vmem:[%s962_s0 + $0x10] ss:$8 sps:$4 sm:$0xff]  }
   0x9   :  { %399 = vmatprep.mubr.bf16.mxu1 %v701_v13  ;;  %91 = vperm.xlu1 %679, %v65_v18   ;;  %v699_v22 = vld [vmem:[%s962_s0 + $0x40] ss:$8 sps:$4 sm:$0xff]   ;;  %v704_v26 = vld [vmem:[%s962_s0 + $0x54] ss:$8 sps:$4 sm:$0xff]   ;;  %v707_v30 = vld [vmem:[%s962_s0 + $0x50] ss:$8 sps:$4 sm:$0xff]  }
   0xa   :  { %81 = vperm.xlu0 %678, %v63_v20   ;;  %v64_v24 = vld [vmem:[%s963_s2 + $0x8] sm:$0xff]  ;;  %v67_v28 = vld [vmem:[%s963_s2 + $0x20] sm:$0xff]  ;;  %v70_v31 = vld [vmem:[%s963_s2 + $0x38] sm:$0xff] }
   0xb   :  { %602 = vmatpush3.bf16.msra.mxu0 %v685_v6  ;;  %671 = vmatpush3.bf16.msra.mxu1 %v685_v6  ;;  %v68_v27 = vld [vmem:[%s963_s2 + $0x28] sm:$0xff]  ;;  %v69_v32 = vld [vmem:[%s963_s2 + $0x30] sm:$0xff]  ;;  %v71_v36 = vld [vmem:[%s963_s2 + $0x40] sm:$0xff] }
   0xc   :  { %603 = vmatprep.subr.bf16.mxu0 %v686_v7  ;;  %664 = vmatprep.subr.bf16.mxu1 %v686_v7  ;;  %v708_v33 = vld [vmem:[%s962_s0 + $0x24] ss:$8 sps:$4 sm:$0xff]   ;;  %v712_v37 = vld [vmem:[%s962_s0 + $0x20] ss:$8 sps:$4 sm:$0xff]   ;;  %v74_v39 = vld [vmem:[%s963_s2 + $0x58] sm:$0xff] }
   0xd   :  { %96 = vperm.xlu1 %679, %v66_v23   ;;  %v710_v34 = vld [vmem:[%s962_s0 + $0x64] ss:$8 sps:$4 sm:$0xff]   ;;  %v713_v38 = vld [vmem:[%s962_s0 + $0x60] ss:$8 sps:$4 sm:$0xff]   ;;  %v73_v40 = vld [vmem:[%s963_s2 + $0x50] sm:$0xff] }
   0xe   :  { %86 = vperm.xlu0 %678, %v64_v24   ;;  %v72_v35 = vld [vmem:[%s963_s2 + $0x48] sm:$0xff]  ;;  %v714_v41 = vld [vmem:[%s962_s0 + $0x34] ss:$8 sps:$4 sm:$0xff]   ;;  %v75_v44 = vld [vmem:[%s963_s2 + $0x60] sm:$0xff] }
   0xf   :  { %604 = vmatpush3.bf16.msra.mxu0 %v687_v8  ;;  %672 = vmatpush3.bf16.msra.mxu1 %v687_v8  ;;  %v716_v42 = vld [vmem:[%s962_s0 + $0x74] ss:$8 sps:$4 sm:$0xff]   ;;  %v76_v43 = vld [vmem:[%s963_s2 + $0x68] sm:$0xff]  ;;  %v718_v45 = vld [vmem:[%s962_s0 + $0x30] ss:$8 sps:$4 sm:$0xff]  }
  0x10   :  { %605 = vmatprep.subr.bf16.mxu0 %v688_v9  ;;  %665 = vmatprep.subr.bf16.mxu1 %v688_v9  ;;  %v719_v46 = vld [vmem:[%s962_s0 + $0x70] ss:$8 sps:$4 sm:$0xff]  }
  0x11   :  { %106 = vperm.xlu1 %679, %v68_v27   ;;  %v78_v47 = vld [vmem:[%s963_s2 + $0x78] sm:$0xff]  ;;  %v77_v48 = vld [vmem:[%s963_s2 + $0x70] sm:$0xff] }
  0x12   :  { %101 = vperm.xlu0 %678, %v67_v28  }
  0x13   :  { %606 = vmatpush3.bf16.msra.mxu0 %v689_v10  ;;  %673 = vmatpush3.bf16.msra.mxu1 %v689_v10 }
  0x14   :  { %607 = vmatprep.subr.bf16.mxu0 %v690_v11  ;;  %666 = vmatprep.subr.bf16.mxu1 %v690_v11 }
  0x15   :  { %116 = vperm.xlu1 %679, %v70_v31  }
  0x16   :  { %111 = vperm.xlu0 %678, %v69_v32  }
  0x17   :  { %608 = vmatpush3.bf16.msra.mxu0 %v691_v14  ;;  %674 = vmatpush3.bf16.msra.mxu1 %v691_v14 }
  0x18   :  { %609 = vmatprep.subr.bf16.mxu0 %v692_v15  ;;  %667 = vmatprep.subr.bf16.mxu1 %v692_v15 }
  0x19   :  { %126 = vperm.xlu1 %679, %v72_v35  }
  0x1a   :  { %121 = vperm.xlu0 %678, %v71_v36  }
  0x1b   :  { %610 = vmatpush3.bf16.msra.mxu0 %v693_v16  ;;  %675 = vmatpush3.bf16.msra.mxu1 %v693_v16 }
  0x1c   :  { %611 = vmatprep.subr.bf16.mxu0 %v694_v17  ;;  %668 = vmatprep.subr.bf16.mxu1 %v694_v17 }
  0x1d   :  { %136 = vperm.xlu1 %679, %v74_v39  }
  0x1e   :  { %131 = vperm.xlu0 %678, %v73_v40  }
  0x1f   :  { %612 = vmatpush3.bf16.msra.mxu0 %v695_v19  ;;  %676 = vmatpush3.bf16.msra.mxu1 %v695_v19 }
  0x21   :  { %146 = vperm.xlu1 %679, %v76_v43  }
  0x22   :  { %368 = vmatmul.mubr.bf16.vlgmr.msra.gmra.mrb[0].mxu0 %v696_v21  ;;  %400 = vmatmul.mubr.bf16.vlgmr.msra.gmra.mrb[0].mxu1 %v699_v22 }
  0x23   :  { %375 = vmatprep.mubr.bf16.mxu0 %v702_v25  ;;  %407 = vmatprep.mubr.bf16.mxu1 %v704_v26 }
  0x24   :  { %141 = vperm.xlu0 %678, %v75_v44  }
  0x25   :  { %156 = vperm.xlu1 %679, %v78_v47  }
  0x28   :  { %151 = vperm.xlu0 %678, %v77_v48  }
  0x2a   :  { %376 = vmatmul.mubr.bf16.gmra.mrb[4].mxu0 %v706_v29  ;;  %408 = vmatmul.mubr.bf16.gmra.mrb[4].mxu1 %v707_v30 }
  0x2b   :  { %383 = vmatprep.mubr.bf16.mxu0 %v708_v33  ;;  %415 = vmatprep.mubr.bf16.mxu1 %v710_v34 }
  0x32   :  { %384 = vmatmul.mubr.bf16.gmra.mrb[8].mxu0 %v712_v37  ;;  %416 = vmatmul.mubr.bf16.gmra.mrb[8].mxu1 %v713_v38 }
  0x33   :  { %391 = vmatprep.mubr.bf16.mxu0 %v714_v41  ;;  %423 = vmatprep.mubr.bf16.mxu1 %v716_v42 }
  0x3a   :  { %392 = vmatmul.mubr.bf16.gmra.mrb[12].mxu0 %v718_v45  ;;  %424 = vmatmul.mubr.bf16.gmra.mrb[12].mxu1 %v719_v46 }
  0x88   :  { %v92_v50 = vpop.permute.xlu1 %91 }
  0x89   :  { %v82_v49 = vpop.permute.xlu0 %81 }
  0x8c   :  { %v97_v52 = vpop.permute.xlu1 %96 }
  0x8d   :  { %v87_v51 = vpop.permute.xlu0 %86 }
  0x90   :  { %v887_v54 = vpop.permute.xlu1 %106 }
  0x91   :  { %v885_v53 = vpop.permute.xlu0 %101 }
  0x94   :  { %v891_v56 = vpop.permute.xlu1 %116 }
  0x95   :  { %v889_v55 = vpop.permute.xlu0 %111 }
  0x98   :  { %v127_v8 = vpop.permute.xlu1 %126 }
  0x99   :  { %v122_v57 = vpop.permute.xlu0 %121 }
  0x9c   :  { %v137_v34 = vpop.permute.xlu1 %136 }
  0x9d   :  { %v132_v13 = vpop.permute.xlu0 %131 }
  0xa3   :  { %v142_v39 = vpop.permute.xlu0 %141 }
  0xf5   :  { %v613_v58 = vpop.f32.mrb[0].mxu0  ;;  %v637_v59 = vpop.f32.mrb[0].mxu1 }
  0xf6   :  { %v614_v60 = vpop.f32.mrb[1].mxu0  ;;  %v638_v61 = vpop.f32.mrb[1].mxu1 }
  0xf7   :  { %v615_v62 = vadd.f32 %v614_v60, %v613_v58  ;;  %v639_v63 = vadd.f32 %v638_v61, %v637_v59  ;;  %v616_v0 = vpop.f32.mrb[2].mxu0  ;;  %v640_v1 = vpop.f32.mrb[2].mxu1 }
  0xf8   :  { %v617_v2 = vpop.f32.mrb[3].mxu0  ;;  %v641_v3 = vpop.f32.mrb[3].mxu1 }
  0xf9   :  { %v370_v4 = vadd.f32 %v615_v62, %v82_v49  ;;  %v402_v5 = vadd.f32 %v639_v63, %v122_v57  ;;  %v618_v6 = vadd.f32 %v617_v2, %v616_v0  ;;  %v642_v7 = vadd.f32 %v641_v3, %v640_v1  ;;  %v147_v0 = vpop.permute.xlu1 %146 }
  0xfb   :  { %v432_v9 = vmax.f32 %v370_v4, 0.0  ;;  %v440_v10 = vmax.f32 %v402_v5, 0.0  ;;  %v373_v11 = vadd.f32 %v618_v6, %v87_v51  ;;  %v405_v12 = vadd.f32 %v642_v7, %v127_v8  ;;  %v152_v5 = vpop.permute.xlu0 %151 }
  0xfd   :  { %v581_v14 = vpack.c.bf16 %v432_v9, %v432_v9  ;;  %v589_v15 = vpack.c.bf16 %v440_v10, %v440_v10  ;;  %v433_v16 = vmax.f32 %v373_v11, 0.0  ;;  %v441_v17 = vmax.f32 %v405_v12, 0.0  ;;  %v619_v18 = vpop.f32.mrb[4].mxu0  ;;  %v643_v19 = vpop.f32.mrb[4].mxu1 }
  0xfe   :  { %v620_v20 = vpop.f32.mrb[5].mxu0  ;;  %v644_v21 = vpop.f32.mrb[5].mxu1 }
  0xff   :  { %513 = vst.msk [vmem:[%s964_s3] sm:$0xf] %vm512_vm0, %v581_v14  ;;  %521 = vst.msk [vmem:[%s964_s3 + $0x20] sm:$0xf] %vm512_vm0, %v589_v15  ;;  %v582_v22 = vpack.c.bf16 %v433_v16, %v433_v16  ;;  %v590_v23 = vpack.c.bf16 %v441_v17, %v441_v17  ;;  %v621_v24 = vadd.f32 %v620_v20, %v619_v18  ;;  %v622_v26 = vpop.f32.mrb[6].mxu0  ;;  %v646_v27 = vpop.f32.mrb[6].mxu1 }
 0x100   :  { %v645_v25 = vadd.f32 %v644_v21, %v643_v19  ;;  %v623_v28 = vpop.f32.mrb[7].mxu0  ;;  %v647_v29 = vpop.f32.mrb[7].mxu1 }
 0x101   :  { %514 = vst.msk [vmem:[%s964_s3 + $0x4] sm:$0xf] %vm512_vm0, %v582_v22  ;;  %522 = vst.msk [vmem:[%s964_s3 + $0x24] sm:$0xf] %vm512_vm0, %v590_v23  ;;  %v378_v30 = vadd.f32 %v621_v24, %v92_v50  ;;  %v624_v32 = vadd.f32 %v623_v28, %v622_v26  ;;  %v648_v33 = vadd.f32 %v647_v29, %v646_v27  ;;  %v157_v24 = vpop.permute.xlu1 %156 }
 0x102   :  { %v410_v31 = vadd.f32 %v645_v25, %v132_v13 }
 0x103   :  { %v434_v35 = vmax.f32 %v378_v30, 0.0  ;;  %v381_v37 = vadd.f32 %v624_v32, %v97_v52  ;;  %v413_v38 = vadd.f32 %v648_v33, %v137_v34 }
 0x104   :  { %v442_v36 = vmax.f32 %v410_v31, 0.0 }
 0x105   :  { %v583_v40 = vpack.c.bf16 %v434_v35, %v434_v35  ;;  %v435_v42 = vmax.f32 %v381_v37, 0.0  ;;  %v443_v43 = vmax.f32 %v413_v38, 0.0  ;;  %v625_v44 = vpop.f32.mrb[8].mxu0  ;;  %v649_v45 = vpop.f32.mrb[8].mxu1 }
 0x106   :  { %v591_v41 = vpack.c.bf16 %v442_v36, %v442_v36  ;;  %v626_v46 = vpop.f32.mrb[9].mxu0  ;;  %v650_v47 = vpop.f32.mrb[9].mxu1 }
 0x107   :  { %515 = vst.msk [vmem:[%s964_s3 + $0x8] sm:$0xf] %vm512_vm0, %v583_v40  ;;  %v584_v48 = vpack.c.bf16 %v435_v42, %v435_v42  ;;  %v592_v49 = vpack.c.bf16 %v443_v43, %v443_v43  ;;  %v627_v50 = vadd.f32 %v626_v46, %v625_v44  ;;  %v651_v51 = vadd.f32 %v650_v47, %v649_v45  ;;  %v628_v52 = vpop.f32.mrb[10].mxu0  ;;  %v652_v57 = vpop.f32.mrb[10].mxu1 }
 0x108   :  { %523 = vst.msk [vmem:[%s964_s3 + $0x28] sm:$0xf] %vm512_vm0, %v591_v41  ;;  %v629_v58 = vpop.f32.mrb[11].mxu0  ;;  %v653_v59 = vpop.f32.mrb[11].mxu1 }
 0x109   :  { %516 = vst.msk [vmem:[%s964_s3 + $0xc] sm:$0xf] %vm512_vm0, %v584_v48  ;;  %524 = vst.msk [vmem:[%s964_s3 + $0x2c] sm:$0xf] %vm512_vm0, %v592_v49  ;;  %v386_v60 = vadd.f32 %v627_v50, %v885_v53  ;;  %v418_v61 = vadd.f32 %v651_v51, %v142_v39  ;;  %v630_v62 = vadd.f32 %v629_v58, %v628_v52 }
 0x10a   :  { %v654_v63 = vadd.f32 %v653_v59, %v652_v57 }
 0x10b   :  { %v436_v1 = vmax.f32 %v386_v60, 0.0  ;;  %v444_v2 = vmax.f32 %v418_v61, 0.0  ;;  %v389_v3 = vadd.f32 %v630_v62, %v887_v54 }
 0x10c   :  { %v421_v4 = vadd.f32 %v654_v63, %v147_v0 }
 0x10d   :  { %v585_v6 = vpack.c.bf16 %v436_v1, %v436_v1  ;;  %v593_v7 = vpack.c.bf16 %v444_v2, %v444_v2  ;;  %v437_v8 = vmax.f32 %v389_v3, 0.0  ;;  %v631_v10 = vpop.f32.mrb[12].mxu0  ;;  %v655_v11 = vpop.f32.mrb[12].mxu1 }
 0x10e   :  { %v445_v9 = vmax.f32 %v421_v4, 0.0  ;;  %v632_v12 = vpop.f32.mrb[13].mxu0  ;;  %v656_v13 = vpop.f32.mrb[13].mxu1 }
 0x10f   :  { %517 = vst.msk [vmem:[%s964_s3 + $0x10] sm:$0xf] %vm512_vm0, %v585_v6  ;;  %525 = vst.msk [vmem:[%s964_s3 + $0x30] sm:$0xf] %vm512_vm0, %v593_v7  ;;  %v586_v53 = vpack.c.bf16 %v437_v8, %v437_v8  ;;  %v633_v14 = vadd.f32 %v632_v12, %v631_v10  ;;  %v657_v15 = vadd.f32 %v656_v13, %v655_v11  ;;  %v634_v16 = vpop.f32.mrb[14].mxu0  ;;  %v658_v17 = vpop.f32.mrb[14].mxu1 }
 0x110   :  { %v594_v54 = vpack.c.bf16 %v445_v9, %v445_v9  ;;  %v635_v18 = vpop.f32.mrb[15].mxu0  ;;  %v659_v19 = vpop.f32.mrb[15].mxu1 }
 0x111   :  { %518 = vst.msk [vmem:[%s964_s3 + $0x14] sm:$0xf] %vm512_vm0, %v586_v53  ;;  %v394_v20 = vadd.f32 %v633_v14, %v889_v55  ;;  %v426_v21 = vadd.f32 %v657_v15, %v152_v5  ;;  %v636_v22 = vadd.f32 %v635_v18, %v634_v16  ;;  %v660_v23 = vadd.f32 %v659_v19, %v658_v17 }
 0x112   :  { %526 = vst.msk [vmem:[%s964_s3 + $0x34] sm:$0xf] %vm512_vm0, %v594_v54 }
 0x113   :  { %v438_v25 = vmax.f32 %v394_v20, 0.0  ;;  %v446_v26 = vmax.f32 %v426_v21, 0.0  ;;  %v397_v27 = vadd.f32 %v636_v22, %v891_v56  ;;  %v429_v28 = vadd.f32 %v660_v23, %v157_v24 }
 0x115   :  { %v587_v29 = vpack.c.bf16 %v438_v25, %v438_v25  ;;  %v595_v30 = vpack.c.bf16 %v446_v26, %v446_v26  ;;  %v439_v31 = vmax.f32 %v397_v27, 0.0  ;;  %v447_v32 = vmax.f32 %v429_v28, 0.0 }
 0x117   :  { %519 = vst.msk [vmem:[%s964_s3 + $0x18] sm:$0xf] %vm512_vm0, %v587_v29  ;;  %527 = vst.msk [vmem:[%s964_s3 + $0x38] sm:$0xf] %vm512_vm0, %v595_v30  ;;  %v588_v55 = vpack.c.bf16 %v439_v31, %v439_v31  ;;  %v596_v33 = vpack.c.bf16 %v447_v32, %v447_v32 }
 0x119   :  { %520 = vst.msk [vmem:[%s964_s3 + $0x1c] sm:$0xf] %vm512_vm0, %v588_v55  ;;  %528 = vst.msk [vmem:[%s964_s3 + $0x3c] sm:$0xf] %vm512_vm0, %v596_v33 }

// kernel: autoencoder_forward.12
= control target key start
LH: loop header
LB: loop body
LE: loop exit
PB: predicated region body
PF: predicated region fallthrough
CT: control target
= control target key end

     0   :  { %v653_v1 = vmov 0   ;;  %vm498_vm0 = vcmask 519168   ;;  %s854_s1 = inlined_call_operand.vmem [shape: bf16[128,320], index: 1, kind: input, shape index: {}]   ;;  %s855_s0 = inlined_call_operand.vmem [shape: bf16[64,128], index: 0, kind: input, shape index: {}]   ;;  %s856_s2 = inlined_call_operand.vmem [shape: f32[64,1], index: 2, kind: input, shape index: {}]   ;;  %s857_s3 = inlined_call_operand.vmem [shape: bf16[64,320], index: 3, kind: output, shape index: {}]  }
   0x1   :  { %v617_v0 = vld [vmem:[%s854_s1 + $0x4] ss:$12 sps:$4 sm:$0xff]   ;;  %287 = vmatprep.mubr.bf16.mxu0 %v653_v1  ;;  %615 = vset.pattern.permute.xlu0 %v653_v1  ;;  %v619_v2 = vld [vmem:[%s854_s1] ss:$12 sps:$4 sm:$0xff]   ;;  %v620_v3 = vld [vmem:[%s854_s1 + $0x1c] ss:$12 sps:$4 sm:$0xff]  }
   0x2   :  { %616 = vset.pattern.permute.xlu1 %v653_v1  ;;  %255 = vmatprep.subr.bf16.mxu0 %v617_v0  ;;  %v622_v4 = vld [vmem:[%s854_s1 + $0x8] ss:$12 sps:$4 sm:$0xff]   ;;  %v623_v5 = vld [vmem:[%s854_s1 + $0x18] ss:$12 sps:$4 sm:$0xff]   ;;  %v626_v7 = vld [vmem:[%s854_s1 + $0x20] ss:$12 sps:$4 sm:$0xff]  }
   0x3   :  { %256 = vmatpush1.bf16.msra.mxu0 %v619_v2  ;;  %v624_v6 = vld [vmem:[%s854_s1 + $0x34] ss:$12 sps:$4 sm:$0xff]   ;;  %590 = vmatprep.subr.bf16.mxu1 %v622_v4  ;;  %v627_v8 = vld [vmem:[%s854_s1 + $0x30] ss:$12 sps:$4 sm:$0xff]   ;;  %v630_v9 = vld [vmem:[%s854_s1 + $0x38] ss:$12 sps:$4 sm:$0xff]  }
   0x4   :  { %257 = vmatprep.subr.bf16.mxu0 %v620_v3  ;;  %591 = vmatpush3.bf16.msra.mxu1 %v622_v4  ;;  %v628_v10 = vld [vmem:[%s854_s1 + $0x4c] ss:$12 sps:$4 sm:$0xff]   ;;  %v631_v11 = vld [vmem:[%s854_s1 + $0x48] ss:$12 sps:$4 sm:$0xff]   ;;  %v634_v12 = vld [vmem:[%s854_s1 + $0x50] ss:$12 sps:$4 sm:$0xff]  }
   0x5   :  { %592 = vmatprep.subr.bf16.mxu1 %v626_v7  ;;  %v632_v13 = vld [vmem:[%s854_s1 + $0x64] ss:$12 sps:$4 sm:$0xff]   ;;  %v635_v14 = vld [vmem:[%s854_s1 + $0x60] ss:$12 sps:$4 sm:$0xff]   ;;  %v638_v15 = vld [vmem:[%s854_s1 + $0x68] ss:$12 sps:$4 sm:$0xff]  }
   0x6   :  { %v636_v16 = vld [vmem:[%s854_s1 + $0x7c] ss:$12 sps:$4 sm:$0xff]   ;;  %v639_v17 = vld [vmem:[%s854_s1 + $0x78] ss:$12 sps:$4 sm:$0xff]   ;;  %v642_v19 = vld [vmem:[%s854_s1 + $0x80] ss:$12 sps:$4 sm:$0xff]  }
   0x7   :  { %258 = vmatpush1.bf16.msra.mxu0 %v623_v5  ;;  %v648_v18 = vld [vmem:[%s855_s0] sm:$0xff]   ;;  %v643_v22 = vld [vmem:[%s854_s1 + $0x90] ss:$12 sps:$4 sm:$0xff]   ;;  %v644_v25 = vld [vmem:[%s854_s1 + $0xac] ss:$12 sps:$4 sm:$0xff]  }
   0x8   :  { %259 = vmatprep.subr.bf16.mxu0 %v624_v6  ;;  %593 = vmatpush3.bf16.msra.mxu1 %v626_v7  ;;  %v640_v20 = vld [vmem:[%s854_s1 + $0x94] ss:$12 sps:$4 sm:$0xff]   ;;  %v646_v23 = vld [vmem:[%s854_s1 + $0x98] ss:$12 sps:$4 sm:$0xff]   ;;  %v56_v26 = vld [vmem:[%s856_s2 + $0x8] sm:$0xff] }
   0x9   :  { %594 = vmatprep.subr.bf16.mxu1 %v630_v9  ;;  %606 = vmatprep.mubr.bf16.mxu1 %v648_v18  ;;  %v55_v21 = vld [vmem:[%s856_s2] sm:$0xff]  ;;  %v57_v24 = vld [vmem:[%s856_s2 + $0x10] sm:$0xff]  ;;  %v58_v27 = vld [vmem:[%s856_s2 + $0x18] sm:$0xff] }
   0xa   :  { %65 = vperm.xlu0 %615, %v55_v21   ;;  %75 = vperm.xlu1 %616, %v57_v24   ;;  %v647_v28 = vld [vmem:[%s854_s1 + $0xa8] ss:$12 sps:$4 sm:$0xff]   ;;  %v649_v29 = vld [vmem:[%s854_s1 + $0xb0] ss:$12 sps:$4 sm:$0xff]   ;;  %v59_v30 = vld [vmem:[%s856_s2 + $0x20] sm:$0xff] }
   0xb   :  { %260 = vmatpush1.bf16.msra.mxu0 %v627_v8  ;;  %v60_v31 = vld [vmem:[%s856_s2 + $0x28] sm:$0xff]  ;;  %v61_v33 = vld [vmem:[%s856_s2 + $0x30] sm:$0xff]  ;;  %v62_v35 = vld [vmem:[%s856_s2 + $0x38] sm:$0xff] }
   0xc   :  { %261 = vmatprep.subr.bf16.mxu0 %v628_v10  ;;  %595 = vmatpush3.bf16.msra.mxu1 %v630_v9  ;;  %v650_v32 = vld [vmem:[%s855_s0 + $0x8] sm:$0xff]   ;;  %v651_v34 = vld [vmem:[%s855_s0 + $0x10] sm:$0xff]   ;;  %v652_v36 = vld [vmem:[%s855_s0 + $0x18] sm:$0xff]  }
   0xd   :  { %596 = vmatprep.subr.bf16.mxu1 %v634_v12 }
   0xe   :  { %70 = vperm.xlu0 %615, %v56_v26   ;;  %80 = vperm.xlu1 %616, %v58_v27  }
   0xf   :  { %262 = vmatpush1.bf16.msra.mxu0 %v631_v11 }
  0x10   :  { %263 = vmatprep.subr.bf16.mxu0 %v632_v13  ;;  %597 = vmatpush3.bf16.msra.mxu1 %v634_v12 }
  0x11   :  { %598 = vmatprep.subr.bf16.mxu1 %v638_v15 }
  0x12   :  { %85 = vperm.xlu0 %615, %v59_v30   ;;  %90 = vperm.xlu1 %616, %v60_v31  }
  0x13   :  { %264 = vmatpush1.bf16.msra.mxu0 %v635_v14 }
  0x14   :  { %265 = vmatprep.subr.bf16.mxu0 %v636_v16  ;;  %599 = vmatpush3.bf16.msra.mxu1 %v638_v15 }
  0x15   :  { %600 = vmatprep.subr.bf16.mxu1 %v642_v19 }
  0x16   :  { %95 = vperm.xlu0 %615, %v61_v33   ;;  %100 = vperm.xlu1 %616, %v62_v35  }
  0x17   :  { %266 = vmatpush1.bf16.msra.mxu0 %v639_v17 }
  0x18   :  { %267 = vmatprep.subr.bf16.mxu0 %v640_v20  ;;  %601 = vmatpush3.bf16.msra.mxu1 %v642_v19 }
  0x19   :  { %602 = vmatprep.subr.bf16.mxu1 %v646_v23 }
  0x1b   :  { %268 = vmatpush1.bf16.msra.mxu0 %v643_v22 }
  0x1c   :  { %269 = vmatprep.subr.bf16.mxu0 %v644_v25  ;;  %603 = vmatpush3.bf16.msra.mxu1 %v646_v23 }
  0x1d   :  { %604 = vmatprep.subr.bf16.mxu1 %v649_v29 }
  0x1f   :  { %270 = vmatpush1.bf16.msra.mxu0 %v647_v28 }
  0x20   :  { %605 = vmatpush3.bf16.msra.mxu1 %v649_v29 }
  0x22   :  { %288 = vmatmul.mubr.bf16.vlgmr.msra.gmra.mrb[0].mxu0 %v648_v18 }
  0x23   :  { %297 = vmatprep.mubr.bf16.mxu0 %v653_v1  ;;  %607 = vmatmul.mubr.bf16.vlgmr.msra.gmra.mrb[0].mxu1 %v650_v32 }
  0x24   :  { %610 = vmatprep.mubr.bf16.mxu1 %v651_v34 }
  0x2a   :  { %298 = vmatmul.mubr.bf16.gmra.mrb[4].mxu0 %v650_v32 }
  0x2b   :  { %307 = vmatprep.mubr.bf16.mxu0 %v653_v1  ;;  %611 = vmatmul.mubr.bf16.gmra.mrb[4].mxu1 %v652_v36 }
  0x32   :  { %308 = vmatmul.mubr.bf16.gmra.mrb[8].mxu0 %v651_v34 }
  0x33   :  { %317 = vmatprep.mubr.bf16.mxu0 %v653_v1 }
  0x3a   :  { %318 = vmatmul.mubr.bf16.gmra.mrb[12].mxu0 %v652_v36 }
  0x89   :  { %v66_v37 = vpop.permute.xlu0 %65  ;;  %v76_v38 = vpop.permute.xlu1 %75 }
  0x8d   :  { %v71_v39 = vpop.permute.xlu0 %70  ;;  %v81_v40 = vpop.permute.xlu1 %80 }
  0x91   :  { %v788_v46 = vpop.permute.xlu0 %85  ;;  %v790_v55 = vpop.permute.xlu1 %90 }
  0x95   :  { %v96_v10 = vpop.permute.xlu0 %95  ;;  %v101_v14 = vpop.permute.xlu1 %100 }
  0xf5   :  { %v289_v41 = vpop.f32.mrb[0].mxu0 }
  0xf6   :  { %v290_v42 = vadd.f32 %v289_v41, %v66_v37  ;;  %v291_v43 = vpop.f32.mrb[1].mxu0  ;;  %v608_v50 = vpop.f32.mrb[0].mxu1 }
  0xf7   :  { %v292_v44 = vadd.f32 %v291_v43, %v66_v37  ;;  %v293_v45 = vpop.f32.mrb[2].mxu0  ;;  %v371_v53 = vadd.f32 %v608_v50, %v76_v38  ;;  %v362_v54 = vpop.f32.mrb[1].mxu1 }
  0xf8   :  { %v393_v47 = vmax.f32 %v290_v42, 0.0  ;;  %v294_v48 = vadd.f32 %v293_v45, %v71_v39  ;;  %v295_v49 = vpop.f32.mrb[3].mxu0  ;;  %v363_v57 = vadd.f32 %v362_v54, %v66_v37  ;;  %v609_v58 = vpop.f32.mrb[2].mxu1 }
  0xf9   :  { %v394_v51 = vmax.f32 %v292_v44, 0.0  ;;  %v296_v52 = vadd.f32 %v295_v49, %v71_v39  ;;  %v401_v61 = vmax.f32 %v371_v53, 0.0  ;;  %v374_v62 = vadd.f32 %v609_v58, %v81_v40  ;;  %v365_v63 = vpop.f32.mrb[3].mxu1 }
  0xfa   :  { %v396_v56 = vmax.f32 %v294_v48, 0.0  ;;  %v395_v0 = vmax.f32 %v363_v57, 0.0  ;;  %v366_v1 = vadd.f32 %v365_v63, %v71_v39 }
  0xfb   :  { %v562_v59 = vpack.c.bf16 %v394_v51, %v393_v47  ;;  %v397_v60 = vmax.f32 %v296_v52, 0.0  ;;  %v567_v4 = vpack.c.bf16 %v401_v61, %v401_v61  ;;  %v404_v5 = vmax.f32 %v374_v62, 0.0 }
  0xfc   :  { %v563_v8 = vpack.c.bf16 %v395_v0, %v395_v0  ;;  %v398_v9 = vmax.f32 %v366_v1, 0.0 }
  0xfd   :  { %497 = vst [vmem:[%s857_s3] sm:$0xff] %v562_v59  ;;  %v564_v2 = vpack.c.bf16 %v397_v60, %v396_v56  ;;  %v299_v3 = vpop.f32.mrb[4].mxu0  ;;  %503 = vst.msk [vmem:[%s857_s3 + $0x20] sm:$0xf] %vm498_vm0, %v567_v4  ;;  %v569_v13 = vpack.c.bf16 %v404_v5, %v404_v5 }
  0xfe   :  { %v300_v6 = vadd.f32 %v299_v3, %v76_v38  ;;  %v301_v7 = vpop.f32.mrb[5].mxu0  ;;  %499 = vst.msk [vmem:[%s857_s3 + $0x8] sm:$0xf] %vm498_vm0, %v563_v8  ;;  %v565_v18 = vpack.c.bf16 %v398_v9, %v398_v9  ;;  %v612_v19 = vpop.f32.mrb[4].mxu1 }
  0xff   :  { %500 = vst [vmem:[%s857_s3 + $0xc] sm:$0xff] %v564_v2  ;;  %v302_v11 = vadd.f32 %v301_v7, %v76_v38  ;;  %v303_v12 = vpop.f32.mrb[6].mxu0  ;;  %505 = vst.msk [vmem:[%s857_s3 + $0x2c] sm:$0xf] %vm498_vm0, %v569_v13  ;;  %v378_v22 = vpop.f32.mrb[5].mxu1  ;;  %v387_v23 = vadd.f32 %v612_v19, %v96_v10 }
 0x100   :  { %v399_v15 = vmax.f32 %v300_v6, 0.0  ;;  %v304_v16 = vadd.f32 %v303_v12, %v81_v40  ;;  %v305_v17 = vpop.f32.mrb[7].mxu0  ;;  %501 = vst.msk [vmem:[%s857_s3 + $0x14] sm:$0xf] %vm498_vm0, %v565_v18  ;;  %v379_v25 = vadd.f32 %v378_v22, %v788_v46  ;;  %v613_v26 = vpop.f32.mrb[6].mxu1 }
 0x101   :  { %v400_v20 = vmax.f32 %v302_v11, 0.0  ;;  %v306_v21 = vadd.f32 %v305_v17, %v81_v40  ;;  %v390_v29 = vadd.f32 %v613_v26, %v101_v14  ;;  %v413_v30 = vmax.f32 %v387_v23, 0.0  ;;  %v381_v31 = vpop.f32.mrb[7].mxu1 }
 0x102   :  { %v402_v24 = vmax.f32 %v304_v16, 0.0  ;;  %v407_v32 = vmax.f32 %v379_v25, 0.0  ;;  %v382_v33 = vadd.f32 %v381_v31, %v790_v55 }
 0x103   :  { %v566_v27 = vpack.c.bf16 %v400_v20, %v399_v15  ;;  %v403_v28 = vmax.f32 %v306_v21, 0.0  ;;  %v416_v35 = vmax.f32 %v390_v29, 0.0  ;;  %v575_v36 = vpack.c.bf16 %v413_v30, %v413_v30 }
 0x104   :  { %v571_v38 = vpack.c.bf16 %v407_v32, %v407_v32  ;;  %v410_v39 = vmax.f32 %v382_v33, 0.0 }
 0x105   :  { %502 = vst [vmem:[%s857_s3 + $0x18] sm:$0xff] %v566_v27  ;;  %v568_v34 = vpack.c.bf16 %v403_v28, %v402_v24  ;;  %v309_v37 = vpop.f32.mrb[8].mxu0  ;;  %v577_v42 = vpack.c.bf16 %v416_v35, %v416_v35  ;;  %511 = vst.msk [vmem:[%s857_s3 + $0x50] sm:$0xf] %vm498_vm0, %v575_v36 }
 0x106   :  { %v310_v40 = vadd.f32 %v309_v37, %v788_v46  ;;  %v311_v41 = vpop.f32.mrb[9].mxu0  ;;  %507 = vst.msk [vmem:[%s857_s3 + $0x38] sm:$0xf] %vm498_vm0, %v571_v38  ;;  %v573_v45 = vpack.c.bf16 %v410_v39, %v410_v39 }
 0x107   :  { %504 = vst [vmem:[%s857_s3 + $0x24] sm:$0xff] %v568_v34  ;;  %v312_v43 = vadd.f32 %v311_v41, %v788_v46  ;;  %v313_v44 = vpop.f32.mrb[10].mxu0  ;;  %513 = vst.msk [vmem:[%s857_s3 + $0x5c] sm:$0xf] %vm498_vm0, %v577_v42 }
 0x108   :  { %v405_v47 = vmax.f32 %v310_v40, 0.0  ;;  %v314_v48 = vadd.f32 %v313_v44, %v790_v55  ;;  %v315_v49 = vpop.f32.mrb[11].mxu0  ;;  %509 = vst.msk [vmem:[%s857_s3 + $0x44] sm:$0xf] %vm498_vm0, %v573_v45 }
 0x109   :  { %v406_v50 = vmax.f32 %v312_v43, 0.0  ;;  %v316_v51 = vadd.f32 %v315_v49, %v790_v55 }
 0x10a   :  { %v408_v46 = vmax.f32 %v314_v48, 0.0 }
 0x10b   :  { %v570_v52 = vpack.c.bf16 %v406_v50, %v405_v47  ;;  %v409_v53 = vmax.f32 %v316_v51, 0.0 }
 0x10d   :  { %506 = vst [vmem:[%s857_s3 + $0x30] sm:$0xff] %v570_v52  ;;  %v572_v54 = vpack.c.bf16 %v409_v53, %v408_v46  ;;  %v319_v56 = vpop.f32.mrb[12].mxu0 }
 0x10e   :  { %v320_v57 = vadd.f32 %v319_v56, %v96_v10  ;;  %v321_v58 = vpop.f32.mrb[13].mxu0 }
 0x10f   :  { %508 = vst [vmem:[%s857_s3 + $0x3c] sm:$0xff] %v572_v54  ;;  %v322_v55 = vadd.f32 %v321_v58, %v96_v10  ;;  %v323_v59 = vpop.f32.mrb[14].mxu0 }
 0x110   :  { %v411_v60 = vmax.f32 %v320_v57, 0.0  ;;  %v324_v61 = vadd.f32 %v323_v59, %v101_v14  ;;  %v325_v62 = vpop.f32.mrb[15].mxu0 }
 0x111   :  { %v412_v63 = vmax.f32 %v322_v55, 0.0  ;;  %v326_v0 = vadd.f32 %v325_v62, %v101_v14 }
 0x112   :  { %v414_v1 = vmax.f32 %v324_v61, 0.0 }
 0x113   :  { %v574_v2 = vpack.c.bf16 %v412_v63, %v411_v60  ;;  %v415_v3 = vmax.f32 %v326_v0, 0.0 }
 0x115   :  { %510 = vst [vmem:[%s857_s3 + $0x48] sm:$0xff] %v574_v2  ;;  %v576_v4 = vpack.c.bf16 %v415_v3, %v414_v1 }
 0x117   :  { %512 = vst [vmem:[%s857_s3 + $0x54] sm:$0xff] %v576_v4 }

// kernel: autoencoder_forward.13
= control target key start
LH: loop header
LB: loop body
LE: loop exit
PB: predicated region body
PF: predicated region fallthrough
CT: control target
= control target key end

     0   :  { %v757_v1 = vmov 0   ;;  %vm262_vm0 = vcmask 523264   ;;  %s937_s1 = inlined_call_operand.vmem [shape: bf16[64,1280], index: 1, kind: input, shape index: {}]   ;;  %s938_s0 = inlined_call_operand.vmem [shape: bf16[4,64], index: 0, kind: input, shape index: {}]   ;;  %s939_s2 = inlined_call_operand.vmem [shape: f32[4,1], index: 2, kind: input, shape index: {}]   ;;  %s940_s3 = inlined_call_operand.vmem [shape: bf16[4,1280], index: 3, kind: output, shape index: {}]  }
   0x1   :  { %v657_v0 = vld [vmem:[%s937_s1 + $0x4] ss:$40 sps:$4 sm:$0xff]   ;;  %298 = vmatprep.mubr.bf16.mxu0 %v757_v1  ;;  %339 = vmatprep.mubr.bf16.mxu1 %v757_v1  ;;  %v661_v3 = vld [vmem:[%s937_s1] ss:$40 sps:$4 sm:$0xff]   ;;  %v663_v5 = vld [vmem:[%s937_s1 + $0x54] ss:$40 sps:$4 sm:$0xff]  }
   0x2   :  { %v659_v2 = vld [vmem:[%s937_s1 + $0xc] ss:$40 sps:$4 sm:$0xff]   ;;  %656 = vset.pattern.permute.xlu0 %v757_v1  ;;  %266 = vmatprep.subr.bf16.mxu0 %v657_v0  ;;  %v662_v4 = vld [vmem:[%s937_s1 + $0x8] ss:$40 sps:$4 sm:$0xff]   ;;  %v665_v6 = vld [vmem:[%s937_s1 + $0x5c] ss:$40 sps:$4 sm:$0xff]  }
   0x3   :  { %307 = vmatprep.subr.bf16.mxu1 %v659_v2  ;;  %267 = vmatpush1.bf16.msra.mxu0 %v661_v3  ;;  %v667_v7 = vld [vmem:[%s937_s1 + $0x50] ss:$40 sps:$4 sm:$0xff]   ;;  %v669_v9 = vld [vmem:[%s937_s1 + $0xa4] ss:$40 sps:$4 sm:$0xff]   ;;  %v673_v11 = vld [vmem:[%s937_s1 + $0xa0] ss:$40 sps:$4 sm:$0xff]  }
   0x4   :  { %308 = vmatpush1.bf16.msra.mxu1 %v662_v4  ;;  %268 = vmatprep.subr.bf16.mxu0 %v663_v5  ;;  %v668_v8 = vld [vmem:[%s937_s1 + $0x58] ss:$40 sps:$4 sm:$0xff]   ;;  %v671_v10 = vld [vmem:[%s937_s1 + $0xac] ss:$40 sps:$4 sm:$0xff]   ;;  %v674_v12 = vld [vmem:[%s937_s1 + $0xa8] ss:$40 sps:$4 sm:$0xff]  }
   0x5   :  { %309 = vmatprep.subr.bf16.mxu1 %v665_v6  ;;  %v675_v13 = vld [vmem:[%s937_s1 + $0xf4] ss:$40 sps:$4 sm:$0xff]   ;;  %v679_v15 = vld [vmem:[%s937_s1 + $0xf0] ss:$40 sps:$4 sm:$0xff]   ;;  %v15_v19 = vld [vmem:[%s938_s0] sm:$0x3] }
   0x6   :  { %v677_v14 = vld [vmem:[%s937_s1 + $0xfc] ss:$40 sps:$4 sm:$0xff]   ;;  %v680_v16 = vld [vmem:[%s937_s1 + $0xf8] ss:$40 sps:$4 sm:$0xff]   ;;  %v692_v23 = vld [vmem:[%s937_s1 + $0x6c] ss:$40 sps:$4 sm:$0xff]  }
   0x7   :  { %269 = vmatpush1.bf16.msra.mxu0 %v667_v7  ;;  %v683_v17 = vld [vmem:[%s937_s1 + $0x14] ss:$40 sps:$4 sm:$0xff]   ;;  %v681_v20 = vld [vmem:[%s937_s1 + $0x10] ss:$40 sps:$4 sm:$0xff]   ;;  %v689_v22 = vld [vmem:[%s937_s1 + $0x64] ss:$40 sps:$4 sm:$0xff]  }
   0x8   :  { %310 = vmatpush1.bf16.msra.mxu1 %v668_v8  ;;  %270 = vmatprep.subr.bf16.mxu0 %v669_v9  ;;  %v686_v18 = vld [vmem:[%s937_s1 + $0x1c] ss:$40 sps:$4 sm:$0xff]   ;;  %v684_v21 = vld [vmem:[%s937_s1 + $0x18] ss:$40 sps:$4 sm:$0xff]   ;;  %v690_v25 = vld [vmem:[%s937_s1 + $0x68] ss:$40 sps:$4 sm:$0xff]  }
   0x9   :  { %311 = vmatprep.subr.bf16.mxu1 %v671_v10  ;;  %v687_v24 = vld [vmem:[%s937_s1 + $0x60] ss:$40 sps:$4 sm:$0xff]   ;;  %v695_v26 = vld [vmem:[%s937_s1 + $0xb4] ss:$40 sps:$4 sm:$0xff]   ;;  %v693_v28 = vld [vmem:[%s937_s1 + $0xb0] ss:$40 sps:$4 sm:$0xff]  }
   0xa   :  { %v698_v27 = vld [vmem:[%s937_s1 + $0xbc] ss:$40 sps:$4 sm:$0xff]   ;;  %v696_v29 = vld [vmem:[%s937_s1 + $0xb8] ss:$40 sps:$4 sm:$0xff]   ;;  %v704_v31 = vld [vmem:[%s937_s1 + $0x10c] ss:$40 sps:$4 sm:$0xff]  }
   0xb   :  { %271 = vmatpush1.bf16.msra.mxu0 %v673_v11  ;;  %v701_v30 = vld [vmem:[%s937_s1 + $0x104] ss:$40 sps:$4 sm:$0xff]   ;;  %v56_v32 = vld [vmem:[%s939_s2] sm:$0xf]  ;;  %v702_v34 = vld [vmem:[%s937_s1 + $0x108] ss:$40 sps:$4 sm:$0xff]  }
   0xc   :  { %312 = vmatpush1.bf16.msra.mxu1 %v674_v12  ;;  %272 = vmatprep.subr.bf16.mxu0 %v675_v13  ;;  %v699_v33 = vld [vmem:[%s937_s1 + $0x100] ss:$40 sps:$4 sm:$0xff]   ;;  %v707_v35 = vld [vmem:[%s937_s1 + $0x24] ss:$40 sps:$4 sm:$0xff]   ;;  %v710_v37 = vld [vmem:[%s937_s1 + $0x74] ss:$40 sps:$4 sm:$0xff]  }
   0xd   :  { %313 = vmatprep.subr.bf16.mxu1 %v677_v14  ;;  %59 = vperm.xlu0 %656, %v56_v32   ;;  %v705_v36 = vld [vmem:[%s937_s1 + $0x20] ss:$40 sps:$4 sm:$0xff]   ;;  %v708_v38 = vld [vmem:[%s937_s1 + $0x70] ss:$40 sps:$4 sm:$0xff]   ;;  %v713_v39 = vld [vmem:[%s937_s1 + $0xc4] ss:$40 sps:$4 sm:$0xff]  }
   0xe   :  { %v711_v40 = vld [vmem:[%s937_s1 + $0xc0] ss:$40 sps:$4 sm:$0xff]   ;;  %v716_v41 = vld [vmem:[%s937_s1 + $0x114] ss:$40 sps:$4 sm:$0xff]   ;;  %v714_v42 = vld [vmem:[%s937_s1 + $0x110] ss:$40 sps:$4 sm:$0xff]  }
   0xf   :  { %273 = vmatpush1.bf16.msra.mxu0 %v679_v15 }
  0x10   :  { %314 = vmatpush1.bf16.msra.mxu1 %v680_v16  ;;  %348 = vmatprep.subr.bf16.mxu0 %v683_v17 }
  0x11   :  { %389 = vmatprep.subr.bf16.mxu1 %v686_v18 }
  0x12   :  { %643 = vmatmul.mubr.msk.bf16.vlgmr.msra.gmra.mrb[0].mxu0 %vm262_vm0, %v15_v19 }
  0x13   :  { %644 = vmatmul.mubr.msk.bf16.vlgmr.msra.gmra.mrb[0].mxu1 %vm262_vm0, %v15_v19  ;;  %349 = vmatpush1.bf16.msra.mxu0 %v681_v20 }
  0x14   :  { %390 = vmatpush1.bf16.msra.mxu1 %v684_v21  ;;  %350 = vmatprep.subr.bf16.mxu0 %v689_v22 }
  0x15   :  { %391 = vmatprep.subr.bf16.mxu1 %v692_v23  ;;  %380 = vmatprep.mubr.bf16.mxu0 %v757_v1 }
  0x16   :  { %421 = vmatprep.mubr.bf16.mxu1 %v757_v1 }
  0x17   :  { %351 = vmatpush1.bf16.msra.mxu0 %v687_v24 }
  0x18   :  { %392 = vmatpush1.bf16.msra.mxu1 %v690_v25  ;;  %352 = vmatprep.subr.bf16.mxu0 %v695_v26 }
  0x19   :  { %393 = vmatprep.subr.bf16.mxu1 %v698_v27  ;;  %v758_v27 = vmov 1983009808  }
  0x1b   :  { %353 = vmatpush1.bf16.msra.mxu0 %v693_v28  ;;  %v554_v28 = vunpack.c.l.s4 %v758_v27 }
  0x1c   :  { %394 = vmatpush1.bf16.msra.mxu1 %v696_v29  ;;  %354 = vmatprep.subr.bf16.mxu0 %v701_v30  ;;  %v556_v29 = vlaneseq }
  0x1d   :  { %395 = vmatprep.subr.bf16.mxu1 %v704_v31  ;;  %v555_v31 = vunpack.c.0.s8 %v554_v28 }
  0x1e   :  { %v557_v32 = vshrl.u32 %v556_v29, 7 }
  0x1f   :  { %355 = vmatpush1.bf16.msra.mxu0 %v699_v33 }
  0x20   :  { %396 = vmatpush1.bf16.msra.mxu1 %v702_v34  ;;  %430 = vmatprep.subr.bf16.mxu0 %v707_v35  ;;  %v558_v35 = vsub.s32 %v555_v31, %v557_v32 }
  0x22   :  { %645 = vmatmul.mubr.msk.bf16.vlgmr.msra.gmra.mrb[4].mxu0 %vm262_vm0, %v15_v19 }
  0x23   :  { %646 = vmatmul.mubr.msk.bf16.vlgmr.msra.gmra.mrb[4].mxu1 %vm262_vm0, %v15_v19  ;;  %431 = vmatpush1.bf16.msra.mxu0 %v705_v36 }
  0x24   :  { %462 = vmatprep.mubr.bf16.mxu0 %v757_v1  ;;  %432 = vmatprep.subr.bf16.mxu0 %v710_v37 }
  0x27   :  { %433 = vmatpush1.bf16.msra.mxu0 %v708_v38 }
  0x28   :  { %434 = vmatprep.subr.bf16.mxu0 %v713_v39 }
  0x2b   :  { %435 = vmatpush1.bf16.msra.mxu0 %v711_v40 }
  0x2c   :  { %436 = vmatprep.subr.bf16.mxu0 %v716_v41 }
  0x2f   :  { %437 = vmatpush1.bf16.msra.mxu0 %v714_v42 }
  0x32   :  { %647 = vmatmul.mubr.msk.bf16.vlgmr.msra.gmra.mrb[8].mxu0 %vm262_vm0, %v15_v19 }
  0x8c   :  { %v916_v43 = vpop.permute.xlu0 %59 }
  0xe5   :  { %v300_v44 = vpop.f32.mrb[0].mxu0 }
  0xe6   :  { %v341_v45 = vpop.f32.mrb[0].mxu1  ;;  %v301_v46 = vadd.f32 %v300_v44, %v916_v43  ;;  %v302_v48 = vpop.f32.mrb[1].mxu0 }
  0xe7   :  { %v342_v47 = vadd.f32 %v341_v45, %v916_v43  ;;  %v343_v49 = vpop.f32.mrb[1].mxu1  ;;  %v303_v50 = vadd.f32 %v302_v48, %v916_v43  ;;  %v304_v52 = vpop.f32.mrb[2].mxu0 }
  0xe8   :  { %v344_v51 = vadd.f32 %v343_v49, %v916_v43  ;;  %v345_v53 = vpop.f32.mrb[2].mxu1  ;;  %v471_v54 = vsub.f32 0.0, %v301_v46  ;;  %v305_v56 = vpop.f32.mrb[3].mxu0 }
  0xe9   :  { %v473_v55 = vsub.f32 0.0, %v342_v47  ;;  %v346_v57 = vpop.f32.mrb[3].mxu1  ;;  %v472_v58 = vsub.f32 0.0, %v303_v50 }
  0xea   :  { %v474_v59 = vsub.f32 0.0, %v344_v51  ;;  %v481_v60 = vmul.f32 1.442695, %v471_v54 }
  0xeb   :  { %v485_v61 = vmul.f32 1.442695, %v473_v55  ;;  %v483_v62 = vmul.f32 1.442695, %v472_v58 }
  0xec   :  { %v487_v63 = vmul.f32 1.442695, %v474_v59  ;;  %717 = vpow2.f32 %v481_v60 }
  0xed   :  { %719 = vpow2.f32 %v485_v61 }
  0xee   :  { %721 = vpow2.f32 %v483_v62 }
  0xef   :  { %723 = vpow2.f32 %v487_v63 }
  0xf5   :  { %v382_v0 = vpop.f32.mrb[4].mxu0 }
  0xf6   :  { %v423_v1 = vpop.f32.mrb[4].mxu1  ;;  %v718_v2 = vpop.eup %717  ;;  %v383_v3 = vadd.f32 %v382_v0, %v916_v43 }
  0xf7   :  { %v424_v4 = vadd.f32 %v423_v1, %v916_v43  ;;  %v384_v5 = vpop.f32.mrb[5].mxu0  ;;  %v425_v6 = vpop.f32.mrb[5].mxu1  ;;  %v501_v8 = vadd.f32 1.0, %v718_v2 }
  0xf8   :  { %v720_v7 = vpop.eup %719  ;;  %v385_v9 = vadd.f32 %v384_v5, %v916_v43  ;;  %v426_v10 = vadd.f32 %v425_v6, %v916_v43  ;;  %v386_v11 = vpop.f32.mrb[6].mxu0  ;;  %v475_v15 = vsub.f32 0.0, %v383_v3 }
  0xf9   :  { %v427_v12 = vpop.f32.mrb[6].mxu1  ;;  %v722_v13 = vpop.eup %721  ;;  %v503_v14 = vadd.f32 1.0, %v720_v7  ;;  %v477_v16 = vsub.f32 0.0, %v424_v4  ;;  %725 = vrcp.f32 %v501_v8 }
  0xfa   :  { %v387_v17 = vpop.f32.mrb[7].mxu0  ;;  %v428_v18 = vpop.f32.mrb[7].mxu1  ;;  %v502_v20 = vadd.f32 1.0, %v722_v13  ;;  %v476_v21 = vsub.f32 0.0, %v385_v9  ;;  %v478_v22 = vsub.f32 0.0, %v426_v10 }
  0xfb   :  { %v724_v19 = vpop.eup %723  ;;  %727 = vrcp.f32 %v503_v14  ;;  %v489_v24 = vmul.f32 1.442695, %v475_v15  ;;  %v493_v25 = vmul.f32 1.442695, %v477_v16 }
  0xfc   :  { %v504_v23 = vadd.f32 1.0, %v724_v19  ;;  %729 = vrcp.f32 %v502_v20  ;;  %v491_v26 = vmul.f32 1.442695, %v476_v21  ;;  %v495_v30 = vmul.f32 1.442695, %v478_v22 }
  0xfe   :  { %731 = vrcp.f32 %v504_v23 }
  0xff   :  { %733 = vpow2.f32 %v489_v24 }
 0x100   :  { %735 = vpow2.f32 %v493_v25 }
 0x101   :  { %737 = vpow2.f32 %v491_v26 }
 0x102   :  { %739 = vpow2.f32 %v495_v30 }
 0x103   :  { %v726_v33 = vpop.eup %725 }
 0x105   :  { %v728_v34 = vpop.eup %727  ;;  %v464_v37 = vpop.f32.mrb[8].mxu0 }
 0x106   :  { %v730_v36 = vpop.eup %729  ;;  %v465_v40 = vadd.f32 %v464_v37, %v916_v43  ;;  %v466_v41 = vpop.f32.mrb[9].mxu0 }
 0x107   :  { %v648_v39 = vpack.c.bf16 %v730_v36, %v726_v33  ;;  %v467_v45 = vadd.f32 %v466_v41, %v916_v43  ;;  %v468_v46 = vpop.f32.mrb[10].mxu0 }
 0x108   :  { %v732_v38 = vpop.eup %731  ;;  %v479_v50 = vsub.f32 0.0, %v465_v40  ;;  %v469_v51 = vpop.f32.mrb[11].mxu0 }
 0x109   :  { %v734_v42 = vpop.eup %733  ;;  %v649_v44 = vpack.c.bf16 %v732_v38, %v728_v34  ;;  %v559_v48 = vrot.slane %v648_v39, %v558_v35  ;;  %v480_v55 = vsub.f32 0.0, %v467_v45 }
 0x10a   :  { %v736_v47 = vpop.eup %735  ;;  %v505_v49 = vadd.f32 1.0, %v734_v42  ;;  %v497_v58 = vmul.f32 1.442695, %v479_v50 }
 0x10b   :  { %v738_v52 = vpop.eup %737  ;;  %v566_v53 = vrot.slane %v649_v44, %v558_v35  ;;  %v507_v54 = vadd.f32 1.0, %v736_v47  ;;  %v499_v61 = vmul.f32 1.442695, %v480_v55 }
 0x10c   :  { %v740_v56 = vpop.eup %739  ;;  %741 = vrcp.f32 %v505_v49  ;;  %v506_v57 = vadd.f32 1.0, %v738_v52 }
 0x10d   :  { %v567_v59 = vcombine.low %v559_v48, %v566_v53  ;;  %743 = vrcp.f32 %v507_v54  ;;  %v508_v60 = vadd.f32 1.0, %v740_v56 }
 0x10e   :  { %745 = vrcp.f32 %v506_v57 }
 0x10f   :  { %747 = vrcp.f32 %v508_v60  ;;  %596 = vst [vmem:[%s940_s3] sm:$0xff] %v567_v59 }
 0x110   :  { %749 = vpow2.f32 %v497_v58 }
 0x111   :  { %751 = vpow2.f32 %v499_v61 }
 0x116   :  { %v742_v43 = vpop.eup %741 }
 0x117   :  { %v744_v62 = vpop.eup %743 }
 0x118   :  { %v746_v63 = vpop.eup %745 }
 0x119   :  { %v748_v0 = vpop.eup %747  ;;  %v650_v1 = vpack.c.bf16 %v746_v63, %v742_v43 }
 0x11a   :  { %v750_v2 = vpop.eup %749  ;;  %v651_v3 = vpack.c.bf16 %v748_v0, %v744_v62 }
 0x11b   :  { %v752_v4 = vpop.eup %751  ;;  %v576_v5 = vrot.slane %v650_v1, %v558_v35  ;;  %v509_v6 = vadd.f32 1.0, %v750_v2 }
 0x11c   :  { %v583_v7 = vrot.slane %v651_v3, %v558_v35  ;;  %v510_v8 = vadd.f32 1.0, %v752_v4 }
 0x11d   :  { %753 = vrcp.f32 %v509_v6 }
 0x11e   :  { %v584_v9 = vcombine.low %v576_v5, %v583_v7  ;;  %755 = vrcp.f32 %v510_v8 }
 0x120   :  { %597 = vst [vmem:[%s940_s3 + $0x8] sm:$0xff] %v584_v9 }
 0x127   :  { %v754_v10 = vpop.eup %753 }
 0x128   :  { %v756_v11 = vpop.eup %755 }
 0x129   :  { %v652_v12 = vpack.c.bf16 %v756_v11, %v754_v10 }
 0x12b   :  { %653 = vst.sshfl [vmem:[%s940_s3 + $0x10] sm:$0x33 pattern:$0x76325410] %v652_v12 }

</bundles_post_ra>
